<compile_context>
chip_gen: v7x
topology: tpu7x:2x2x1
jax: 0.10.0
libtpu: 0.0.40
codegen_flags: <defaults>
</compile_context>

<pallas_src>
import math
import functools

import jax
import jax.numpy as jnp
from jax.experimental import pallas as pl
from jax.experimental.pallas import tpu as pltpu


def _swap_leading(t, eq):
    """Swap the two leading axes of a rank-3 tensor (minor/lane dim unchanged).

    Uses pltpu.einshape (lane-layout-aware, single XLU pass) when available;
    falls back to jnp.swapaxes on older JAX versions.
    """
    if hasattr(pltpu, "einshape"):
        return pltpu.einshape(eq, t)
    return jnp.swapaxes(t, 0, 1)


def _evasion_attention_kernel(
    x_ref,             # (L, Nb, E)  seq-major block of hidden_states (f32)
    wx_ref, bx_ref,    # packed [W1^T | (s*Wq)^T | Wk^T]: (E, 3E) bf16, (1, 3E) f32
    w2_ref, b2_ref,    # evasion Linear #2, pre-transposed: (E, E) bf16, (1, E) f32
    wv_ref, bv_ref,    # MHA value projection, pre-transposed
    wo_ref, bo_ref,    # MHA output projection, pre-transposed
    o_ref,             # (L, Nb, E)  output block
    *, num_heads: int,
):
    f32, bf16 = jnp.float32, jnp.bfloat16
    L, Nb, E = x_ref.shape
    H = num_heads
    hd = E // H

    # (L, Nb, E) -> (Nb, L, E): one sublane relayout (lane dim untouched);
    # replaces the two wrapper-side HBM transposes of the previous version.
    x = _swap_leading(x_ref[...], "lne->nle").reshape(Nb * L, E).astype(bf16)

    # ---- fused x-side projections [h1 | q*scale | k]: ONE MXU pass ---------
    xproj = jnp.dot(x, wx_ref[...], preferred_element_type=f32) + bx_ref[...]
    h1 = jnp.maximum(xproj[:, :E], 0.0)          # evasion Linear #1 + ReLU (f32)
    q = xproj[:, E:2 * E]                        # 1/sqrt(hd) folded into wx/bx
    k = xproj[:, 2 * E:]

    # ---- evasion tail (Linear -> Tanh) and MHA value projection -------------
    ev = jnp.tanh(jnp.dot(h1.astype(bf16), w2_ref[...],
                          preferred_element_type=f32) + b2_ref[...])
    v = jnp.dot(ev.astype(bf16), wv_ref[...],
                preferred_element_type=f32) + bv_ref[...]

    # ---- head split: one reshape + one relayout per tensor (no per-head slicing)
    # (Nb*L, E) -> (Nb*L, H, hd) -> (H, Nb*L, hd) -> (H*Nb, L, hd)
    def to_heads(t):
        t = t.astype(bf16).reshape(Nb * L, H, hd)
        t = _swap_leading(t, "mhd->hmd")
        return t.reshape(H * Nb, L, hd)

    q3, k3, v3 = to_heads(q), to_heads(k), to_heads(v)

    # ---- attention batched over (head, batch) --------------------------------
    s = jnp.einsum("bqd,bkd->bqk", q3, k3, preferred_element_type=f32)
    s = s - jnp.max(s, axis=-1, keepdims=True)
    p = jnp.exp(s)
    # EUP reciprocal (approx): rows sum to 1 only to ~1e-3 rel. accuracy.
    p = p * pl.reciprocal(jnp.sum(p, axis=-1, keepdims=True), approx=True)
    ctx = jnp.einsum("bqk,bkd->bqd", p.astype(bf16), v3,
                     preferred_element_type=f32)              # (H*Nb, L, hd)

    # ---- merge heads back (inverse of to_heads: one relayout + reshapes) -----
    attn = _swap_leading(ctx.reshape(H, Nb * L, hd), "hmd->mhd").reshape(Nb * L, E)

    # ---- output projection and store in the module's (L, Nb, E) layout -------
    y = jnp.dot(attn.astype(bf16), wo_ref[...],
                preferred_element_type=f32) + bo_ref[...]     # (Nb*L, E)
    y = _swap_leading(y.reshape(Nb, L, E), "nle->lne")        # (L, Nb, E)
    o_ref[...] = y.astype(o_ref.dtype)


def _pick_batch_block(N):
    """Batch elements per grid step.

    Block (L, Nb, E) requires Nb % 8 == 0 or Nb == N (second-minor dim rule).
    Small batches are processed in a single step (amortizes per-step overhead
    and keeps both v7x TensorCores busy via the batch grid when N is larger).
    """
    if N <= 8:
        return N
    for nb in (64, 32, 16, 8):
        if N % nb == 0:
            return nb
    return N


def _pick_vmem_limit():
    """~48 MiB on v7x (64 MiB/TC physical), ~96 MiB on v5e/v6e (128 MiB)."""
    try:
        cap = pltpu.get_tpu_info().vmem_capacity_bytes
    except Exception:
        cap = 64 * 1024 * 1024
    return int(min(cap * 3 // 4, 96 * 1024 * 1024))


def detection_evasion_forward(hidden_states, attentions, params, *, num_heads=8):
    """hidden_states: (L, N, E) float32 (seq-major, like nn.MultiheadAttention).
    attentions: ignored (unused by the reference module's forward)."""
    del attentions  # unused by the reference module
    L, N, E = hidden_states.shape
    assert E % num_heads == 0
    head_dim = E // num_heads
    scale = 1.0 / math.sqrt(head_dim)

    (w1, b1, w2, b2, wq, bq, wk, bk, wv, bv, wo, bo) = params
    f32, bf16 = jnp.float32, jnp.bfloat16

    # One-time weight prep (plain XLA, outside the kernel): pre-transpose, pack
    # [W1 | s*Wq | Wk], fold the softmax scale into Wq/bq, cast matmul operands
    # to bf16 (biases stay f32; added after the f32 accumulation).
    wx = jnp.concatenate([w1.T, (wq * scale).T, wk.T], axis=1).astype(bf16)     # (E, 3E)
    bx = jnp.concatenate([b1, bq * scale, bk]).reshape(1, 3 * E).astype(f32)    # (1, 3E)
    w2t, wvt, wot = (w.T.astype(bf16) for w in (w2, wv, wo))
    b2r, bvr, bor = (b.reshape(1, E).astype(f32) for b in (b2, bv, bo))

    Nb = _pick_batch_block(N)
    grid = (N // Nb,)

    kernel = functools.partial(_evasion_attention_kernel, num_heads=num_heads)
    x_spec = pl.BlockSpec((L, Nb, E), lambda b: (0, b, 0))

    def run(single_buffer_weights):
        def wspec(shape):
            # Constant-index weight blocks: single-buffer to halve their VMEM
            # footprint (matters most on v7x's 64 MiB VMEM per TensorCore).
            if single_buffer_weights:
                return pl.BlockSpec(shape, lambda b: (0, 0),
                                    pipeline_mode=pl.Buffered(1))
            return pl.BlockSpec(shape, lambda b: (0, 0))

        return pl.pallas_call(
            kernel,
            out_shape=jax.ShapeDtypeStruct((L, N, E), hidden_states.dtype),
            grid=grid,
            in_specs=[
                x_spec,
                wspec((E, 3 * E)), wspec((1, 3 * E)),   # packed x-side proj
                wspec((E, E)), wspec((1, E)),           # evasion Linear #2
                wspec((E, E)), wspec((1, E)),           # value projection
                wspec((E, E)), wspec((1, E)),           # output projection
            ],
            out_specs=x_spec,
            compiler_params=pltpu.CompilerParams(
                dimension_semantics=("parallel",),
                vmem_limit_bytes=_pick_vmem_limit(),
            ),
        )(hidden_states, wx, bx, w2t, b2r, wvt, bvr, wot, bor)

    try:
        return run(True)
    except Exception:
        # pipeline_mode / Buffered(1) unsupported on this JAX build: fall back
        # to default (double-buffered) weight blocks.
        return run(False)


def reference_forward(hidden_states, params, num_heads):
    """Pure-JAX f32 reference matching the PyTorch module (for tolerance check)."""
    (w1, b1, w2, b2, wq, bq, wk, bk, wv, bv, wo, bo) = params
    L, N, E = hidden_states.shape
    hd = E // num_heads
    x = hidden_states
    h1 = jax.nn.relu(x @ w1.T + b1)
    ev = jnp.tanh(h1 @ w2.T + b2)
    q = (x @ wq.T + bq) / math.sqrt(hd)
    k = x @ wk.T + bk
    v = ev @ wv.T + bv

    def heads(t):  # (L, N, E) -> (N, H, L, hd)
        return jnp.transpose(t.reshape(L, N, num_heads, hd), (1, 2, 0, 3))

    qh, kh, vh = heads(q), heads(k), heads(v)
    s = jnp.einsum("nhqd,nhkd->nhqk", qh, kh)
    p = jax.nn.softmax(s, axis=-1)
    ctx = jnp.einsum("nhqk,nhkd->nhqd", p, vh)          # (N, H, L, hd)
    attn = jnp.transpose(ctx, (2, 0, 1, 3)).reshape(L, N, E)
    return attn @ wo.T + bo


def init_params(hidden_size, seed=42):
    """Deterministic synthetic parameters matching the module's shapes."""
    E = hidden_size
    key = jax.random.PRNGKey(seed)
    ks = jax.random.split(key, 12)
    bound = 1.0 / math.sqrt(E)

    def u(k, shape):
        return jax.random.uniform(k, shape, jnp.float32, -bound, bound)

    w1, b1 = u(ks[0], (E, E)), u(ks[1], (E,))    # evasion Linear #1
    w2, b2 = u(ks[2], (E, E)), u(ks[3], (E,))    # evasion Linear #2
    wq, bq = u(ks[4], (E, E)), u(ks[5], (E,))    # MHA q projection
    wk, bk = u(ks[6], (E, E)), u(ks[7], (E,))    # MHA k projection
    wv, bv = u(ks[8], (E, E)), u(ks[9], (E,))    # MHA v projection
    wo, bo = u(ks[10], (E, E)), u(ks[11], (E,))  # MHA out projection
    return (w1, b1, w2, b2, wq, bq, wk, bk, wv, bv, wo, bo)


if __name__ == "__main__":
    L, N, E, NH = 8, 2, 32, 8          # seq, batch, hidden_size, num_heads

    key = jax.random.PRNGKey(0)
    k1, k2 = jax.random.split(key)
    hidden_states = jax.random.normal(k1, (L, N, E), jnp.float32)
    attentions = jax.random.normal(k2, (N, NH, L, L), jnp.float32)  # unused by forward

    params = init_params(E)
    out = detection_evasion_forward(hidden_states, attentions, params, num_heads=NH)
    out = jax.block_until_ready(out)

    assert out.shape == (L, N, E), out.shape
    assert bool(jnp.all(jnp.isfinite(out)))

    # Loose tolerance: kernel uses bf16 MXU operands (f32 accumulation) and an
    # approx EUP reciprocal in the softmax normalization.
    ref = reference_forward(hidden_states, params, NH)
    assert bool(jnp.allclose(out, ref, atol=1e-1, rtol=1e-1)), float(
        jnp.max(jnp.abs(out - ref)))

    print("KERNEL_OK")
</pallas_src>

<mosaic_0001>
module attributes {stable_mosaic.version = 11 : i64} {
  func.func @_evasion_attention_kernel(%arg0: i32, %arg1: memref<8x2x32xf32, #tpu.memory_space<vmem>>, %arg2: memref<32x96xbf16, #tpu.memory_space<vmem>>, %arg3: memref<1x96xf32, #tpu.memory_space<vmem>>, %arg4: memref<32x32xbf16, #tpu.memory_space<vmem>>, %arg5: memref<1x32xf32, #tpu.memory_space<vmem>>, %arg6: memref<32x32xbf16, #tpu.memory_space<vmem>>, %arg7: memref<1x32xf32, #tpu.memory_space<vmem>>, %arg8: memref<32x32xbf16, #tpu.memory_space<vmem>>, %arg9: memref<1x32xf32, #tpu.memory_space<vmem>>, %arg10: memref<8x2x32xf32, #tpu.memory_space<vmem>>) attributes {dimension_semantics = [#tpu.dimension_semantics<parallel>], iteration_bounds = array<i64: 1>, scalar_prefetch = 0 : i64, scratch_operands = 0 : i64, tpu.core_type = #tpu.core_type<tc>, window_params = [{transform_indices = @transform_0, window_bounds = array<i64: 8, 2, 32>}, {pipeline_mode = #tpu.pipeline_mode<synchronous>, transform_indices = @transform_1, window_bounds = array<i64: 32, 96>}, {pipeline_mode = #tpu.pipeline_mode<synchronous>, transform_indices = @transform_2, window_bounds = array<i64: 1, 96>}, {pipeline_mode = #tpu.pipeline_mode<synchronous>, transform_indices = @transform_3, window_bounds = array<i64: 32, 32>}, {pipeline_mode = #tpu.pipeline_mode<synchronous>, transform_indices = @transform_4, window_bounds = array<i64: 1, 32>}, {pipeline_mode = #tpu.pipeline_mode<synchronous>, transform_indices = @transform_5, window_bounds = array<i64: 32, 32>}, {pipeline_mode = #tpu.pipeline_mode<synchronous>, transform_indices = @transform_6, window_bounds = array<i64: 1, 32>}, {pipeline_mode = #tpu.pipeline_mode<synchronous>, transform_indices = @transform_7, window_bounds = array<i64: 32, 32>}, {pipeline_mode = #tpu.pipeline_mode<synchronous>, transform_indices = @transform_8, window_bounds = array<i64: 1, 32>}, {transform_indices = @transform_9, window_bounds = array<i64: 8, 2, 32>}]} {
    %c0 = arith.constant 0 : index
    %c0_0 = arith.constant 0 : index
    %c0_1 = arith.constant 0 : index
    %0 = vector.load %arg1[%c0, %c0_0, %c0_1] : memref<8x2x32xf32, #tpu.memory_space<vmem>>, vector<8x2x32xf32>
    %1 = tpu.transpose %0, [1, 0, 2] : vector<8x2x32xf32> -> vector<2x8x32xf32>
    %2 = vector.shape_cast %1 : vector<2x8x32xf32> to vector<16x32xf32>
    %3 = arith.truncf %2 : vector<16x32xf32> to vector<16x32xbf16>
    %c0_2 = arith.constant 0 : index
    %c0_3 = arith.constant 0 : index
    %4 = vector.load %arg2[%c0_2, %c0_3] : memref<32x96xbf16, #tpu.memory_space<vmem>>, vector<32x96xbf16>
    %cst = arith.constant dense<0.000000e+00> : vector<16x96xf32>
    %5 = tpu.matmul %3, %4, %cst {dimension_numbers = #tpu.dot_dimension_numbers<[1], [0], [0], [1], [0, 0, 1, 1], [], []>} : vector<16x32xbf16>, vector<32x96xbf16>, vector<16x96xf32> -> vector<16x96xf32>
    %c0_4 = arith.constant 0 : index
    %c0_5 = arith.constant 0 : index
    %6 = vector.load %arg3[%c0_4, %c0_5] : memref<1x96xf32, #tpu.memory_space<vmem>>, vector<1x96xf32>
    %7 = vector.broadcast %6 : vector<1x96xf32> to vector<16x96xf32>
    %8 = arith.addf %5, %7 : vector<16x96xf32>
    %9 = vector.extract_strided_slice %8 {offsets = [0, 0], sizes = [16, 32], strides = [1, 1]} : vector<16x96xf32> to vector<16x32xf32>
    %cst_6 = arith.constant 0.000000e+00 : f32
    %10 = vector.broadcast %cst_6 : f32 to vector<16x32xf32>
    %11 = arith.maximumf %9, %10 : vector<16x32xf32>
    %12 = vector.extract_strided_slice %8 {offsets = [0, 32], sizes = [16, 32], strides = [1, 1]} : vector<16x96xf32> to vector<16x32xf32>
    %13 = vector.extract_strided_slice %8 {offsets = [0, 64], sizes = [16, 32], strides = [1, 1]} : vector<16x96xf32> to vector<16x32xf32>
    %14 = arith.truncf %11 : vector<16x32xf32> to vector<16x32xbf16>
    %c0_7 = arith.constant 0 : index
    %c0_8 = arith.constant 0 : index
    %15 = vector.load %arg4[%c0_7, %c0_8] : memref<32x32xbf16, #tpu.memory_space<vmem>>, vector<32x32xbf16>
    %cst_9 = arith.constant dense<0.000000e+00> : vector<16x32xf32>
    %16 = tpu.matmul %14, %15, %cst_9 {dimension_numbers = #tpu.dot_dimension_numbers<[1], [0], [0], [1], [0, 0, 1, 1], [], []>} : vector<16x32xbf16>, vector<32x32xbf16>, vector<16x32xf32> -> vector<16x32xf32>
    %c0_10 = arith.constant 0 : index
    %c0_11 = arith.constant 0 : index
    %17 = vector.load %arg5[%c0_10, %c0_11] : memref<1x32xf32, #tpu.memory_space<vmem>>, vector<1x32xf32>
    %18 = vector.broadcast %17 : vector<1x32xf32> to vector<16x32xf32>
    %19 = arith.addf %16, %18 : vector<16x32xf32>
    %20 = math.tanh %19 : vector<16x32xf32>
    %21 = arith.truncf %20 : vector<16x32xf32> to vector<16x32xbf16>
    %c0_12 = arith.constant 0 : index
    %c0_13 = arith.constant 0 : index
    %22 = vector.load %arg6[%c0_12, %c0_13] : memref<32x32xbf16, #tpu.memory_space<vmem>>, vector<32x32xbf16>
    %cst_14 = arith.constant dense<0.000000e+00> : vector<16x32xf32>
    %23 = tpu.matmul %21, %22, %cst_14 {dimension_numbers = #tpu.dot_dimension_numbers<[1], [0], [0], [1], [0, 0, 1, 1], [], []>} : vector<16x32xbf16>, vector<32x32xbf16>, vector<16x32xf32> -> vector<16x32xf32>
    %c0_15 = arith.constant 0 : index
    %c0_16 = arith.constant 0 : index
    %24 = vector.load %arg7[%c0_15, %c0_16] : memref<1x32xf32, #tpu.memory_space<vmem>>, vector<1x32xf32>
    %25 = vector.broadcast %24 : vector<1x32xf32> to vector<16x32xf32>
    %26 = arith.addf %23, %25 : vector<16x32xf32>
    %27 = arith.truncf %12 : vector<16x32xf32> to vector<16x32xbf16>
    %28 = vector.shape_cast %27 : vector<16x32xbf16> to vector<16x8x4xbf16>
    %29 = tpu.transpose %28, [1, 0, 2] : vector<16x8x4xbf16> -> vector<8x16x4xbf16>
    %30 = vector.shape_cast %29 : vector<8x16x4xbf16> to vector<16x8x4xbf16>
    %31 = arith.truncf %13 : vector<16x32xf32> to vector<16x32xbf16>
    %32 = vector.shape_cast %31 : vector<16x32xbf16> to vector<16x8x4xbf16>
    %33 = tpu.transpose %32, [1, 0, 2] : vector<16x8x4xbf16> -> vector<8x16x4xbf16>
    %34 = vector.shape_cast %33 : vector<8x16x4xbf16> to vector<16x8x4xbf16>
    %35 = arith.truncf %26 : vector<16x32xf32> to vector<16x32xbf16>
    %36 = vector.shape_cast %35 : vector<16x32xbf16> to vector<16x8x4xbf16>
    %37 = tpu.transpose %36, [1, 0, 2] : vector<16x8x4xbf16> -> vector<8x16x4xbf16>
    %38 = vector.shape_cast %37 : vector<8x16x4xbf16> to vector<16x8x4xbf16>
    "tpu.trace_start"() <{level = 10 : i32, message = "bqd,bkd->bqk"}> : () -> ()
    %cst_17 = arith.constant dense<0.000000e+00> : vector<16x8x8xf32>
    %39 = tpu.matmul %30, %34, %cst_17 {dimension_numbers = #tpu.dot_dimension_numbers<[2], [2], [1], [1], [0, 0, 0, 1, 1, 1], [0], [0]>} : vector<16x8x4xbf16>, vector<16x8x4xbf16>, vector<16x8x8xf32> -> vector<16x8x8xf32>
    "tpu.trace_stop"() : () -> ()
    %cst_18 = arith.constant dense<0xFF800000> : vector<16x8xf32>
    %40 = vector.multi_reduction <maximumf>, %39, %cst_18 [2] : vector<16x8x8xf32> to vector<16x8xf32>
    %41 = vector.shape_cast %40 : vector<16x8xf32> to vector<16x8x1xf32>
    %42 = vector.broadcast %41 : vector<16x8x1xf32> to vector<16x8x8xf32>
    %43 = arith.subf %39, %42 : vector<16x8x8xf32>
    %44 = math.exp %43 : vector<16x8x8xf32>
    %cst_19 = arith.constant dense<0.000000e+00> : vector<16x8xf32>
    %45 = vector.multi_reduction <add>, %44, %cst_19 [2] : vector<16x8x8xf32> to vector<16x8xf32>
    %46 = vector.shape_cast %45 : vector<16x8xf32> to vector<16x8x1xf32>
    %47 = tpu.reciprocal %46 {approx = true} : vector<16x8x1xf32> -> vector<16x8x1xf32>
    %48 = vector.broadcast %47 : vector<16x8x1xf32> to vector<16x8x8xf32>
    %49 = arith.mulf %44, %48 : vector<16x8x8xf32>
    %50 = arith.truncf %49 : vector<16x8x8xf32> to vector<16x8x8xbf16>
    "tpu.trace_start"() <{level = 10 : i32, message = "bqk,bkd->bqd"}> : () -> ()
    %cst_20 = arith.constant dense<0.000000e+00> : vector<16x8x4xf32>
    %51 = tpu.matmul %50, %38, %cst_20 {dimension_numbers = #tpu.dot_dimension_numbers<[2], [1], [1], [2], [0, 0, 0, 1, 1, 2], [0], [0]>} : vector<16x8x8xbf16>, vector<16x8x4xbf16>, vector<16x8x4xf32> -> vector<16x8x4xf32>
    "tpu.trace_stop"() : () -> ()
    %52 = vector.shape_cast %51 : vector<16x8x4xf32> to vector<8x16x4xf32>
    %53 = tpu.transpose %52, [1, 0, 2] : vector<8x16x4xf32> -> vector<16x8x4xf32>
    %54 = vector.shape_cast %53 : vector<16x8x4xf32> to vector<16x32xf32>
    %55 = arith.truncf %54 : vector<16x32xf32> to vector<16x32xbf16>
    %c0_21 = arith.constant 0 : index
    %c0_22 = arith.constant 0 : index
    %56 = vector.load %arg8[%c0_21, %c0_22] : memref<32x32xbf16, #tpu.memory_space<vmem>>, vector<32x32xbf16>
    %cst_23 = arith.constant dense<0.000000e+00> : vector<16x32xf32>
    %57 = tpu.matmul %55, %56, %cst_23 {dimension_numbers = #tpu.dot_dimension_numbers<[1], [0], [0], [1], [0, 0, 1, 1], [], []>} : vector<16x32xbf16>, vector<32x32xbf16>, vector<16x32xf32> -> vector<16x32xf32>
    %c0_24 = arith.constant 0 : index
    %c0_25 = arith.constant 0 : index
    %58 = vector.load %arg9[%c0_24, %c0_25] : memref<1x32xf32, #tpu.memory_space<vmem>>, vector<1x32xf32>
    %59 = vector.broadcast %58 : vector<1x32xf32> to vector<16x32xf32>
    %60 = arith.addf %57, %59 : vector<16x32xf32>
    %61 = vector.shape_cast %60 : vector<16x32xf32> to vector<2x8x32xf32>
    %62 = tpu.transpose %61, [1, 0, 2] : vector<2x8x32xf32> -> vector<8x2x32xf32>
    %c0_26 = arith.constant 0 : index
    %c0_27 = arith.constant 0 : index
    %c0_28 = arith.constant 0 : index
    %63 = vector.load %arg10[%c0_26, %c0_27, %c0_28] : memref<8x2x32xf32, #tpu.memory_space<vmem>>, vector<8x2x32xf32>
    tpu.vector_store %arg10[%c0_26, %c0_27, %c0_28], %62 {strides = array<i32>} : memref<8x2x32xf32, #tpu.memory_space<vmem>>, vector<8x2x32xf32>,
    return
  }
  func.func @transform_0(%arg0: i32) -> (i32, i32, i32) {
    %c0_i32 = arith.constant 0 : i32
    %c0_i32_0 = arith.constant 0 : i32
    %c0_i32_1 = arith.constant 0 : i32
    return %c0_i32, %arg0, %c0_i32_0 : i32, i32, i32
  }
  func.func @transform_1(%arg0: i32) -> (i32, i32) {
    %c0_i32 = arith.constant 0 : i32
    %c0_i32_0 = arith.constant 0 : i32
    %c0_i32_1 = arith.constant 0 : i32
    return %c0_i32, %c0_i32_0 : i32, i32
  }
  func.func @transform_2(%arg0: i32) -> (i32, i32) {
    %c0_i32 = arith.constant 0 : i32
    %c0_i32_0 = arith.constant 0 : i32
    %c0_i32_1 = arith.constant 0 : i32
    return %c0_i32, %c0_i32_0 : i32, i32
  }
  func.func @transform_3(%arg0: i32) -> (i32, i32) {
    %c0_i32 = arith.constant 0 : i32
    %c0_i32_0 = arith.constant 0 : i32
    %c0_i32_1 = arith.constant 0 : i32
    return %c0_i32, %c0_i32_0 : i32, i32
  }
  func.func @transform_4(%arg0: i32) -> (i32, i32) {
    %c0_i32 = arith.constant 0 : i32
    %c0_i32_0 = arith.constant 0 : i32
    %c0_i32_1 = arith.constant 0 : i32
    return %c0_i32, %c0_i32_0 : i32, i32
  }
  func.func @transform_5(%arg0: i32) -> (i32, i32) {
    %c0_i32 = arith.constant 0 : i32
    %c0_i32_0 = arith.constant 0 : i32
    %c0_i32_1 = arith.constant 0 : i32
    return %c0_i32, %c0_i32_0 : i32, i32
  }
  func.func @transform_6(%arg0: i32) -> (i32, i32) {
    %c0_i32 = arith.constant 0 : i32
    %c0_i32_0 = arith.constant 0 : i32
    %c0_i32_1 = arith.constant 0 : i32
    return %c0_i32, %c0_i32_0 : i32, i32
  }
  func.func @transform_7(%arg0: i32) -> (i32, i32) {
    %c0_i32 = arith.constant 0 : i32
    %c0_i32_0 = arith.constant 0 : i32
    %c0_i32_1 = arith.constant 0 : i32
    return %c0_i32, %c0_i32_0 : i32, i32
  }
  func.func @transform_8(%arg0: i32) -> (i32, i32) {
    %c0_i32 = arith.constant 0 : i32
    %c0_i32_0 = arith.constant 0 : i32
    %c0_i32_1 = arith.constant 0 : i32
    return %c0_i32, %c0_i32_0 : i32, i32
  }
  func.func @transform_9(%arg0: i32) -> (i32, i32, i32) {
    %c0_i32 = arith.constant 0 : i32
    %c0_i32_0 = arith.constant 0 : i32
    %c0_i32_1 = arith.constant 0 : i32
    return %c0_i32, %arg0, %c0_i32_0 : i32, i32, i32
  }
}

module attributes {stable_mosaic.version = 11 : i64} {
  func.func @_evasion_attention_kernel(%arg0: i32, %arg1: memref<8x2x32xf32, #tpu.memory_space<vmem>>, %arg2: memref<32x96xbf16, #tpu.memory_space<vmem>>, %arg3: memref<1x96xf32, #tpu.memory_space<vmem>>, %arg4: memref<32x32xbf16, #tpu.memory_space<vmem>>, %arg5: memref<1x32xf32, #tpu.memory_space<vmem>>, %arg6: memref<32x32xbf16, #tpu.memory_space<vmem>>, %arg7: memref<1x32xf32, #tpu.memory_space<vmem>>, %arg8: memref<32x32xbf16, #tpu.memory_space<vmem>>, %arg9: memref<1x32xf32, #tpu.memory_space<vmem>>, %arg10: memref<8x2x32xf32, #tpu.memory_space<vmem>>) attributes {dimension_semantics = [#tpu.dimension_semantics<parallel>], iteration_bounds = array<i64: 1>, scalar_prefetch = 0 : i64, scratch_operands = 0 : i64, tpu.core_type = #tpu.core_type<tc>, window_params = [{transform_indices = @transform_0, window_bounds = array<i64: 8, 2, 32>}, {pipeline_mode = #tpu.pipeline_mode<synchronous>, transform_indices = @transform_1, window_bounds = array<i64: 32, 96>}, {pipeline_mode = #tpu.pipeline_mode<synchronous>, transform_indices = @transform_2, window_bounds = array<i64: 1, 96>}, {pipeline_mode = #tpu.pipeline_mode<synchronous>, transform_indices = @transform_3, window_bounds = array<i64: 32, 32>}, {pipeline_mode = #tpu.pipeline_mode<synchronous>, transform_indices = @transform_4, window_bounds = array<i64: 1, 32>}, {pipeline_mode = #tpu.pipeline_mode<synchronous>, transform_indices = @transform_5, window_bounds = array<i64: 32, 32>}, {pipeline_mode = #tpu.pipeline_mode<synchronous>, transform_indices = @transform_6, window_bounds = array<i64: 1, 32>}, {pipeline_mode = #tpu.pipeline_mode<synchronous>, transform_indices = @transform_7, window_bounds = array<i64: 32, 32>}, {pipeline_mode = #tpu.pipeline_mode<synchronous>, transform_indices = @transform_8, window_bounds = array<i64: 1, 32>}, {transform_indices = @transform_9, window_bounds = array<i64: 8, 2, 32>}]} {
    %c0 = arith.constant 0 : index
    %c0_0 = arith.constant 0 : index
    %c0_1 = arith.constant 0 : index
    %0 = vector.load %arg1[%c0, %c0_0, %c0_1] : memref<8x2x32xf32, #tpu.memory_space<vmem>>, vector<8x2x32xf32>
    %1 = tpu.transpose %0, [1, 0, 2] : vector<8x2x32xf32> -> vector<2x8x32xf32>
    %2 = vector.shape_cast %1 : vector<2x8x32xf32> to vector<16x32xf32>
    %3 = arith.truncf %2 : vector<16x32xf32> to vector<16x32xbf16>
    %c0_2 = arith.constant 0 : index
    %c0_3 = arith.constant 0 : index
    %4 = vector.load %arg2[%c0_2, %c0_3] : memref<32x96xbf16, #tpu.memory_space<vmem>>, vector<32x96xbf16>
    %cst = arith.constant dense<0.000000e+00> : vector<16x96xf32>
    %5 = tpu.matmul %3, %4, %cst {dimension_numbers = #tpu.dot_dimension_numbers<[1], [0], [0], [1], [0, 0, 1, 1], [], []>} : vector<16x32xbf16>, vector<32x96xbf16>, vector<16x96xf32> -> vector<16x96xf32>
    %c0_4 = arith.constant 0 : index
    %c0_5 = arith.constant 0 : index
    %6 = vector.load %arg3[%c0_4, %c0_5] : memref<1x96xf32, #tpu.memory_space<vmem>>, vector<1x96xf32>
    %7 = vector.broadcast %6 : vector<1x96xf32> to vector<16x96xf32>
    %8 = arith.addf %5, %7 : vector<16x96xf32>
    %9 = vector.extract_strided_slice %8 {offsets = [0, 0], sizes = [16, 32], strides = [1, 1]} : vector<16x96xf32> to vector<16x32xf32>
    %cst_6 = arith.constant 0.000000e+00 : f32
    %10 = vector.broadcast %cst_6 : f32 to vector<16x32xf32>
    %11 = arith.maximumf %9, %10 : vector<16x32xf32>
    %12 = vector.extract_strided_slice %8 {offsets = [0, 32], sizes = [16, 32], strides = [1, 1]} : vector<16x96xf32> to vector<16x32xf32>
    %13 = vector.extract_strided_slice %8 {offsets = [0, 64], sizes = [16, 32], strides = [1, 1]} : vector<16x96xf32> to vector<16x32xf32>
    %14 = arith.truncf %11 : vector<16x32xf32> to vector<16x32xbf16>
    %c0_7 = arith.constant 0 : index
    %c0_8 = arith.constant 0 : index
    %15 = vector.load %arg4[%c0_7, %c0_8] : memref<32x32xbf16, #tpu.memory_space<vmem>>, vector<32x32xbf16>
    %cst_9 = arith.constant dense<0.000000e+00> : vector<16x32xf32>
    %16 = tpu.matmul %14, %15, %cst_9 {dimension_numbers = #tpu.dot_dimension_numbers<[1], [0], [0], [1], [0, 0, 1, 1], [], []>} : vector<16x32xbf16>, vector<32x32xbf16>, vector<16x32xf32> -> vector<16x32xf32>
    %c0_10 = arith.constant 0 : index
    %c0_11 = arith.constant 0 : index
    %17 = vector.load %arg5[%c0_10, %c0_11] : memref<1x32xf32, #tpu.memory_space<vmem>>, vector<1x32xf32>
    %18 = vector.broadcast %17 : vector<1x32xf32> to vector<16x32xf32>
    %19 = arith.addf %16, %18 : vector<16x32xf32>
    %20 = math.tanh %19 : vector<16x32xf32>
    %21 = arith.truncf %20 : vector<16x32xf32> to vector<16x32xbf16>
    %c0_12 = arith.constant 0 : index
    %c0_13 = arith.constant 0 : index
    %22 = vector.load %arg6[%c0_12, %c0_13] : memref<32x32xbf16, #tpu.memory_space<vmem>>, vector<32x32xbf16>
    %cst_14 = arith.constant dense<0.000000e+00> : vector<16x32xf32>
    %23 = tpu.matmul %21, %22, %cst_14 {dimension_numbers = #tpu.dot_dimension_numbers<[1], [0], [0], [1], [0, 0, 1, 1], [], []>} : vector<16x32xbf16>, vector<32x32xbf16>, vector<16x32xf32> -> vector<16x32xf32>
    %c0_15 = arith.constant 0 : index
    %c0_16 = arith.constant 0 : index
    %24 = vector.load %arg7[%c0_15, %c0_16] : memref<1x32xf32, #tpu.memory_space<vmem>>, vector<1x32xf32>
    %25 = vector.broadcast %24 : vector<1x32xf32> to vector<16x32xf32>
    %26 = arith.addf %23, %25 : vector<16x32xf32>
    %27 = arith.truncf %12 : vector<16x32xf32> to vector<16x32xbf16>
    %28 = vector.shape_cast %27 : vector<16x32xbf16> to vector<16x8x4xbf16>
    %29 = tpu.transpose %28, [1, 0, 2] : vector<16x8x4xbf16> -> vector<8x16x4xbf16>
    %30 = vector.shape_cast %29 : vector<8x16x4xbf16> to vector<16x8x4xbf16>
    %31 = arith.truncf %13 : vector<16x32xf32> to vector<16x32xbf16>
    %32 = vector.shape_cast %31 : vector<16x32xbf16> to vector<16x8x4xbf16>
    %33 = tpu.transpose %32, [1, 0, 2] : vector<16x8x4xbf16> -> vector<8x16x4xbf16>
    %34 = vector.shape_cast %33 : vector<8x16x4xbf16> to vector<16x8x4xbf16>
    %35 = arith.truncf %26 : vector<16x32xf32> to vector<16x32xbf16>
    %36 = vector.shape_cast %35 : vector<16x32xbf16> to vector<16x8x4xbf16>
    %37 = tpu.transpose %36, [1, 0, 2] : vector<16x8x4xbf16> -> vector<8x16x4xbf16>
    %38 = vector.shape_cast %37 : vector<8x16x4xbf16> to vector<16x8x4xbf16>
    "tpu.trace_start"() <{level = 10 : i32, message = "bqd,bkd->bqk"}> : () -> ()
    %cst_17 = arith.constant dense<0.000000e+00> : vector<16x8x8xf32>
    %39 = tpu.matmul %30, %34, %cst_17 {dimension_numbers = #tpu.dot_dimension_numbers<[2], [2], [1], [1], [0, 0, 0, 1, 1, 1], [0], [0]>} : vector<16x8x4xbf16>, vector<16x8x4xbf16>, vector<16x8x8xf32> -> vector<16x8x8xf32>
    "tpu.trace_stop"() : () -> ()
    %cst_18 = arith.constant dense<0xFF800000> : vector<16x8xf32>
    %40 = vector.multi_reduction <maximumf>, %39, %cst_18 [2] : vector<16x8x8xf32> to vector<16x8xf32>
    %41 = vector.shape_cast %40 : vector<16x8xf32> to vector<16x8x1xf32>
    %42 = vector.broadcast %41 : vector<16x8x1xf32> to vector<16x8x8xf32>
    %43 = arith.subf %39, %42 : vector<16x8x8xf32>
    %44 = math.exp %43 : vector<16x8x8xf32>
    %cst_19 = arith.constant dense<0.000000e+00> : vector<16x8xf32>
    %45 = vector.multi_reduction <add>, %44, %cst_19 [2] : vector<16x8x8xf32> to vector<16x8xf32>
    %46 = vector.shape_cast %45 : vector<16x8xf32> to vector<16x8x1xf32>
    %47 = tpu.reciprocal %46 {approx = true} : vector<16x8x1xf32> -> vector<16x8x1xf32>
    %48 = vector.broadcast %47 : vector<16x8x1xf32> to vector<16x8x8xf32>
    %49 = arith.mulf %44, %48 : vector<16x8x8xf32>
    %50 = arith.truncf %49 : vector<16x8x8xf32> to vector<16x8x8xbf16>
    "tpu.trace_start"() <{level = 10 : i32, message = "bqk,bkd->bqd"}> : () -> ()
    %cst_20 = arith.constant dense<0.000000e+00> : vector<16x8x4xf32>
    %51 = tpu.matmul %50, %38, %cst_20 {dimension_numbers = #tpu.dot_dimension_numbers<[2], [1], [1], [2], [0, 0, 0, 1, 1, 2], [0], [0]>} : vector<16x8x8xbf16>, vector<16x8x4xbf16>, vector<16x8x4xf32> -> vector<16x8x4xf32>
    "tpu.trace_stop"() : () -> ()
    %52 = vector.shape_cast %51 : vector<16x8x4xf32> to vector<8x16x4xf32>
    %53 = tpu.transpose %52, [1, 0, 2] : vector<8x16x4xf32> -> vector<16x8x4xf32>
    %54 = vector.shape_cast %53 : vector<16x8x4xf32> to vector<16x32xf32>
    %55 = arith.truncf %54 : vector<16x32xf32> to vector<16x32xbf16>
    %c0_21 = arith.constant 0 : index
    %c0_22 = arith.constant 0 : index
    %56 = vector.load %arg8[%c0_21, %c0_22] : memref<32x32xbf16, #tpu.memory_space<vmem>>, vector<32x32xbf16>
    %cst_23 = arith.constant dense<0.000000e+00> : vector<16x32xf32>
    %57 = tpu.matmul %55, %56, %cst_23 {dimension_numbers = #tpu.dot_dimension_numbers<[1], [0], [0], [1], [0, 0, 1, 1], [], []>} : vector<16x32xbf16>, vector<32x32xbf16>, vector<16x32xf32> -> vector<16x32xf32>
    %c0_24 = arith.constant 0 : index
    %c0_25 = arith.constant 0 : index
    %58 = vector.load %arg9[%c0_24, %c0_25] : memref<1x32xf32, #tpu.memory_space<vmem>>, vector<1x32xf32>
    %59 = vector.broadcast %58 : vector<1x32xf32> to vector<16x32xf32>
    %60 = arith.addf %57, %59 : vector<16x32xf32>
    %61 = vector.shape_cast %60 : vector<16x32xf32> to vector<2x8x32xf32>
    %62 = tpu.transpose %61, [1, 0, 2] : vector<2x8x32xf32> -> vector<8x2x32xf32>
    %c0_26 = arith.constant 0 : index
    %c0_27 = arith.constant 0 : index
    %c0_28 = arith.constant 0 : index
    %63 = vector.load %arg10[%c0_26, %c0_27, %c0_28] : memref<8x2x32xf32, #tpu.memory_space<vmem>>, vector<8x2x32xf32>
    tpu.vector_store %arg10[%c0_26, %c0_27, %c0_28], %62 {strides = array<i32>} : memref<8x2x32xf32, #tpu.memory_space<vmem>>, vector<8x2x32xf32>,
    return
  }
  func.func @transform_0(%arg0: i32) -> (i32, i32, i32) {
    %c0_i32 = arith.constant 0 : i32
    %c0_i32_0 = arith.constant 0 : i32
    %c0_i32_1 = arith.constant 0 : i32
    return %c0_i32, %arg0, %c0_i32_0 : i32, i32, i32
  }
  func.func @transform_1(%arg0: i32) -> (i32, i32) {
    %c0_i32 = arith.constant 0 : i32
    %c0_i32_0 = arith.constant 0 : i32
    %c0_i32_1 = arith.constant 0 : i32
    return %c0_i32, %c0_i32_0 : i32, i32
  }
  func.func @transform_2(%arg0: i32) -> (i32, i32) {
    %c0_i32 = arith.constant 0 : i32
    %c0_i32_0 = arith.constant 0 : i32
    %c0_i32_1 = arith.constant 0 : i32
    return %c0_i32, %c0_i32_0 : i32, i32
  }
  func.func @transform_3(%arg0: i32) -> (i32, i32) {
    %c0_i32 = arith.constant 0 : i32
    %c0_i32_0 = arith.constant 0 : i32
    %c0_i32_1 = arith.constant 0 : i32
    return %c0_i32, %c0_i32_0 : i32, i32
  }
  func.func @transform_4(%arg0: i32) -> (i32, i32) {
    %c0_i32 = arith.constant 0 : i32
    %c0_i32_0 = arith.constant 0 : i32
    %c0_i32_1 = arith.constant 0 : i32
    return %c0_i32, %c0_i32_0 : i32, i32
  }
  func.func @transform_5(%arg0: i32) -> (i32, i32) {
    %c0_i32 = arith.constant 0 : i32
    %c0_i32_0 = arith.constant 0 : i32
    %c0_i32_1 = arith.constant 0 : i32
    return %c0_i32, %c0_i32_0 : i32, i32
  }
  func.func @transform_6(%arg0: i32) -> (i32, i32) {
    %c0_i32 = arith.constant 0 : i32
    %c0_i32_0 = arith.constant 0 : i32
    %c0_i32_1 = arith.constant 0 : i32
    return %c0_i32, %c0_i32_0 : i32, i32
  }
  func.func @transform_7(%arg0: i32) -> (i32, i32) {
    %c0_i32 = arith.constant 0 : i32
    %c0_i32_0 = arith.constant 0 : i32
    %c0_i32_1 = arith.constant 0 : i32
    return %c0_i32, %c0_i32_0 : i32, i32
  }
  func.func @transform_8(%arg0: i32) -> (i32, i32) {
    %c0_i32 = arith.constant 0 : i32
    %c0_i32_0 = arith.constant 0 : i32
    %c0_i32_1 = arith.constant 0 : i32
    return %c0_i32, %c0_i32_0 : i32, i32
  }
  func.func @transform_9(%arg0: i32) -> (i32, i32, i32) {
    %c0_i32 = arith.constant 0 : i32
    %c0_i32_0 = arith.constant 0 : i32
    %c0_i32_1 = arith.constant 0 : i32
    return %c0_i32, %arg0, %c0_i32_0 : i32, i32, i32
  }
}

</mosaic_0001>

<bundles_post_ra>
// kernel: tpu_custom_call.1
= control target key start
LH: loop header
LB: loop body
LE: loop exit
PB: predicated region body
PF: predicated region fallthrough
CT: control target
= control target key end

     0   :  { %14 = vsyncpa [#allocation3], 0  ;;  %s5546_s0 = inlined_call_operand.hbm [shape: f32[8,2,32], index: 0, kind: input, shape index: {}]   ;;  %s5547_s1 = inlined_call_operand.hbm [shape: bf16[32,96], index: 1, kind: input, shape index: {}]   ;;  %s5548_s2 = inlined_call_operand.vmem [shape: f32[1,96], index: 2, kind: input, shape index: {}]   ;;  %s5549_s3 = inlined_call_operand.hbm [shape: bf16[32,32], index: 3, kind: input, shape index: {}]   ;;  %s5550_s4 = inlined_call_operand.vmem [shape: f32[1,32], index: 4, kind: input, shape index: {}]   ;;  %s5551_s5 = inlined_call_operand.vmem [shape: bf16[32,32], index: 5, kind: input, shape index: {}]   ;;  %s5552_s6 = inlined_call_operand.vmem [shape: f32[1,32], index: 6, kind: input, shape index: {}]   ;;  %s5553_s7 = inlined_call_operand.hbm [shape: bf16[32,32], index: 7, kind: input, shape index: {}]   ;;  %s5554_s8 = inlined_call_operand.vmem [shape: f32[1,32], index: 8, kind: input, shape index: {}]   ;;  %s5555_s9 = inlined_call_operand.hbm [shape: f32[8,2,32], index: 9, kind: output, shape index: {}]  }
   0x1   :  { %15 = vsyncpa [#allocation6], 0 }
   0x2   :  { %16 = vsyncpa [#allocation9], 0 }
   0x3   :  { %17 = vsyncpa [#allocation4], 0  ;;  %s4636_s30 = smov [#allocation5]   ;;  %s4518_s13 = scalar_lea.hbm %s5547_s1, 256 }
   0x4   :  { %s35_s10 = sshll.u32 %s4636_s30, 4  ;;  %p4519_p0 = scmp.ne.s32.totalorder %s5547_s1, %s4518_s13  ;;  %s36_s10 = int_to_ptr.vmem [resolvable:$true] %s35_s10 }
   0x5   :  { %p4522_p1 = scmp.lt.u32.totalorder %s4518_s13, %s5547_s1 }
   0x7   :  { %p4524_p2 = pnand %p4522_p1, %p4519_p0 }
   0x9   :  { %4527 = shalt.err (!%p4524_p2)
}
   0xa   :  { %s4528_s18 = scalar_lea.vmem %s36_s10, 256  ;;  %p4533_p4 = scmp.lt.s32.totalorder %s36_s10, %s36_s10 }
   0xb   :  { %p4529_p3 = scmp.ne.s32.totalorder %s36_s10, %s4528_s18  ;;  %p4534_p5 = scmp.lt.s32.totalorder %s4528_s18, %s4528_s18 }
   0xd   :  { %p4535_p6 = por %p4534_p5, %p4533_p4 }
   0xf   :  { %p4536_p7 = pnand %p4535_p6, %p4529_p3 }
  0x11   :  { %4539 = shalt.err (!%p4536_p7)
}
  0x12   :  { %s4637_s19 = smov 64   ;;  %s4638_s20 = smov 4  }
  0x13   :  { %41 = dma.hbm_to_vmem [thread:$0]  %s5547_s1, 256, %s36_s10, [#allocation6], %s4637_s19, %s4637_s19, %s4638_s20  }
  0x14   :  { %s4639_s23 = smov [#allocation2]   ;;  %s4540_s27 = scalar_lea.hbm %s5546_s0, 256 }
  0x15   :  { %s23_s24 = sshll.u32 %s4639_s23, 4  ;;  %p4541_p8 = scmp.ne.s32.totalorder %s5546_s0, %s4540_s27  ;;  %s24_s24 = int_to_ptr.vmem [resolvable:$true] %s23_s24 }
  0x16   :  { %p4544_p9 = scmp.lt.u32.totalorder %s4540_s27, %s5546_s0 }
  0x18   :  { %p4546_p10 = pnand %p4544_p9, %p4541_p8 }
  0x1a   :  { %4549 = shalt.err (!%p4546_p10)
}
  0x1b   :  { %s4550_s12 = scalar_lea.vmem %s24_s24, 256  ;;  %p4555_p12 = scmp.lt.s32.totalorder %s24_s24, %s24_s24 }
  0x1c   :  { %p4551_p11 = scmp.ne.s32.totalorder %s24_s24, %s4550_s12  ;;  %p4556_p13 = scmp.lt.s32.totalorder %s4550_s12, %s4550_s12 }
  0x1e   :  { %p4557_p0 = por %p4556_p13, %p4555_p12 }
  0x20   :  { %p4558_p1 = pnand %p4557_p0, %p4551_p11 }
  0x22   :  { %4561 = shalt.err (!%p4558_p1)
}
  0x23   :  { %s4640_s1 = smov 32   ;;  %s4641_s10 = smov 2  }
  0x24   :  { %29 = dma.hbm_to_vmem [thread:$0]  %s5546_s0, 256, %s24_s24, [#allocation3], %s4640_s1, %s4640_s1, %s4641_s10  }
  0x25   :  { %s4642_s15 = smov [#allocation7]   ;;  %s4643_s17 = smov [#allocation8]  }
  0x26   :  { %s49_s16 = sshll.u32 %s4642_s15, 4  ;;  %s67_s18 = sshll.u32 %s4643_s17, 4  ;;  %s50_s16 = int_to_ptr.vmem [resolvable:$true] %s49_s16  ;;  %s4743_s18 = int_to_ptr.vmem [resolvable:$true] %s67_s18 }
  0x27   :  { %s4562_s23 = scalar_lea.hbm %s5549_s3, 256 }
  0x28   :  { %p4563_p2 = scmp.ne.s32.totalorder %s5549_s3, %s4562_s23  ;;  %p4566_p3 = scmp.lt.u32.totalorder %s4562_s23, %s5549_s3 }
  0x2a   :  { %p4568_p4 = pnand %p4566_p3, %p4563_p2 }
  0x2c   :  { %4571 = shalt.err (!%p4568_p4)
}
  0x2d   :  { %s4572_s0 = scalar_lea.vmem %s50_s16, 256  ;;  %p4577_p6 = scmp.lt.s32.totalorder %s50_s16, %s50_s16 }
  0x2e   :  { %p4573_p5 = scmp.ne.s32.totalorder %s50_s16, %s4572_s0  ;;  %p4578_p7 = scmp.lt.s32.totalorder %s4572_s0, %s4572_s0 }
  0x30   :  { %p4579_p8 = por %p4578_p7, %p4577_p6 }
  0x32   :  { %p4580_p9 = pnand %p4579_p8, %p4573_p5 }
  0x34   :  { %4583 = shalt.err (!%p4580_p9)
}
  0x35   :  { %55 = dma.hbm_to_vmem [thread:$0]  %s5549_s3, 256, %s50_s16, [#allocation6], %s4637_s19, %s4637_s19, %s4638_s20  }
  0x36   :  { %s4584_s12 = scalar_lea.hbm %s5553_s7, 256 }
  0x37   :  { %p4585_p10 = scmp.ne.s32.totalorder %s5553_s7, %s4584_s12  ;;  %p4588_p11 = scmp.lt.u32.totalorder %s4584_s12, %s5553_s7 }
  0x39   :  { %p4590_p12 = pnand %p4588_p11, %p4585_p10 }
  0x3b   :  { %4593 = shalt.err (!%p4590_p12)
}
  0x3c   :  { %s4594_s21 = scalar_lea.vmem %s4743_s18, 256  ;;  %p4599_p0 = scmp.lt.s32.totalorder %s4743_s18, %s4743_s18 }
  0x3d   :  { %p4595_p13 = scmp.ne.s32.totalorder %s4743_s18, %s4594_s21  ;;  %p4600_p1 = scmp.lt.s32.totalorder %s4594_s21, %s4594_s21 }
  0x3f   :  { %p4601_p2 = por %p4600_p1, %p4599_p0 }
  0x41   :  { %p4602_p3 = pnand %p4601_p2, %p4595_p13 }
  0x43   :  { %4605 = shalt.err (!%p4602_p3)
}
  0x44   :  { %73 = dma.hbm_to_vmem [thread:$0]  %s5553_s7, 256, %s4743_s18, [#allocation9], %s4637_s19, %s4637_s19, %s4638_s20  }
  0x45   :  { %4628 = dma.done.wait [#allocation3], 256  }
  0x46   :  { %4629 = vsyncadd [#allocation3], 4294967040 }
  0x47   :  { %4630 = dma.done.wait [#allocation6], 512  }
  0x48   :  { %4631 = vsyncadd [#allocation6], 4294966784 }
  0x49   :  { %4632 = dma.done.wait [#allocation9], 256  }
  0x4a   :  { %4633 = vsyncadd [#allocation9], 4294967040  ;;  %v4644_v0 = vmov 0.0   ;;  %vm4645_vm0 = vmmov 0   ;;  %v4646_v1 = vmov 1983009808   ;;  %v101_v3 = vlaneseq }
  0x4b   :  { %4148 = vmatprep.subr.bf16.mxu0 %v4644_v0  ;;  %4152 = vmatprep.mubr.msk.bf16.mxu0 %vm4645_vm0, %v4644_v0  ;;  %v99_v2 = vunpack.c.l.s4 %v4646_v1  ;;  %v4647_v6 = vmov 1934713408   ;;  %v4434_v8 = vld [vmem:[#allocation5] sm:$0xff]   ;;  %v4435_v9 = vld [vmem:[#allocation5 + $0x8] sm:$0xff]   ;;  %vm171_vm1 = vcmask 261120   ;;  %v4440_v24 = vld [vmem:[#allocation7] sm:$0xff]  }
  0x4c   :  { %4156 = vmatprep.subr.bf16.mxu1 %v4644_v0  ;;  %4160 = vmatprep.mubr.msk.bf16.mxu1 %vm4645_vm0, %v4644_v0  ;;  %v102_v5 = vshrl.u32 %v101_v3, 7  ;;  %v131_v7 = vunpack.c.l.s4 %v4647_v6  ;;  %v4514_v12 = vld.sshfl [vmem:[#allocation2] sm:$0xf pattern:$0x76325410]  ;;  %v4441_v25 = vld [vmem:[#allocation7 + $0x8] sm:$0xff]  }
  0x4d   :  { %v100_v4 = vunpack.c.0.s8 %v99_v2  ;;  %4149 = vmatpush3.bf16.msra.mxu0 %v4434_v8  ;;  %v4515_v13 = vld.sshfl [vmem:[#allocation2 + $0x2] sm:$0xf pattern:$0x76325410]  ;;  %4157 = vmatpush3.bf16.msra.mxu1 %v4440_v24  ;;  %v3948_v26 = vld [vmem:[%s5548_s2] ss:$0 sm:$0xff] }
  0x4e   :  { %4150 = vmatprep.subr.bf16.mxu0 %v4644_v0  ;;  %v132_v11 = vunpack.c.0.s8 %v131_v7  ;;  %v4516_v14 = vld.sshfl [vmem:[#allocation2 + $0x8] sm:$0xf pattern:$0x76325410]  ;;  %v129_v17 = vcombine.low %v4514_v12, %v4515_v13  ;;  %4158 = vmatprep.subr.bf16.mxu1 %v4644_v0  ;;  %s4648_s22 = smov 116   ;;  %s4649_s23 = smov 124  }
  0x4f   :  { %v4786_v10 = vsub.s32 %v100_v4, %v102_v5  ;;  %v4517_v15 = vld.sshfl [vmem:[#allocation2 + $0xa] sm:$0xf pattern:$0x76325410]  ;;  %s4650_s2 = smov 112   ;;  %s4651_s25 = smov 120  }
  0x50   :  { %v4789_v16 = vsub.s32 %v132_v11, %v102_v5  ;;  %v137_v18 = vcombine.low %v4516_v14, %v4517_v15  ;;  %s4652_s26 = smov 104   ;;  %s4653_s27 = smov 108   ;;  %v4442_v37 = vld [vmem:[%s5551_s5] sm:$0xff]   ;;  %v4443_v38 = vld [vmem:[%s5551_s5 + $0x8] sm:$0xff]   ;;  %vm1500_vm2 = vcmask 31744   ;;  %vm2237_vm3 = vcmask 64512  }
  0x51   :  { %4151 = vmatpush3.bf16.msra.mxu0 %v4435_v9  ;;  %4159 = vmatpush3.bf16.msra.mxu1 %v4441_v25  ;;  %s4654_s28 = smov 100   ;;  %s4655_s0 = smov 96   ;;  %v3952_v46 = vld [vmem:[%s5550_s4] ss:$0 sm:$0xff]  ;;  %vm2433_vm4 = vcmask 1043456   ;;  %vm3771_vm5 = vcmask 97280  }
  0x52   :  { %4164 = vmatprep.subr.bf16.mxu0 %v4644_v0  ;;  %v136_v19 = vrot.slane %v129_v17, %v4789_v16  ;;  %v144_v20 = vrot.slane %v137_v18, %v4789_v16  ;;  %4172 = vmatprep.subr.bf16.mxu1 %v4644_v0  ;;  %s4657_s13 = smov 12   ;;  %s4659_s14 = smov 16   ;;  %vm3774_vm6 = vcmask 130048   ;;  %vm3777_vm7 = vcmask 162816  }
  0x53   :  { %s4660_s15 = smov 28   ;;  %s4661_s17 = smov 24   ;;  %vm3780_vm8 = vcmask 195584   ;;  %vm3783_vm9 = vcmask 228352   ;;  %vm3920_vm10 = vcmask 254976  }
  0x54   :  { %v145_v21 = vcombine.low %v136_v19, %v144_v20  ;;  %v146_v22 = vcombine.high %v136_v19, %v144_v20 }
  0x56   :  { %v147_v23 = vpack.c.bf16 %v146_v22, %v145_v21 }
  0x58   :  { %4153 = vmatmul.mubr.msk.bf16.vlgmr.msra.gmra.mrb[0].mxu0 %vm171_vm1, %v147_v23 }
  0x59   :  { %4168 = vmatprep.mubr.msk.bf16.mxu0 %vm4645_vm0, %v4644_v0  ;;  %4165 = vmatpush3.bf16.msra.mxu0 %v4442_v37 }
  0x5a   :  { %4166 = vmatprep.subr.bf16.mxu0 %v4644_v0 }
  0x5d   :  { %4167 = vmatpush3.bf16.msra.mxu0 %v4443_v38 }
  0x5e   :  { %4178 = vmatprep.subr.bf16.mxu0 %v4644_v0 }
 0x12b   :  { %v209_v27 = vpop.f32.mrb[0].mxu0 }
 0x12c   :  { %v210_v28 = vadd.f32 %v3948_v26, %v209_v27  ;;  %v4154_v29 = vpop.f32.mrb[1].mxu0 }
 0x12d   :  { %v212_v30 = vpop.f32.mrb[2].mxu0 }
 0x12e   :  { %v213_v31 = vadd.f32 %v3948_v26, %v212_v30  ;;  %v4155_v32 = vpop.f32.mrb[3].mxu0  ;;  %v216_v33 = vmax.f32 %v210_v28, 0.0 }
 0x130   :  { %v217_v34 = vmax.f32 %v213_v31, 0.0  ;;  %v356_v35 = vpack.c.bf16 %v213_v31, %v210_v28 }
 0x132   :  { %v218_v36 = vpack.c.bf16 %v217_v34, %v216_v33  ;;  %362 = vrot.lane.b32.xlu1 %v356_v35, %s4648_s22  ;;  %358 = vrot.lane.b32.xlu0 %v356_v35, %s4649_s23 }
 0x134   :  { %4161 = vmatmul.mubr.msk.bf16.vlgmr.msra.gmra.mrb[0].mxu1 %vm171_vm1, %v218_v36 }
 0x135   :  { %4174 = vmatprep.mubr.msk.bf16.mxu1 %vm4645_vm0, %v4644_v0 }
 0x136   :  { %364 = vrot.lane.b32.xlu1 %v356_v35, %s4650_s2  ;;  %360 = vrot.lane.b32.xlu0 %v356_v35, %s4651_s25 }
 0x13a   :  { %368 = vrot.lane.b32.xlu1 %v356_v35, %s4652_s26  ;;  %366 = vrot.lane.b32.xlu0 %v356_v35, %s4653_s27 }
 0x13e   :  { %748 = vrot.lane.b32.xlu1 %v356_v35, %s4637_s19  ;;  %370 = vrot.lane.b32.xlu0 %v356_v35, %s4654_s28 }
 0x142   :  { %372 = vrot.lane.b32.xlu1 %v356_v35, %s4655_s0 }
 0x1a4   :  { %v363_v39 = vpop.permute.xlu1 %362  ;;  %v359_v40 = vpop.permute.xlu0 %358 }
 0x1a5   :  { %750 = vrot.lane.b32.xlu0 %v359_v40, %s4637_s19 }
 0x1a8   :  { %v361_v41 = vpop.permute.xlu0 %360  ;;  %v365_v42 = vpop.permute.xlu1 %364 }
 0x1a9   :  { %754 = vrot.lane.b32.xlu0 %v363_v39, %s4637_s19  ;;  %752 = vrot.lane.b32.xlu1 %v361_v41, %s4637_s19 }
 0x1ac   :  { %v367_v43 = vpop.permute.xlu0 %366  ;;  %v369_v44 = vpop.permute.xlu1 %368 }
 0x1ad   :  { %756 = vrot.lane.b32.xlu1 %v365_v42, %s4637_s19  ;;  %758 = vrot.lane.b32.xlu0 %v367_v43, %s4637_s19 }
 0x1b0   :  { %v371_v45 = vpop.permute.xlu0 %370  ;;  %v749_v53 = vpop.permute.xlu1 %748 }
 0x1b1   :  { %760 = vrot.lane.b32.xlu1 %v369_v44, %s4637_s19  ;;  %762 = vrot.lane.b32.xlu0 %v371_v45, %s4637_s19  ;;  %v768_v9 = vshrl.u32 %v749_v53, 16 }
 0x1b4   :  { %v4831_v56 = vpop.permute.xlu1 %372 }
 0x1b5   :  { %376 = vrot.lane.b32.xlu1 %v361_v41, %s4655_s0  ;;  %374 = vrot.lane.b32.xlu0 %v359_v40, %s4655_s0 }
 0x1b9   :  { %380 = vrot.lane.b32.xlu1 %v365_v42, %s4655_s0  ;;  %378 = vrot.lane.b32.xlu0 %v363_v39, %s4655_s0 }
 0x1bd   :  { %384 = vrot.lane.b32.xlu1 %v369_v44, %s4655_s0  ;;  %382 = vrot.lane.b32.xlu0 %v367_v43, %s4655_s0  ;;  %v392_v44 = vshrl.u32 %v4831_v56, 16 }
 0x1c1   :  { %386 = vrot.lane.b32.xlu0 %v371_v45, %s4655_s0 }
 0x207   :  { %v279_v47 = vpop.f32.mrb[0].mxu1 }
 0x208   :  { %v280_v48 = vadd.f32 %v3952_v46, %v279_v47  ;;  %v4162_v49 = vpop.f32.mrb[1].mxu1 }
 0x209   :  { %v282_v50 = vpop.f32.mrb[2].mxu1 }
 0x20a   :  { %v283_v51 = vadd.f32 %v3952_v46, %v282_v50  ;;  %v4163_v52 = vpop.f32.mrb[3].mxu1  ;;  %4446 = vtanh.f32 %v280_v48 }
 0x20c   :  { %4448 = vtanh.f32 %v283_v51 }
 0x214   :  { %v4447_v54 = vpop.eup %4446 }
 0x216   :  { %v4449_v55 = vpop.eup %4448 }
 0x217   :  { %v751_v57 = vpop.permute.xlu0 %750  ;;  %v288_v58 = vpack.c.bf16 %v4449_v55, %v4447_v54 }
 0x218   :  { %v766_v3 = vpack.i.b16 %v751_v57, %v749_v53  ;;  %v769_v4 = vshrl.u32 %v751_v57, 16 }
 0x219   :  { %4169 = vmatmul.mubr.msk.bf16.vlgmr.msra.gmra.mrb[4].mxu0 %vm171_vm1, %v288_v58 }
 0x21a   :  { %4180 = vmatprep.mubr.msk.bf16.mxu0 %vm4645_vm0, %v4644_v0  ;;  %v770_v19 = vpack.i.b16 %v769_v4, %v768_v9 }
 0x21b   :  { %v753_v59 = vpop.permute.xlu1 %752  ;;  %v755_v60 = vpop.permute.xlu0 %754 }
 0x21c   :  { %v776_v5 = vshrl.u32 %v753_v59, 16  ;;  %v777_v6 = vshrl.u32 %v755_v60, 16  ;;  %v774_v14 = vpack.i.b16 %v755_v60, %v753_v59 }
 0x21e   :  { %v778_v20 = vpack.i.b16 %v777_v6, %v776_v5 }
 0x21f   :  { %v757_v61 = vpop.permute.xlu1 %756  ;;  %v759_v62 = vpop.permute.xlu0 %758 }
 0x220   :  { %v784_v63 = vshrl.u32 %v757_v61, 16  ;;  %v782_v1 = vpack.i.b16 %v759_v62, %v757_v61  ;;  %v785_v2 = vshrl.u32 %v759_v62, 16 }
 0x222   :  { %v786_v11 = vpack.i.b16 %v785_v2, %v784_v63  ;;  %v796_v12 = vcombine.low %v766_v3, %v782_v1  ;;  %v797_v13 = vcombine.high %v766_v3, %v782_v1 }
 0x223   :  { %v761_v7 = vpop.permute.xlu1 %760  ;;  %v763_v8 = vpop.permute.xlu0 %762 }
 0x224   :  { %v792_v15 = vshrl.u32 %v761_v7, 16  ;;  %v790_v17 = vpack.i.b16 %v763_v8, %v761_v7  ;;  %v793_v18 = vshrl.u32 %v763_v8, 16  ;;  %v804_v26 = vrot.slane %v796_v12, %v4786_v10 }
 0x225   :  { %v811_v27 = vrot.slane %v797_v13, %v4786_v10  ;;  %v864_v28 = vcombine.low %v770_v19, %v786_v11  ;;  %v865_v33 = vcombine.high %v770_v19, %v786_v11 }
 0x226   :  { %v794_v21 = vpack.i.b16 %v793_v18, %v792_v15  ;;  %v812_v22 = vcombine.low %v774_v14, %v790_v17  ;;  %v813_v23 = vcombine.high %v774_v14, %v790_v17 }
 0x227   :  { %v377_v24 = vpop.permute.xlu1 %376  ;;  %v375_v25 = vpop.permute.xlu0 %374  ;;  %v872_v40 = vrot.slane %v864_v28, %v4786_v10  ;;  %v879_v47 = vrot.slane %v865_v33, %v4786_v10 }
 0x228   :  { %v820_v29 = vrot.slane %v812_v22, %v4786_v10  ;;  %v827_v30 = vrot.slane %v813_v23, %v4786_v10  ;;  %v880_v31 = vcombine.low %v778_v20, %v794_v21  ;;  %v881_v32 = vcombine.high %v778_v20, %v794_v21 }
 0x229   :  { %v393_v43 = vshrl.u32 %v375_v25, 16  ;;  %v400_v54 = vshrl.u32 %v377_v24, 16  ;;  %v390_v55 = vpack.i.b16 %v375_v25, %v4831_v56 }
 0x22a   :  { %v828_v34 = vcombine.low %v804_v26, %v820_v29  ;;  %v829_v35 = vcombine.high %v804_v26, %v820_v29  ;;  %v844_v36 = vcombine.low %v811_v27, %v827_v30  ;;  %v845_v37 = vcombine.high %v811_v27, %v827_v30 }
 0x22b   :  { %v381_v38 = vpop.permute.xlu1 %380  ;;  %v379_v39 = vpop.permute.xlu0 %378  ;;  %v888_v41 = vrot.slane %v880_v31, %v4786_v10  ;;  %v895_v42 = vrot.slane %v881_v32, %v4786_v10  ;;  %v394_v57 = vpack.i.b16 %v393_v43, %v392_v44 }
 0x22c   :  { %v836_v45 = vrot.slane %v828_v34, %v4789_v16  ;;  %v843_v46 = vrot.slane %v829_v35, %v4789_v16  ;;  %v852_v48 = vrot.slane %v844_v36, %v4789_v16  ;;  %v859_v49 = vrot.slane %v845_v37, %v4789_v16 }
 0x22d   :  { %v896_v50 = vcombine.low %v872_v40, %v888_v41  ;;  %v897_v51 = vcombine.high %v872_v40, %v888_v41  ;;  %v912_v53 = vcombine.low %v879_v47, %v895_v42  ;;  %v913_v58 = vcombine.high %v879_v47, %v895_v42 }
 0x22e   :  { %v932_v59 = vcombine.low %v836_v45, %v843_v46  ;;  %v408_v60 = vshrl.u32 %v381_v38, 16  ;;  %v398_v61 = vpack.i.b16 %v379_v39, %v377_v24  ;;  %v3980_v1 = vcombine.high %v836_v45, %v843_v46 }
 0x22f   :  { %v383_v52 = vpop.permute.xlu0 %382  ;;  %v385_v62 = vpop.permute.xlu1 %384  ;;  %v4851_v63 = vrot.slane %v896_v50, %v4789_v16  ;;  %v948_v2 = vcombine.low %v852_v48, %v859_v49  ;;  %v3981_v3 = vcombine.high %v852_v48, %v859_v49  ;;  %v4854_v4 = vrot.slane %v897_v51, %v4789_v16 }
 0x230   :  { %v401_v5 = vshrl.u32 %v379_v39, 16  ;;  %v406_v6 = vpack.i.b16 %v383_v52, %v381_v38  ;;  %v409_v7 = vshrl.u32 %v383_v52, 16  ;;  %v4857_v56 = vrot.slane %v912_v53, %v4789_v16 }
 0x231   :  { %v416_v9 = vshrl.u32 %v385_v62, 16  ;;  %v4860_v13 = vrot.slane %v913_v58, %v4789_v16  ;;  %v4867_v30 = vrot.slane %v932_v59, %v4786_v10  ;;  %v4870_v31 = vrot.slane %v3980_v1, %v4786_v10 }
 0x232   :  { %v410_v14 = vpack.i.b16 %v409_v7, %v408_v60  ;;  %v420_v15 = vcombine.low %v390_v55, %v406_v6  ;;  %v421_v17 = vcombine.high %v390_v55, %v406_v6  ;;  %v402_v18 = vpack.i.b16 %v401_v5, %v400_v54 }
 0x233   :  { %v387_v8 = vpop.permute.xlu0 %386  ;;  %v4873_v32 = vrot.slane %v948_v2, %v4786_v10  ;;  %v4876_v33 = vrot.slane %v3981_v3, %v4786_v10  ;;  %v1000_v50 = vcombine.low %v4851_v63, %v4854_v4  ;;  %v3982_v51 = vcombine.high %v4851_v63, %v4854_v4 }
 0x234   :  { %v414_v11 = vpack.i.b16 %v387_v8, %v385_v62  ;;  %v417_v12 = vshrl.u32 %v387_v8, 16  ;;  %v428_v22 = vrot.slane %v420_v15, %v4786_v10  ;;  %v435_v23 = vrot.slane %v421_v17, %v4786_v10 }
 0x235   :  { %v488_v24 = vcombine.low %v394_v57, %v410_v14  ;;  %v489_v25 = vcombine.high %v394_v57, %v410_v14  ;;  %v1016_v52 = vcombine.low %v4857_v56, %v4860_v13  ;;  %v3983_v53 = vcombine.high %v4857_v56, %v4860_v13 }
 0x236   :  { %v418_v19 = vpack.i.b16 %v417_v12, %v416_v9  ;;  %v436_v20 = vcombine.low %v398_v61, %v414_v11  ;;  %v437_v21 = vcombine.high %v398_v61, %v414_v11  ;;  %v964_v4 = vcombine.low %v4867_v30, %v4870_v31 }
 0x237   :  { %v496_v38 = vrot.slane %v488_v24, %v4786_v10  ;;  %v503_v39 = vrot.slane %v489_v25, %v4786_v10  ;;  %v980_v5 = vcombine.low %v4873_v32, %v4876_v33  ;;  %v4903_v6 = vrot.slane %v1000_v50, %v4786_v10 }
 0x238   :  { %v444_v26 = vrot.slane %v436_v20, %v4786_v10  ;;  %v451_v27 = vrot.slane %v437_v21, %v4786_v10  ;;  %v504_v28 = vcombine.low %v402_v18, %v418_v19  ;;  %v505_v29 = vcombine.high %v402_v18, %v418_v19 }
 0x239   :  { %v4906_v7 = vrot.slane %v3982_v51, %v4786_v10  ;;  %v4937_v19 = vrot.slane %v1016_v52, %v4786_v10  ;;  %v4940_v20 = vrot.slane %v3983_v53, %v4786_v10 }
 0x23a   :  { %v452_v34 = vcombine.low %v428_v22, %v444_v26  ;;  %v453_v35 = vcombine.high %v428_v22, %v444_v26  ;;  %v468_v36 = vcombine.low %v435_v23, %v451_v27  ;;  %v469_v37 = vcombine.high %v435_v23, %v451_v27 }
 0x23b   :  { %v512_v40 = vrot.slane %v504_v28, %v4786_v10  ;;  %v519_v41 = vrot.slane %v505_v29, %v4786_v10  ;;  %v1032_v21 = vcombine.low %v4903_v6, %v4906_v7  ;;  %v972_v22 = vrot.slane %v964_v4, %v4789_v16 }
 0x23c   :  { %v460_v42 = vrot.slane %v452_v34, %v4789_v16  ;;  %v467_v43 = vrot.slane %v453_v35, %v4789_v16  ;;  %v476_v44 = vrot.slane %v468_v36, %v4789_v16  ;;  %v483_v45 = vrot.slane %v469_v37, %v4789_v16 }
 0x23d   :  { %v520_v46 = vcombine.low %v496_v38, %v512_v40  ;;  %v521_v47 = vcombine.high %v496_v38, %v512_v40  ;;  %v536_v48 = vcombine.low %v503_v39, %v519_v41  ;;  %v537_v49 = vcombine.high %v503_v39, %v519_v41 }
 0x23e   :  { %v556_v59 = vcombine.low %v460_v42, %v467_v43  ;;  %v3960_v60 = vcombine.high %v460_v42, %v467_v43  ;;  %v572_v61 = vcombine.low %v476_v44, %v483_v45  ;;  %v3961_v62 = vcombine.high %v476_v44, %v483_v45 }
 0x23f   :  { %v528_v54 = vrot.slane %v520_v46, %v4789_v16  ;;  %v535_v55 = vrot.slane %v521_v47, %v4789_v16  ;;  %v544_v57 = vrot.slane %v536_v48, %v4789_v16  ;;  %v551_v58 = vrot.slane %v537_v49, %v4789_v16 }
 0x240   :  { %v4921_v12 = vrot.slane %v556_v59, %v4786_v10  ;;  %v4924_v13 = vrot.slane %v3960_v60, %v4786_v10  ;;  %v4927_v14 = vrot.slane %v572_v61, %v4786_v10  ;;  %v4930_v15 = vrot.slane %v3961_v62, %v4786_v10 }
 0x241   :  { %v624_v1 = vcombine.low %v528_v54, %v535_v55  ;;  %v3962_v63 = vcombine.high %v528_v54, %v535_v55  ;;  %v640_v2 = vcombine.low %v544_v57, %v551_v58  ;;  %v3963_v3 = vcombine.high %v544_v57, %v551_v58 }
 0x242   :  { %v988_v23 = vrot.slane %v980_v5, %v4789_v16  ;;  %v588_v24 = vcombine.low %v4921_v12, %v4924_v13  ;;  %v604_v25 = vcombine.low %v4927_v14, %v4930_v15  ;;  %v1040_v26 = vrot.slane %v1032_v21, %v4789_v16 }
 0x243   :  { %v4909_v8 = vrot.slane %v624_v1, %v4786_v10  ;;  %v4912_v56 = vrot.slane %v3962_v63, %v4786_v10  ;;  %v4915_v9 = vrot.slane %v640_v2, %v4786_v10  ;;  %v4918_v11 = vrot.slane %v3963_v3, %v4786_v10 }
 0x244   :  { %v1048_v27 = vcombine.low %v4937_v19, %v4940_v20  ;;  %v596_v35 = vrot.slane %v588_v24, %v4789_v16  ;;  %v612_v36 = vrot.slane %v604_v25, %v4789_v16  ;;  %v996_v37 = vcombine.low %v972_v22, %v988_v23 }
 0x245   :  { %v656_v17 = vcombine.low %v4909_v8, %v4912_v56  ;;  %v672_v18 = vcombine.low %v4915_v9, %v4918_v11  ;;  %v997_v57 = vcombine.high %v972_v22, %v988_v23  ;;  %v1033_v3 = vcombine.high %v4903_v6, %v4906_v7 }
 0x246   :  { %v1056_v28 = vrot.slane %v1048_v27, %v4789_v16  ;;  %v620_v44 = vcombine.low %v596_v35, %v612_v36  ;;  %v1071_v45 = vshrl.u32 %v996_v37, 16  ;;  %v1049_v4 = vcombine.high %v4937_v19, %v4940_v20 }
 0x247   :  { %v664_v29 = vrot.slane %v656_v17, %v4789_v16  ;;  %v680_v34 = vrot.slane %v672_v18, %v4789_v16  ;;  %v1077_v17 = vshrl.u32 %v997_v57, 16  ;;  %v965_v22 = vcombine.high %v4867_v30, %v4870_v31 }
 0x248   :  { %v1064_v38 = vcombine.low %v1040_v26, %v1056_v28  ;;  %v1065_v50 = vcombine.high %v1040_v26, %v1056_v28  ;;  %v695_v60 = vshrl.u32 %v620_v44, 16  ;;  %v981_v23 = vcombine.high %v4873_v32, %v4876_v33 }
 0x249   :  { %v688_v40 = vcombine.low %v664_v29, %v680_v34  ;;  %v689_v5 = vcombine.high %v664_v29, %v680_v34  ;;  %v621_v24 = vcombine.high %v596_v35, %v612_v36  ;;  %v1047_v19 = vrot.slane %v1033_v3, %v4789_v16 }
 0x24a   :  { %v1070_v39 = vpack.i.b16 %v1064_v38, %v996_v37  ;;  %v1072_v41 = vshrl.u32 %v1064_v38, 16  ;;  %v1076_v61 = vpack.i.b16 %v1065_v50, %v997_v57  ;;  %v1078_v1 = vshrl.u32 %v1065_v50, 16 }
 0x24b   :  { %v694_v48 = vpack.i.b16 %v688_v40, %v620_v44  ;;  %v696_v55 = vshrl.u32 %v688_v40, 16  ;;  %v1063_v20 = vrot.slane %v1049_v4, %v4789_v16  ;;  %v700_v30 = vpack.i.b16 %v689_v5, %v621_v24 }
 0x24c   :  { %v3984_v42 = vcombine.low %v1070_v39, %v1070_v39  ;;  %v3985_v43 = vcombine.high %v1070_v39, %v1070_v39  ;;  %v1073_v49 = vpack.i.b16 %v1072_v41, %v1071_v45  ;;  %v3988_v63 = vcombine.low %v1076_v61, %v1076_v61 }
 0x24d   :  { %v3964_v51 = vcombine.low %v694_v48, %v694_v48  ;;  %v3965_v52 = vcombine.high %v694_v48, %v694_v48  ;;  %v697_v62 = vpack.i.b16 %v696_v55, %v695_v60  ;;  %v3989_v2 = vcombine.high %v1076_v61, %v1076_v61 }
 0x24e   :  { %v1505_v46 = vsel %vm1500_vm2, %v3984_v42, 0  ;;  %v1551_v47 = vsel %vm1500_vm2, %v3985_v43, 0  ;;  %v3986_v53 = vcombine.low %v1073_v49, %v1073_v49  ;;  %v3987_v54 = vcombine.high %v1073_v49, %v1073_v49 }
 0x24f   :  { %4173 = vmatpush3.bf16.xpose.msra.mxu1 %v1505_v46  ;;  %4179 = vmatpush3.bf16.xpose.msra.mxu0 %v1551_v47  ;;  %v3966_v18 = vcombine.low %v697_v62, %v697_v62  ;;  %v3967_v21 = vcombine.high %v697_v62, %v697_v62  ;;  %v1079_v25 = vpack.i.b16 %v1078_v1, %v1077_v17  ;;  %v1689_v6 = vsel %vm1500_vm2, %v3988_v63, 0 }
 0x250   :  { %4184 = vmatprep.subr.bf16.mxu1 %v4644_v0  ;;  %4190 = vmatprep.subr.bf16.mxu0 %v4644_v0  ;;  %v1597_v58 = vsel %vm1500_vm2, %v3986_v53, 0  ;;  %v1643_v59 = vsel %vm1500_vm2, %v3987_v54, 0  ;;  %v1735_v7 = vsel %vm1500_vm2, %v3989_v2, 0  ;;  %v979_v31 = vrot.slane %v965_v22, %v4789_v16 }
 0x251   :  { %v995_v32 = vrot.slane %v981_v23, %v4789_v16  ;;  %v3990_v33 = vcombine.low %v1079_v25, %v1079_v25  ;;  %v3991_v26 = vcombine.high %v1079_v25, %v1079_v25  ;;  %v1066_v27 = vcombine.low %v1047_v19, %v1063_v20 }
 0x252   :  { %v657_v28 = vcombine.high %v4909_v8, %v4912_v56  ;;  %v673_v29 = vcombine.high %v4915_v9, %v4918_v11  ;;  %v3968_v34 = vcombine.low %v700_v30, %v700_v30  ;;  %v3969_v35 = vcombine.high %v700_v30, %v700_v30 }
 0x253   :  { %v702_v36 = vshrl.u32 %v689_v5, 16  ;;  %v998_v37 = vcombine.low %v979_v31, %v995_v32  ;;  %v589_v38 = vcombine.high %v4921_v12, %v4924_v13  ;;  %v605_v39 = vcombine.high %v4927_v14, %v4930_v15 }
 0x254   :  { %v1781_v40 = vsel %vm1500_vm2, %v3990_v33, 0  ;;  %v1827_v8 = vsel %vm1500_vm2, %v3991_v26, 0  ;;  %v701_v56 = vshrl.u32 %v621_v24, 16  ;;  %v671_v12 = vrot.slane %v657_v28, %v4789_v16 }
 0x255   :  { %v1082_v9 = vpack.i.b16 %v1066_v27, %v998_v37  ;;  %v687_v13 = vrot.slane %v673_v29, %v4789_v16  ;;  %v603_v14 = vrot.slane %v589_v38, %v4789_v16  ;;  %v619_v15 = vrot.slane %v605_v39, %v4789_v16 }
 0x256   :  { %4175 = vmatmul.mubr.msk.bf16.vlgmr.msra.gmra.mrb[4].mxu1 %vm1500_vm2, %v3964_v51  ;;  %4181 = vmatmul.mubr.msk.bf16.vlgmr.msra.gmra.mrb[8].mxu0 %vm1500_vm2, %v3965_v52  ;;  %v703_v11 = vpack.i.b16 %v702_v36, %v701_v56  ;;  %v1084_v43 = vshrl.u32 %v1066_v27, 16  ;;  %v1083_v47 = vshrl.u32 %v998_v37, 16  ;;  %v1067_v55 = vcombine.high %v1047_v19, %v1063_v20 }
 0x257   :  { %4185 = vmatpush3.bf16.xpose.msra.mxu1 %v1597_v58  ;;  %4191 = vmatpush3.bf16.xpose.msra.mxu0 %v1643_v59  ;;  %v3992_v41 = vcombine.low %v1082_v9, %v1082_v9  ;;  %v3993_v42 = vcombine.high %v1082_v9, %v1082_v9  ;;  %v690_v46 = vcombine.low %v671_v12, %v687_v13 }
 0x258   :  { %4186 = vmatprep.mubr.msk.bf16.mxu1 %vm4645_vm0, %v4644_v0  ;;  %4192 = vmatprep.mubr.msk.bf16.mxu0 %vm4645_vm0, %v4644_v0  ;;  %v3970_v44 = vcombine.low %v703_v11, %v703_v11  ;;  %v3971_v45 = vcombine.high %v703_v11, %v703_v11  ;;  %v622_v50 = vcombine.low %v603_v14, %v619_v15  ;;  %v1090_v5 = vshrl.u32 %v1067_v55, 16 }
 0x259   :  { %4196 = vmatprep.subr.bf16.mxu1 %v4644_v0  ;;  %4202 = vmatprep.subr.bf16.mxu0 %v4644_v0  ;;  %v1873_v48 = vsel %vm1500_vm2, %v3992_v41, 0  ;;  %v1919_v49 = vsel %vm1500_vm2, %v3993_v42, 0  ;;  %v1085_v51 = vpack.i.b16 %v1084_v43, %v1083_v47  ;;  %v708_v59 = vshrl.u32 %v690_v46, 16 }
 0x25a   :  { %v706_v52 = vpack.i.b16 %v690_v46, %v622_v50  ;;  %v999_v60 = vcombine.high %v979_v31, %v995_v32  ;;  %v707_v1 = vshrl.u32 %v622_v50, 16  ;;  %v623_v25 = vcombine.high %v603_v14, %v619_v15 }
 0x25b   :  { %v3994_v53 = vcombine.low %v1085_v51, %v1085_v51  ;;  %v3995_v54 = vcombine.high %v1085_v51, %v1085_v51 }
 0x25c   :  { %v3972_v57 = vcombine.low %v706_v52, %v706_v52  ;;  %v3973_v58 = vcombine.high %v706_v52, %v706_v52  ;;  %v1088_v63 = vpack.i.b16 %v1067_v55, %v999_v60  ;;  %v709_v2 = vpack.i.b16 %v708_v59, %v707_v1 }
 0x25d   :  { %v1965_v61 = vsel %vm1500_vm2, %v3994_v53, 0  ;;  %v2011_v62 = vsel %vm1500_vm2, %v3995_v54, 0  ;;  %v1089_v22 = vshrl.u32 %v999_v60, 16  ;;  %v713_v27 = vshrl.u32 %v623_v25, 16 }
 0x25e   :  { %4187 = vmatmul.mubr.msk.bf16.vlgmr.msra.gmra.mrb[8].mxu1 %vm1500_vm2, %v3966_v18  ;;  %4193 = vmatmul.mubr.msk.bf16.vlgmr.msra.gmra.mrb[12].mxu0 %vm1500_vm2, %v3967_v21  ;;  %v3996_v3 = vcombine.low %v1088_v63, %v1088_v63  ;;  %v3997_v4 = vcombine.high %v1088_v63, %v1088_v63  ;;  %v3974_v17 = vcombine.low %v709_v2, %v709_v2 }
 0x25f   :  { %4197 = vmatpush3.bf16.xpose.msra.mxu1 %v1689_v6  ;;  %4203 = vmatpush3.bf16.xpose.msra.mxu0 %v1735_v7  ;;  %v3975_v18 = vcombine.high %v709_v2, %v709_v2  ;;  %v691_v21 = vcombine.high %v671_v12, %v687_v13  ;;  %v1091_v6 = vpack.i.b16 %v1090_v5, %v1089_v22 }
 0x260   :  { %4198 = vmatprep.mubr.msk.bf16.mxu1 %vm4645_vm0, %v4644_v0  ;;  %4204 = vmatprep.mubr.msk.bf16.mxu0 %vm4645_vm0, %v4644_v0  ;;  %v2057_v23 = vsel %vm1500_vm2, %v3996_v3, 0  ;;  %v2103_v24 = vsel %vm1500_vm2, %v3997_v4, 0 }
 0x261   :  { %4208 = vmatprep.subr.bf16.mxu1 %v4644_v0  ;;  %4214 = vmatprep.subr.bf16.mxu0 %v4644_v0  ;;  %v712_v7 = vpack.i.b16 %v691_v21, %v623_v25  ;;  %v3998_v19 = vcombine.low %v1091_v6, %v1091_v6  ;;  %v3999_v20 = vcombine.high %v1091_v6, %v1091_v6  ;;  %v714_v32 = vshrl.u32 %v691_v21, 16 }
 0x263   :  { %v3976_v30 = vcombine.low %v712_v7, %v712_v7  ;;  %v3977_v31 = vcombine.high %v712_v7, %v712_v7  ;;  %v2149_v33 = vsel %vm1500_vm2, %v3998_v19, 0  ;;  %v2195_v26 = vsel %vm1500_vm2, %v3999_v20, 0 }
 0x264   :  { %v715_v28 = vpack.i.b16 %v714_v32, %v713_v27 }
 0x266   :  { %4199 = vmatmul.mubr.msk.bf16.vlgmr.msra.gmra.mrb[12].mxu1 %vm1500_vm2, %v3968_v34  ;;  %4205 = vmatmul.mubr.msk.bf16.vlgmr.msra.gmra.mrb[16].mxu0 %vm1500_vm2, %v3969_v35  ;;  %v3978_v29 = vcombine.low %v715_v28, %v715_v28  ;;  %v3979_v34 = vcombine.high %v715_v28, %v715_v28  ;;  %v3956_v35 = vld [vmem:[%s5552_s6] ss:$0 sm:$0xff]  ;;  %s4656_s6 = smov 8  }
 0x267   :  { %4209 = vmatpush3.bf16.xpose.msra.mxu1 %v1781_v40  ;;  %4215 = vmatpush3.bf16.xpose.msra.mxu0 %v1827_v8 }
 0x268   :  { %4210 = vmatprep.mubr.msk.bf16.mxu1 %vm4645_vm0, %v4644_v0  ;;  %4216 = vmatprep.mubr.msk.bf16.mxu0 %vm4645_vm0, %v4644_v0 }
 0x269   :  { %4220 = vmatprep.subr.bf16.mxu1 %v4644_v0  ;;  %4226 = vmatprep.subr.bf16.mxu0 %v4644_v0 }
 0x26e   :  { %4211 = vmatmul.mubr.msk.bf16.vlgmr.msra.gmra.mrb[16].mxu1 %vm1500_vm2, %v3970_v44  ;;  %4217 = vmatmul.mubr.msk.bf16.vlgmr.msra.gmra.mrb[20].mxu0 %vm1500_vm2, %v3971_v45 }
 0x26f   :  { %4221 = vmatpush3.bf16.xpose.msra.mxu1 %v1873_v48  ;;  %4227 = vmatpush3.bf16.xpose.msra.mxu0 %v1919_v49 }
 0x270   :  { %4222 = vmatprep.mubr.msk.bf16.mxu1 %vm4645_vm0, %v4644_v0  ;;  %4228 = vmatprep.mubr.msk.bf16.mxu0 %vm4645_vm0, %v4644_v0 }
 0x271   :  { %4232 = vmatprep.subr.bf16.mxu1 %v4644_v0  ;;  %4238 = vmatprep.subr.bf16.mxu0 %v4644_v0 }
 0x276   :  { %4223 = vmatmul.mubr.msk.bf16.vlgmr.msra.gmra.mrb[20].mxu1 %vm1500_vm2, %v3972_v57  ;;  %4229 = vmatmul.mubr.msk.bf16.vlgmr.msra.gmra.mrb[24].mxu0 %vm1500_vm2, %v3973_v58 }
 0x277   :  { %4233 = vmatpush3.bf16.xpose.msra.mxu1 %v1965_v61  ;;  %4239 = vmatpush3.bf16.xpose.msra.mxu0 %v2011_v62 }
 0x278   :  { %4234 = vmatprep.mubr.msk.bf16.mxu1 %vm4645_vm0, %v4644_v0  ;;  %4240 = vmatprep.mubr.msk.bf16.mxu0 %vm4645_vm0, %v4644_v0 }
 0x279   :  { %4244 = vmatprep.subr.bf16.mxu1 %v4644_v0  ;;  %4250 = vmatprep.subr.bf16.mxu0 %v4644_v0 }
 0x27e   :  { %4235 = vmatmul.mubr.msk.bf16.vlgmr.msra.gmra.mrb[24].mxu1 %vm1500_vm2, %v3974_v17  ;;  %4241 = vmatmul.mubr.msk.bf16.vlgmr.msra.gmra.mrb[28].mxu0 %vm1500_vm2, %v3975_v18 }
 0x27f   :  { %4245 = vmatpush3.bf16.xpose.msra.mxu1 %v2057_v23  ;;  %4251 = vmatpush3.bf16.xpose.msra.mxu0 %v2103_v24 }
 0x280   :  { %4246 = vmatprep.mubr.msk.bf16.mxu1 %vm4645_vm0, %v4644_v0  ;;  %4252 = vmatprep.mubr.msk.bf16.mxu0 %vm4645_vm0, %v4644_v0 }
 0x281   :  { %4256 = vmatprep.subr.bf16.mxu1 %v4644_v0  ;;  %4262 = vmatprep.subr.bf16.mxu0 %v4644_v0 }
 0x286   :  { %4247 = vmatmul.mubr.msk.bf16.vlgmr.msra.gmra.mrb[28].mxu1 %vm1500_vm2, %v3976_v30  ;;  %4253 = vmatmul.mubr.msk.bf16.vlgmr.msra.gmra.mrb[32].mxu0 %vm1500_vm2, %v3977_v31 }
 0x287   :  { %4257 = vmatpush3.bf16.xpose.msra.mxu1 %v2149_v33  ;;  %4263 = vmatpush3.bf16.xpose.msra.mxu0 %v2195_v26 }
 0x288   :  { %4258 = vmatprep.mubr.msk.bf16.mxu1 %vm4645_vm0, %v4644_v0  ;;  %4264 = vmatprep.mubr.msk.bf16.mxu0 %vm4645_vm0, %v4644_v0 }
 0x289   :  { %4268 = vmatprep.subr.bf16.mxu1 %v4644_v0  ;;  %4274 = vmatprep.subr.bf16.mxu0 %v4644_v0 }
 0x28e   :  { %4259 = vmatmul.mubr.msk.bf16.vlgmr.msra.gmra.mrb[32].mxu1 %vm1500_vm2, %v3978_v29  ;;  %4265 = vmatmul.mubr.msk.bf16.vlgmr.msra.gmra.mrb[36].mxu0 %vm1500_vm2, %v3979_v34 }
 0x28f   :  { %4270 = vmatprep.mubr.msk.bf16.mxu1 %vm4645_vm0, %v4644_v0  ;;  %4276 = vmatprep.mubr.msk.bf16.mxu0 %vm4645_vm0, %v4644_v0 }
 0x2ec   :  { %v349_v36 = vpop.f32.mrb[4].mxu0 }
 0x2ed   :  { %v4170_v37 = vpop.f32.mrb[5].mxu0  ;;  %v350_v39 = vadd.f32 %v3956_v35, %v349_v36 }
 0x2ee   :  { %v352_v38 = vpop.f32.mrb[6].mxu0 }
 0x2ef   :  { %v353_v40 = vadd.f32 %v3956_v35, %v352_v38  ;;  %v4171_v8 = vpop.f32.mrb[7].mxu0 }
 0x2f1   :  { %v5065_v56 = vpack.c.bf16 %v353_v40, %v350_v39 }
 0x2f3   :  { %1128 = vrot.lane.b32.xlu1 %v5065_v56, %s4651_s25  ;;  %1126 = vrot.lane.b32.xlu0 %v5065_v56, %s4649_s23 }
 0x2f7   :  { %1130 = vrot.lane.b32.xlu1 %v5065_v56, %s4648_s22 }
 0x329   :  { %v5073_v9 = vpop.f32.mrb[4].mxu1  ;;  %v5075_v11 = vpop.f32.mrb[8].mxu0 }
 0x32a   :  { %v4176_v12 = vpop.f32.mrb[5].mxu1  ;;  %v4182_v13 = vpop.f32.mrb[9].mxu0  ;;  %v2238_v14 = vsel %vm2237_vm3, %v5073_v9, -inf  ;;  %v2241_v15 = vsel %vm2237_vm3, %v5075_v11, -inf }
 0x32b   :  { %v1544_v41 = vpop.f32.mrb[6].mxu1  ;;  %2239 = vmax.xlane.f32.xlu1 %v2238_v14  ;;  %2242 = vmax.xlane.f32.xlu0 %v2241_v15  ;;  %v1590_v42 = vpop.f32.mrb[10].mxu0 }
 0x32c   :  { %v4177_v43 = vpop.f32.mrb[7].mxu1  ;;  %v4183_v44 = vpop.f32.mrb[11].mxu0 }
 0x331   :  { %v5081_v45 = vpop.f32.mrb[8].mxu1  ;;  %v5083_v46 = vpop.f32.mrb[12].mxu0 }
 0x332   :  { %v4188_v47 = vpop.f32.mrb[9].mxu1  ;;  %v4194_v48 = vpop.f32.mrb[13].mxu0  ;;  %v2244_v49 = vsel %vm2237_vm3, %v5081_v45, -inf  ;;  %v2247_v50 = vsel %vm2237_vm3, %v5083_v46, -inf }
 0x333   :  { %v1636_v51 = vpop.f32.mrb[10].mxu1  ;;  %2245 = vmax.xlane.f32.xlu0 %v2244_v49  ;;  %2248 = vmax.xlane.f32.xlu1 %v2247_v50  ;;  %v1682_v52 = vpop.f32.mrb[14].mxu0 }
 0x334   :  { %v4189_v53 = vpop.f32.mrb[11].mxu1  ;;  %v4195_v54 = vpop.f32.mrb[15].mxu0 }
 0x339   :  { %v5089_v55 = vpop.f32.mrb[12].mxu1  ;;  %v5091_v57 = vpop.f32.mrb[16].mxu0 }
 0x33a   :  { %v4200_v58 = vpop.f32.mrb[13].mxu1  ;;  %v4206_v59 = vpop.f32.mrb[17].mxu0  ;;  %v2250_v47 = vsel %vm2237_vm3, %v5089_v55, -inf  ;;  %v2253_v48 = vsel %vm2237_vm3, %v5091_v57, -inf }
 0x33b   :  { %v1728_v60 = vpop.f32.mrb[14].mxu1  ;;  %v1774_v61 = vpop.f32.mrb[18].mxu0 }
 0x33c   :  { %v4201_v62 = vpop.f32.mrb[15].mxu1  ;;  %v4207_v1 = vpop.f32.mrb[19].mxu0 }
 0x341   :  { %v5093_v63 = vpop.f32.mrb[16].mxu1  ;;  %v5095_v2 = vpop.f32.mrb[20].mxu0 }
 0x342   :  { %v4212_v3 = vpop.f32.mrb[17].mxu1  ;;  %v4218_v4 = vpop.f32.mrb[21].mxu0  ;;  %v2256_v49 = vsel %vm2237_vm3, %v5093_v63, -inf  ;;  %v2259_v50 = vsel %vm2237_vm3, %v5095_v2, -inf }
 0x343   :  { %v1820_v5 = vpop.f32.mrb[18].mxu1  ;;  %v1866_v17 = vpop.f32.mrb[22].mxu0 }
 0x344   :  { %v4213_v18 = vpop.f32.mrb[19].mxu1  ;;  %1134 = vrot.lane.b32.xlu1 %v5065_v56, %s4653_s27  ;;  %v4219_v21 = vpop.f32.mrb[23].mxu0 }
 0x349   :  { %v5099_v22 = vpop.f32.mrb[20].mxu1  ;;  %1132 = vrot.lane.b32.xlu0 %v5065_v56, %s4650_s2  ;;  %v5103_v23 = vpop.f32.mrb[24].mxu0 }
 0x34a   :  { %v4224_v24 = vpop.f32.mrb[21].mxu1  ;;  %v4230_v25 = vpop.f32.mrb[25].mxu0  ;;  %v2262_v51 = vsel %vm2237_vm3, %v5099_v22, -inf  ;;  %v2265_v52 = vsel %vm2237_vm3, %v5103_v23, -inf }
 0x34b   :  { %v1912_v6 = vpop.f32.mrb[22].mxu1  ;;  %v1958_v7 = vpop.f32.mrb[26].mxu0 }
 0x34c   :  { %v4225_v19 = vpop.f32.mrb[23].mxu1  ;;  %v4231_v20 = vpop.f32.mrb[27].mxu0 }
 0x351   :  { %v5105_v30 = vpop.f32.mrb[24].mxu1  ;;  %v5107_v31 = vpop.f32.mrb[28].mxu0 }
 0x352   :  { %v4236_v32 = vpop.f32.mrb[25].mxu1  ;;  %v4242_v33 = vpop.f32.mrb[29].mxu0  ;;  %v2268_v53 = vsel %vm2237_vm3, %v5105_v30, -inf  ;;  %v2271_v54 = vsel %vm2237_vm3, %v5107_v31, -inf }
 0x353   :  { %v2004_v26 = vpop.f32.mrb[26].mxu1  ;;  %v2050_v27 = vpop.f32.mrb[30].mxu0 }
 0x354   :  { %v4237_v28 = vpop.f32.mrb[27].mxu1  ;;  %v4243_v29 = vpop.f32.mrb[31].mxu0 }
 0x359   :  { %v5109_v34 = vpop.f32.mrb[28].mxu1  ;;  %v5111_v35 = vpop.f32.mrb[32].mxu0 }
 0x35a   :  { %v4248_v36 = vpop.f32.mrb[29].mxu1  ;;  %v4254_v37 = vpop.f32.mrb[33].mxu0  ;;  %v2274_v58 = vsel %vm2237_vm3, %v5109_v34, -inf  ;;  %v2277_v59 = vsel %vm2237_vm3, %v5111_v35, -inf }
 0x35b   :  { %v2096_v38 = vpop.f32.mrb[30].mxu1  ;;  %v2142_v39 = vpop.f32.mrb[34].mxu0 }
 0x35c   :  { %v4249_v40 = vpop.f32.mrb[31].mxu1  ;;  %v4255_v8 = vpop.f32.mrb[35].mxu0 }
 0x361   :  { %v5113_v12 = vpop.f32.mrb[32].mxu1  ;;  %v5115_v13 = vpop.f32.mrb[36].mxu0 }
 0x362   :  { %v4260_v14 = vpop.f32.mrb[33].mxu1  ;;  %v4266_v15 = vpop.f32.mrb[37].mxu0  ;;  %v2280_v60 = vsel %vm2237_vm3, %v5113_v12, -inf  ;;  %v2283_v61 = vsel %vm2237_vm3, %v5115_v13, -inf }
 0x363   :  { %v2188_v41 = vpop.f32.mrb[34].mxu1  ;;  %v2234_v42 = vpop.f32.mrb[38].mxu0 }
 0x364   :  { %v4261_v43 = vpop.f32.mrb[35].mxu1  ;;  %v4267_v44 = vpop.f32.mrb[39].mxu0 }
 0x365   :  { %v5145_v62 = vpop.permute.xlu1 %1128  ;;  %v5147_v1 = vpop.permute.xlu0 %1126 }
 0x368   :  { %2251 = vmax.xlane.f32.xlu0 %v2250_v47  ;;  %2254 = vmax.xlane.f32.xlu1 %v2253_v48 }
 0x369   :  { %v5149_v3 = vpop.permute.xlu1 %1130 }
 0x36c   :  { %2257 = vmax.xlane.f32.xlu0 %v2256_v49  ;;  %2260 = vmax.xlane.f32.xlu1 %v2259_v50 }
 0x370   :  { %2263 = vmax.xlane.f32.xlu0 %v2262_v51  ;;  %2266 = vmax.xlane.f32.xlu1 %v2265_v52 }
 0x374   :  { %2269 = vmax.xlane.f32.xlu0 %v2268_v53  ;;  %2272 = vmax.xlane.f32.xlu1 %v2271_v54 }
 0x378   :  { %2275 = vmax.xlane.f32.xlu0 %v2274_v58  ;;  %2278 = vmax.xlane.f32.xlu1 %v2277_v59 }
 0x37c   :  { %2281 = vmax.xlane.f32.xlu0 %v2280_v60  ;;  %2284 = vmax.xlane.f32.xlu1 %v2283_v61 }
 0x38d   :  { %1138 = vrot.lane.b32.xlu1 %v5065_v56, %s4654_s28 }
 0x392   :  { %1136 = vrot.lane.b32.xlu0 %v5065_v56, %s4652_s26 }
 0x3b8   :  { %v2240_v4 = vpop.xlane.xlu1 %2239  ;;  %v2243_v5 = vpop.xlane.xlu0 %2242 }
 0x3b9   :  { %v2286_v17 = vsub.f32 %v5073_v9, %v2240_v4  ;;  %v2287_v18 = vsub.f32 %v5075_v11, %v2243_v5 }
 0x3bb   :  { %v2302_v21 = vmul.f32 1.442695, %v2286_v17  ;;  %v2304_v24 = vmul.f32 1.442695, %v2287_v18 }
 0x3bd   :  { %4450 = vpow2.f32 %v2302_v21  ;;  %v1145_v21 = vshrl.u32 %v5147_v1, 16 }
 0x3be   :  { %4452 = vpow2.f32 %v2304_v24 }
 0x3c0   :  { %v2246_v25 = vpop.xlane.xlu0 %2245  ;;  %v2249_v6 = vpop.xlane.xlu1 %2248 }
 0x3c1   :  { %v2288_v7 = vsub.f32 %v5081_v45, %v2246_v25  ;;  %v2289_v19 = vsub.f32 %v5083_v46, %v2249_v6 }
 0x3c3   :  { %v2306_v20 = vmul.f32 1.442695, %v2288_v7  ;;  %v2308_v32 = vmul.f32 1.442695, %v2289_v19 }
 0x3c4   :  { %v5171_v29 = vpop.permute.xlu0 %1132  ;;  %v5173_v36 = vpop.permute.xlu1 %1134 }
 0x3c5   :  { %4454 = vpow2.f32 %v2306_v20  ;;  %v1161_v17 = vshrl.u32 %v5173_v36, 16 }
 0x3c6   :  { %4456 = vpow2.f32 %v2308_v32 }
 0x3c7   :  { %v5155_v33 = vpop.eup %4450 }
 0x3c8   :  { %v5157_v26 = vpop.eup %4452  ;;  %v2334_v9 = vsel %vm2237_vm3, %v5155_v33, 0.0 }
 0x3c9   :  { %2335 = vadd.xlane.f32.xlu0 %v2334_v9  ;;  %v2337_v11 = vsel %vm2237_vm3, %v5157_v26, 0.0 }
 0x3ca   :  { %2338 = vadd.xlane.f32.xlu1 %v2337_v11 }
 0x3cf   :  { %v5163_v27 = vpop.eup %4454 }
 0x3d0   :  { %v2340_v45 = vsel %vm2237_vm3, %v5163_v27, 0.0  ;;  %v5167_v46 = vpop.eup %4456 }
 0x3d1   :  { %2341 = vadd.xlane.f32.xlu0 %v2340_v45  ;;  %v2343_v28 = vsel %vm2237_vm3, %v5167_v46, 0.0  ;;  %v1142_v45 = vpack.i.b16 %v5147_v1, %v5065_v56 }
 0x3d5   :  { %2344 = vadd.xlane.f32.xlu0 %v2343_v28  ;;  %v1153_v28 = vshrl.u32 %v5149_v3, 16 }
 0x3f5   :  { %v2252_v37 = vpop.xlane.xlu0 %2251  ;;  %v2255_v38 = vpop.xlane.xlu1 %2254 }
 0x3f6   :  { %v2290_v39 = vsub.f32 %v5089_v55, %v2252_v37  ;;  %v2291_v40 = vsub.f32 %v5091_v57, %v2255_v38  ;;  %v1152_v37 = vshrl.u32 %v5145_v62, 16 }
 0x3f8   :  { %v2310_v8 = vmul.f32 1.442695, %v2290_v39  ;;  %v2312_v14 = vmul.f32 1.442695, %v2291_v40 }
 0x3f9   :  { %v2258_v15 = vpop.xlane.xlu0 %2257  ;;  %v2261_v41 = vpop.xlane.xlu1 %2260 }
 0x3fa   :  { %4458 = vpow2.f32 %v2310_v8  ;;  %v2292_v42 = vsub.f32 %v5093_v63, %v2258_v15  ;;  %v2293_v43 = vsub.f32 %v5095_v2, %v2261_v41 }
 0x3fb   :  { %4460 = vpow2.f32 %v2312_v14 }
 0x3fc   :  { %v2314_v44 = vmul.f32 1.442695, %v2292_v42  ;;  %v2316_v47 = vmul.f32 1.442695, %v2293_v43 }
 0x3fd   :  { %v2264_v48 = vpop.xlane.xlu0 %2263  ;;  %v2267_v49 = vpop.xlane.xlu1 %2266 }
 0x3fe   :  { %4462 = vpow2.f32 %v2314_v44  ;;  %v2294_v50 = vsub.f32 %v5099_v22, %v2264_v48  ;;  %v2295_v55 = vsub.f32 %v5103_v23, %v2267_v49  ;;  %v1154_v44 = vpack.i.b16 %v1153_v28, %v1152_v37 }
 0x3ff   :  { %4464 = vpow2.f32 %v2316_v47 }
 0x400   :  { %v2318_v57 = vmul.f32 1.442695, %v2294_v50  ;;  %v2320_v51 = vmul.f32 1.442695, %v2295_v55 }
 0x401   :  { %v2270_v52 = vpop.xlane.xlu0 %2269  ;;  %v2273_v53 = vpop.xlane.xlu1 %2272 }
 0x402   :  { %4466 = vpow2.f32 %v2318_v57  ;;  %v2296_v63 = vsub.f32 %v5105_v30, %v2270_v52  ;;  %v2297_v2 = vsub.f32 %v5107_v31, %v2273_v53  ;;  %v1160_v31 = vshrl.u32 %v5171_v29, 16 }
 0x403   :  { %4468 = vpow2.f32 %v2320_v51 }
 0x404   :  { %v5183_v54 = vpop.eup %4458  ;;  %v2322_v58 = vmul.f32 1.442695, %v2296_v63  ;;  %v2324_v59 = vmul.f32 1.442695, %v2297_v2 }
 0x405   :  { %v5185_v60 = vpop.eup %4460  ;;  %v2276_v22 = vpop.xlane.xlu0 %2275  ;;  %v2346_v23 = vsel %vm2237_vm3, %v5183_v54, 0.0 }
 0x406   :  { %v2279_v61 = vpop.xlane.xlu1 %2278  ;;  %4470 = vpow2.f32 %v2322_v58  ;;  %v2298_v4 = vsub.f32 %v5109_v34, %v2276_v22  ;;  %v2349_v30 = vsel %vm2237_vm3, %v5185_v60, 0.0  ;;  %2347 = vadd.xlane.f32.xlu1 %v2346_v23  ;;  %v1144_v34 = vshrl.u32 %v5065_v56, 16 }
 0x407   :  { %v2299_v5 = vsub.f32 %v5111_v35, %v2279_v61  ;;  %4472 = vpow2.f32 %v2324_v59  ;;  %2350 = vadd.xlane.f32.xlu0 %v2349_v30  ;;  %v1158_v35 = vpack.i.b16 %v5173_v36, %v5171_v29  ;;  %v1162_v29 = vpack.i.b16 %v1161_v17, %v1160_v31 }
 0x408   :  { %v5195_v18 = vpop.eup %4462  ;;  %v2326_v24 = vmul.f32 1.442695, %v2298_v4  ;;  %v1146_v38 = vpack.i.b16 %v1145_v21, %v1144_v34 }
 0x409   :  { %v5198_v25 = vpop.eup %4464  ;;  %v2328_v6 = vmul.f32 1.442695, %v2299_v5  ;;  %v2282_v7 = vpop.xlane.xlu0 %2281  ;;  %v2352_v20 = vsel %vm2237_vm3, %v5195_v18, 0.0  ;;  %v1172_v8 = vcombine.low %v1142_v45, %v1158_v35  ;;  %v1173_v14 = vcombine.high %v1142_v45, %v1158_v35 }
 0x40a   :  { %v2285_v19 = vpop.xlane.xlu1 %2284  ;;  %4474 = vpow2.f32 %v2326_v24  ;;  %v2300_v32 = vsub.f32 %v5113_v12, %v2282_v7  ;;  %v2355_v11 = vsel %vm2237_vm3, %v5198_v25, 0.0  ;;  %2353 = vadd.xlane.f32.xlu1 %v2352_v20  ;;  %v1240_v47 = vcombine.low %v1146_v38, %v1162_v29 }
 0x40b   :  { %v2301_v9 = vsub.f32 %v5115_v13, %v2285_v19  ;;  %2356 = vadd.xlane.f32.xlu0 %v2355_v11  ;;  %v1150_v13 = vpack.i.b16 %v5149_v3, %v5145_v62  ;;  %4476 = vpow2.f32 %v2328_v6  ;;  %v1180_v57 = vrot.slane %v1172_v8, %v4786_v10 }
 0x40c   :  { %v5212_v36 = vpop.eup %4466  ;;  %v2330_v39 = vmul.f32 1.442695, %v2300_v32  ;;  %v1187_v51 = vrot.slane %v1173_v14, %v4786_v10  ;;  %v1241_v52 = vcombine.high %v1146_v38, %v1162_v29  ;;  %v1248_v22 = vrot.slane %v1240_v47, %v4786_v10 }
 0x40d   :  { %v2332_v12 = vmul.f32 1.442695, %v2301_v9  ;;  %v5215_v40 = vpop.eup %4468  ;;  %v1137_v15 = vpop.permute.xlu0 %1136  ;;  %v2358_v1 = vsel %vm2237_vm3, %v5212_v36, 0.0 }
 0x40e   :  { %v1139_v56 = vpop.permute.xlu1 %1138  ;;  %v1168_v41 = vshrl.u32 %v1137_v15, 16  ;;  %2359 = vadd.xlane.f32.xlu1 %v2358_v1  ;;  %4478 = vpow2.f32 %v2330_v39  ;;  %v2361_v48 = vsel %vm2237_vm3, %v5215_v40, 0.0  ;;  %v1255_v17 = vrot.slane %v1241_v52, %v4786_v10 }
 0x40f   :  { %v1166_v42 = vpack.i.b16 %v1139_v56, %v1137_v15  ;;  %v1169_v43 = vshrl.u32 %v1139_v56, 16  ;;  %4480 = vpow2.f32 %v2332_v12  ;;  %2362 = vadd.xlane.f32.xlu0 %v2361_v48 }
 0x410   :  { %v5223_v49 = vpop.eup %4470 }
 0x411   :  { %v1170_v62 = vpack.i.b16 %v1169_v43, %v1168_v41  ;;  %v1188_v3 = vcombine.low %v1150_v13, %v1166_v42  ;;  %v1189_v50 = vcombine.high %v1150_v13, %v1166_v42  ;;  %v5225_v55 = vpop.eup %4472  ;;  %v2364_v53 = vsel %vm2237_vm3, %v5223_v49, 0.0 }
 0x412   :  { %2365 = vadd.xlane.f32.xlu1 %v2364_v53  ;;  %v2367_v61 = vsel %vm2237_vm3, %v5225_v55, 0.0 }
 0x413   :  { %v1196_v63 = vrot.slane %v1188_v3, %v4786_v10  ;;  %v1203_v2 = vrot.slane %v1189_v50, %v4786_v10  ;;  %v1256_v58 = vcombine.low %v1154_v44, %v1170_v62  ;;  %v1257_v59 = vcombine.high %v1154_v44, %v1170_v62  ;;  %2368 = vadd.xlane.f32.xlu0 %v2367_v61 }
 0x414   :  { %v5236_v23 = vpop.eup %4474 }
 0x415   :  { %v1204_v4 = vcombine.low %v1180_v57, %v1196_v63  ;;  %v1205_v5 = vcombine.high %v1180_v57, %v1196_v63  ;;  %v1220_v30 = vcombine.low %v1187_v51, %v1203_v2  ;;  %v1221_v31 = vcombine.high %v1187_v51, %v1203_v2  ;;  %v5247_v45 = vpop.eup %4476 }
 0x416   :  { %v1264_v21 = vrot.slane %v1256_v58, %v4786_v10  ;;  %v1271_v24 = vrot.slane %v1257_v59, %v4786_v10  ;;  %v2370_v34 = vsel %vm2237_vm3, %v5236_v23, 0.0  ;;  %v2373_v62 = vsel %vm2237_vm3, %v5247_v45, 0.0 }
 0x417   :  { %v1212_v35 = vrot.slane %v1204_v4, %v4789_v16  ;;  %v1219_v6 = vrot.slane %v1205_v5, %v4789_v16  ;;  %v1228_v7 = vrot.slane %v1220_v30, %v4789_v16  ;;  %v1235_v19 = vrot.slane %v1221_v31, %v4789_v16  ;;  %2371 = vadd.xlane.f32.xlu1 %v2370_v34 }
 0x418   :  { %v1272_v20 = vcombine.low %v1248_v22, %v1264_v21  ;;  %v1273_v32 = vcombine.high %v1248_v22, %v1264_v21  ;;  %v1288_v9 = vcombine.low %v1255_v17, %v1271_v24  ;;  %v1289_v11 = vcombine.high %v1255_v17, %v1271_v24  ;;  %v5249_v39 = vpop.eup %4478  ;;  %2374 = vadd.xlane.f32.xlu0 %v2373_v62 }
 0x419   :  { %v1308_v28 = vcombine.low %v1212_v35, %v1219_v6  ;;  %v4000_v29 = vcombine.high %v1212_v35, %v1219_v6  ;;  %v1324_v37 = vcombine.low %v1228_v7, %v1235_v19  ;;  %v4001_v38 = vcombine.high %v1228_v7, %v1235_v19  ;;  %v5255_v15 = vpop.eup %4480 }
 0x41a   :  { %v1280_v12 = vrot.slane %v1272_v20, %v4789_v16  ;;  %v1287_v13 = vrot.slane %v1273_v32, %v4789_v16  ;;  %v1296_v8 = vrot.slane %v1288_v9, %v4789_v16  ;;  %v1303_v14 = vrot.slane %v1289_v11, %v4789_v16 }
 0x41b   :  { %v1315_v56 = vrot.slane %v1308_v28, %v4786_v10  ;;  %v1323_v1 = vrot.slane %v4000_v29, %v4786_v10  ;;  %v1331_v41 = vrot.slane %v1324_v37, %v4786_v10  ;;  %v1339_v42 = vrot.slane %v4001_v38, %v4786_v10 }
 0x41c   :  { %v1376_v43 = vcombine.low %v1280_v12, %v1287_v13  ;;  %v4002_v44 = vcombine.high %v1280_v12, %v1287_v13  ;;  %v1392_v47 = vcombine.low %v1296_v8, %v1303_v14  ;;  %v4003_v48 = vcombine.high %v1296_v8, %v1303_v14 }
 0x41d   :  { %v2376_v3 = vsel %vm2237_vm3, %v5249_v39, 0.0  ;;  %v1340_v50 = vcombine.low %v1315_v56, %v1323_v1  ;;  %v2379_v57 = vsel %vm2237_vm3, %v5255_v15, 0.0  ;;  %v1356_v51 = vcombine.low %v1331_v41, %v1339_v42 }
 0x41e   :  { %2377 = vadd.xlane.f32.xlu1 %v2376_v3  ;;  %v1383_v52 = vrot.slane %v1376_v43, %v4786_v10  ;;  %v1391_v53 = vrot.slane %v4002_v44, %v4786_v10  ;;  %v1399_v2 = vrot.slane %v1392_v47, %v4786_v10  ;;  %v1407_v58 = vrot.slane %v4003_v48, %v4786_v10 }
 0x41f   :  { %v1348_v63 = vrot.slane %v1340_v50, %v4789_v16  ;;  %v1341_v59 = vcombine.high %v1315_v56, %v1323_v1  ;;  %v1364_v22 = vrot.slane %v1356_v51, %v4789_v16  ;;  %v1357_v4 = vcombine.high %v1331_v41, %v1339_v42  ;;  %2380 = vadd.xlane.f32.xlu0 %v2379_v57 }
 0x420   :  { %v1408_v61 = vcombine.low %v1383_v52, %v1391_v53  ;;  %v1409_v5 = vcombine.high %v1383_v52, %v1391_v53  ;;  %v1424_v30 = vcombine.low %v1399_v2, %v1407_v58  ;;  %v1425_v17 = vcombine.high %v1399_v2, %v1407_v58 }
 0x421   :  { %v1355_v31 = vrot.slane %v1341_v59, %v4789_v16  ;;  %v1373_v24 = vcombine.high %v1348_v63, %v1364_v22  ;;  %v1371_v34 = vrot.slane %v1357_v4, %v4789_v16  ;;  %v1372_v19 = vcombine.low %v1348_v63, %v1364_v22 }
 0x422   :  { %v1416_v21 = vrot.slane %v1408_v61, %v4789_v16  ;;  %v1432_v35 = vrot.slane %v1424_v30, %v4789_v16  ;;  %v1423_v6 = vrot.slane %v1409_v5, %v4789_v16  ;;  %v1439_v7 = vrot.slane %v1425_v17, %v4789_v16 }
 0x423   :  { %v1374_v20 = vcombine.low %v1355_v31, %v1371_v34  ;;  %v1375_v32 = vcombine.high %v1355_v31, %v1371_v34  ;;  %v1453_v13 = vshrl.u32 %v1373_v24, 16 }
 0x424   :  { %v1440_v9 = vcombine.low %v1416_v21, %v1432_v35  ;;  %v1441_v11 = vcombine.high %v1416_v21, %v1432_v35  ;;  %v1442_v28 = vcombine.low %v1423_v6, %v1439_v7  ;;  %v1443_v29 = vcombine.high %v1423_v6, %v1439_v7 }
 0x425   :  { %v1459_v50 = vshrl.u32 %v1374_v20, 16  ;;  %v1465_v59 = vshrl.u32 %v1375_v32, 16 }
 0x426   :  { %v1446_v37 = vpack.i.b16 %v1440_v9, %v1372_v19  ;;  %v1452_v38 = vpack.i.b16 %v1441_v11, %v1373_v24  ;;  %v1454_v12 = vshrl.u32 %v1441_v11, 16  ;;  %v1458_v8 = vpack.i.b16 %v1442_v28, %v1374_v20 }
 0x427   :  { %v1464_v14 = vpack.i.b16 %v1443_v29, %v1375_v32  ;;  %v1460_v42 = vshrl.u32 %v1442_v28, 16  ;;  %v1466_v57 = vshrl.u32 %v1443_v29, 16 }
 0x428   :  { %v4004_v56 = vcombine.low %v1446_v37, %v1446_v37  ;;  %v4005_v1 = vcombine.high %v1446_v37, %v1446_v37  ;;  %v4008_v41 = vcombine.low %v1452_v38, %v1452_v38  ;;  %v4009_v43 = vcombine.high %v1452_v38, %v1452_v38 }
 0x429   :  { %v1455_v44 = vpack.i.b16 %v1454_v12, %v1453_v13  ;;  %v4012_v47 = vcombine.low %v1458_v8, %v1458_v8  ;;  %v4013_v48 = vcombine.high %v1458_v8, %v1458_v8  ;;  %v1461_v4 = vpack.i.b16 %v1460_v42, %v1459_v50 }
 0x42a   :  { %v2435_v62 = vsel %vm2433_vm4, %v4004_v56, 0  ;;  %v2481_v3 = vsel %vm2433_vm4, %v4005_v1, 0  ;;  %v2619_v51 = vsel %vm2433_vm4, %v4008_v41, 0  ;;  %v5283_v52 = vsel %vm2433_vm4, %v4009_v43, 0 }
 0x42b   :  { %4269 = vmatpush3.bf16.msra.mxu1 %v2435_v62  ;;  %4275 = vmatpush3.bf16.msra.mxu0 %v2481_v3  ;;  %v4010_v53 = vcombine.low %v1455_v44, %v1455_v44  ;;  %v4011_v63 = vcombine.high %v1455_v44, %v1455_v44  ;;  %v5288_v2 = vsel %vm2433_vm4, %v4012_v47, 0  ;;  %v5291_v58 = vsel %vm2433_vm4, %v4013_v48, 0 }
 0x42c   :  { %4280 = vmatprep.subr.bf16.mxu1 %v4644_v0  ;;  %4286 = vmatprep.subr.bf16.mxu0 %v4644_v0  ;;  %v4016_v5 = vcombine.low %v1464_v14, %v1464_v14  ;;  %v4017_v30 = vcombine.high %v1464_v14, %v1464_v14  ;;  %v1467_v31 = vpack.i.b16 %v1466_v57, %v1465_v59  ;;  %v1448_v37 = vshrl.u32 %v1440_v9, 16 }
 0x42d   :  { %v5294_v22 = vsel %vm2433_vm4, %v4010_v53, 0  ;;  %v5297_v61 = vsel %vm2433_vm4, %v4011_v63, 0  ;;  %v4014_v17 = vcombine.low %v1461_v4, %v1461_v4  ;;  %v4015_v21 = vcombine.high %v1461_v4, %v1461_v4 }
 0x42e   :  { %v5300_v24 = vsel %vm2433_vm4, %v4016_v5, 0  ;;  %v5303_v34 = vsel %vm2433_vm4, %v4017_v30, 0  ;;  %v4018_v35 = vcombine.low %v1467_v31, %v1467_v31  ;;  %v4019_v6 = vcombine.high %v1467_v31, %v1467_v31 }
 0x42f   :  { %v5306_v7 = vsel %vm2433_vm4, %v4014_v17, 0  ;;  %v5309_v20 = vsel %vm2433_vm4, %v4015_v21, 0  ;;  %v1447_v38 = vshrl.u32 %v1372_v19, 16 }
 0x430   :  { %v5312_v32 = vsel %vm2433_vm4, %v4018_v35, 0  ;;  %v5315_v11 = vsel %vm2433_vm4, %v4019_v6, 0 }
 0x431   :  { %v1449_v13 = vpack.i.b16 %v1448_v37, %v1447_v38 }
 0x433   :  { %v4006_v1 = vcombine.low %v1449_v13, %v1449_v13  ;;  %v4007_v44 = vcombine.high %v1449_v13, %v1449_v13 }
 0x435   :  { %v2527_v9 = vsel %vm2433_vm4, %v4006_v1, 0 }
 0x456   :  { %v2336_v28 = vpop.xlane.xlu0 %2335 }
 0x457   :  { %4482 = vrcp.f32 %v2336_v28  ;;  %v2339_v29 = vpop.xlane.xlu1 %2338 }
 0x458   :  { %4484 = vrcp.f32 %v2339_v29 }
 0x45e   :  { %v2342_v12 = vpop.xlane.xlu0 %2341 }
 0x45f   :  { %4486 = vrcp.f32 %v2342_v12 }
 0x461   :  { %v4483_v8 = vpop.eup %4482 }
 0x462   :  { %v2398_v14 = vmul.f32 %v4483_v8, %v5155_v33  ;;  %v2345_v56 = vpop.xlane.xlu0 %2344  ;;  %v4485_v41 = vpop.eup %4484  ;;  %v2573_v33 = vsel %vm2433_vm4, %v4007_v44, 0 }
 0x463   :  { %4488 = vrcp.f32 %v2345_v56  ;;  %v2399_v42 = vmul.f32 %v4485_v41, %v5157_v26 }
 0x464   :  { %v2414_v43 = vpack.c.bf16 %v2398_v14, %v2398_v14 }
 0x465   :  { %v2415_v47 = vpack.c.bf16 %v2399_v42, %v2399_v42 }
 0x466   :  { %4271 = vmatmul.mubr.msk.bf16.vlgmr.msra.gmra.mrb[36].mxu1 %vm2237_vm3, %v2414_v43 }
 0x467   :  { %4281 = vmatpush3.bf16.msra.mxu1 %v2527_v9  ;;  %4282 = vmatprep.mubr.msk.bf16.mxu1 %vm4645_vm0, %v4644_v0 }
 0x468   :  { %4277 = vmatmul.mubr.msk.bf16.vlgmr.msra.gmra.mrb[40].mxu0 %vm2237_vm3, %v2415_v47  ;;  %4292 = vmatprep.subr.bf16.mxu1 %v4644_v0 }
 0x469   :  { %v4487_v19 = vpop.eup %4486  ;;  %4287 = vmatpush3.bf16.msra.mxu0 %v2573_v33  ;;  %4288 = vmatprep.mubr.msk.bf16.mxu0 %vm4645_vm0, %v4644_v0 }
 0x46a   :  { %v2400_v26 = vmul.f32 %v4487_v19, %v5163_v27  ;;  %4298 = vmatprep.subr.bf16.mxu0 %v4644_v0 }
 0x46c   :  { %v2416_v48 = vpack.c.bf16 %v2400_v26, %v2400_v26 }
 0x46d   :  { %v4489_v62 = vpop.eup %4488 }
 0x46e   :  { %v2401_v3 = vmul.f32 %v4489_v62, %v5167_v46  ;;  %4283 = vmatmul.mubr.msk.bf16.vlgmr.msra.gmra.mrb[40].mxu1 %vm2237_vm3, %v2416_v48 }
 0x46f   :  { %4293 = vmatpush3.bf16.msra.mxu1 %v2619_v51  ;;  %4294 = vmatprep.mubr.msk.bf16.mxu1 %vm4645_vm0, %v4644_v0 }
 0x470   :  { %v2417_v50 = vpack.c.bf16 %v2401_v3, %v2401_v3  ;;  %4304 = vmatprep.subr.bf16.mxu1 %v4644_v0 }
 0x472   :  { %4289 = vmatmul.mubr.msk.bf16.vlgmr.msra.gmra.mrb[44].mxu0 %vm2237_vm3, %v2417_v50 }
 0x473   :  { %4299 = vmatpush3.bf16.msra.mxu0 %v5283_v52  ;;  %4300 = vmatprep.mubr.msk.bf16.mxu0 %vm4645_vm0, %v4644_v0 }
 0x474   :  { %4310 = vmatprep.subr.bf16.mxu0 %v4644_v0 }
 0x493   :  { %v2348_v27 = vpop.xlane.xlu1 %2347 }
 0x494   :  { %v2351_v46 = vpop.xlane.xlu0 %2350  ;;  %4490 = vrcp.f32 %v2348_v27 }
 0x495   :  { %4492 = vrcp.f32 %v2351_v46 }
 0x497   :  { %v2354_v57 = vpop.xlane.xlu1 %2353 }
 0x498   :  { %v2357_v51 = vpop.xlane.xlu0 %2356  ;;  %4494 = vrcp.f32 %v2354_v57 }
 0x499   :  { %4496 = vrcp.f32 %v2357_v51 }
 0x49b   :  { %v2360_v53 = vpop.xlane.xlu1 %2359 }
 0x49c   :  { %v2363_v59 = vpop.xlane.xlu0 %2362  ;;  %4498 = vrcp.f32 %v2360_v53 }
 0x49d   :  { %4500 = vrcp.f32 %v2363_v59 }
 0x49e   :  { %v4491_v63 = vpop.eup %4490 }
 0x49f   :  { %v4493_v4 = vpop.eup %4492  ;;  %v2402_v5 = vmul.f32 %v4491_v63, %v5183_v54  ;;  %v2366_v6 = vpop.xlane.xlu1 %2365 }
 0x4a0   :  { %v2403_v52 = vmul.f32 %v4493_v4, %v5185_v60  ;;  %v2369_v60 = vpop.xlane.xlu0 %2368  ;;  %4502 = vrcp.f32 %v2366_v6 }
 0x4a1   :  { %v2418_v30 = vpack.c.bf16 %v2402_v5, %v2402_v5  ;;  %4504 = vrcp.f32 %v2369_v60 }
 0x4a2   :  { %v4495_v31 = vpop.eup %4494  ;;  %v2419_v17 = vpack.c.bf16 %v2403_v52, %v2403_v52 }
 0x4a3   :  { %v4497_v21 = vpop.eup %4496  ;;  %4295 = vmatmul.mubr.msk.bf16.vlgmr.msra.gmra.mrb[44].mxu1 %vm2237_vm3, %v2418_v30  ;;  %v2404_v35 = vmul.f32 %v4495_v31, %v5195_v18 }
 0x4a4   :  { %4301 = vmatmul.mubr.msk.bf16.vlgmr.msra.gmra.mrb[48].mxu0 %vm2237_vm3, %v2419_v17  ;;  %4305 = vmatpush3.bf16.msra.mxu1 %v5294_v22  ;;  %v2405_v54 = vmul.f32 %v4497_v21, %v5198_v25 }
 0x4a5   :  { %4311 = vmatpush3.bf16.msra.mxu0 %v5297_v61  ;;  %4306 = vmatprep.mubr.msk.bf16.mxu1 %vm4645_vm0, %v4644_v0  ;;  %v2420_v22 = vpack.c.bf16 %v2404_v35, %v2404_v35  ;;  %v2372_v61 = vpop.xlane.xlu1 %2371  ;;  %v2375_v38 = vpop.xlane.xlu0 %2374 }
 0x4a6   :  { %4312 = vmatprep.mubr.msk.bf16.mxu0 %vm4645_vm0, %v4644_v0  ;;  %4316 = vmatprep.subr.bf16.mxu1 %v4644_v0  ;;  %v4499_v18 = vpop.eup %4498  ;;  %v2421_v28 = vpack.c.bf16 %v2405_v54, %v2405_v54  ;;  %4506 = vrcp.f32 %v2372_v61 }
 0x4a7   :  { %4322 = vmatprep.subr.bf16.mxu0 %v4644_v0  ;;  %v4501_v29 = vpop.eup %4500  ;;  %v2406_v25 = vmul.f32 %v4499_v18, %v5212_v36  ;;  %4508 = vrcp.f32 %v2375_v38 }
 0x4a8   :  { %v2407_v37 = vmul.f32 %v4501_v29, %v5215_v40 }
 0x4aa   :  { %v4503_v36 = vpop.eup %4502  ;;  %v2423_v12 = vpack.c.bf16 %v2407_v37, %v2407_v37 }
 0x4ab   :  { %4307 = vmatmul.mubr.msk.bf16.vlgmr.msra.gmra.mrb[48].mxu1 %vm2237_vm3, %v2420_v22  ;;  %v4505_v13 = vpop.eup %4504  ;;  %v2408_v40 = vmul.f32 %v4503_v36, %v5223_v49 }
 0x4ac   :  { %4313 = vmatmul.mubr.msk.bf16.vlgmr.msra.gmra.mrb[52].mxu0 %vm2237_vm3, %v2421_v28  ;;  %4317 = vmatpush3.bf16.msra.mxu1 %v5288_v2  ;;  %v2422_v2 = vpack.c.bf16 %v2406_v25, %v2406_v25  ;;  %v2409_v8 = vmul.f32 %v4505_v13, %v5225_v55  ;;  %v2381_v14 = vpop.xlane.xlu0 %2380 }
 0x4ad   :  { %4323 = vmatpush3.bf16.msra.mxu0 %v5291_v58  ;;  %4318 = vmatprep.mubr.msk.bf16.mxu1 %vm4645_vm0, %v4644_v0  ;;  %v2378_v58 = vpop.xlane.xlu1 %2377 }
 0x4ae   :  { %4324 = vmatprep.mubr.msk.bf16.mxu0 %vm4645_vm0, %v4644_v0  ;;  %4328 = vmatprep.subr.bf16.mxu1 %v4644_v0  ;;  %4510 = vrcp.f32 %v2378_v58  ;;  %v2425_v56 = vpack.c.bf16 %v2409_v8, %v2409_v8 }
 0x4af   :  { %4334 = vmatprep.subr.bf16.mxu0 %v4644_v0  ;;  %4512 = vrcp.f32 %v2381_v14 }
 0x4b0   :  { %v4507_v49 = vpop.eup %4506 }
 0x4b1   :  { %v4509_v1 = vpop.eup %4508  ;;  %v2410_v55 = vmul.f32 %v4507_v49, %v5236_v23 }
 0x4b3   :  { %4319 = vmatmul.mubr.msk.bf16.vlgmr.msra.gmra.mrb[52].mxu1 %vm2237_vm3, %v2422_v2  ;;  %v2426_v41 = vpack.c.bf16 %v2410_v55, %v2410_v55 }
 0x4b4   :  { %4325 = vmatmul.mubr.msk.bf16.vlgmr.msra.gmra.mrb[56].mxu0 %vm2237_vm3, %v2423_v12  ;;  %4329 = vmatpush3.bf16.msra.mxu1 %v5306_v7  ;;  %v2424_v7 = vpack.c.bf16 %v2408_v40, %v2408_v40 }
 0x4b5   :  { %4335 = vmatpush3.bf16.msra.mxu0 %v5309_v20  ;;  %4330 = vmatprep.mubr.msk.bf16.mxu1 %vm4645_vm0, %v4644_v0  ;;  %v2411_v20 = vmul.f32 %v4509_v1, %v5247_v45 }
 0x4b6   :  { %4336 = vmatprep.mubr.msk.bf16.mxu0 %vm4645_vm0, %v4644_v0  ;;  %4340 = vmatprep.subr.bf16.mxu1 %v4644_v0 }
 0x4b7   :  { %4346 = vmatprep.subr.bf16.mxu0 %v4644_v0  ;;  %v2427_v43 = vpack.c.bf16 %v2411_v20, %v2411_v20 }
 0x4b8   :  { %v4511_v42 = vpop.eup %4510 }
 0x4b9   :  { %v2412_v23 = vmul.f32 %v4511_v42, %v5249_v39 }
 0x4bb   :  { %4331 = vmatmul.mubr.msk.bf16.vlgmr.msra.gmra.mrb[56].mxu1 %vm2237_vm3, %v2424_v7 }
 0x4bc   :  { %4337 = vmatmul.mubr.msk.bf16.vlgmr.msra.gmra.mrb[60].mxu0 %vm2237_vm3, %v2425_v56  ;;  %4341 = vmatpush3.bf16.msra.mxu1 %v5300_v24  ;;  %v4513_v24 = vpop.eup %4512 }
 0x4bd   :  { %4347 = vmatpush3.bf16.msra.mxu0 %v5303_v34  ;;  %4342 = vmatprep.mubr.msk.bf16.mxu1 %vm4645_vm0, %v4644_v0  ;;  %v2413_v45 = vmul.f32 %v4513_v24, %v5255_v15  ;;  %v2428_v34 = vpack.c.bf16 %v2412_v23, %v2412_v23 }
 0x4be   :  { %4348 = vmatprep.mubr.msk.bf16.mxu0 %vm4645_vm0, %v4644_v0  ;;  %4352 = vmatprep.subr.bf16.mxu1 %v4644_v0 }
 0x4bf   :  { %4358 = vmatprep.subr.bf16.mxu0 %v4644_v0  ;;  %v2429_v44 = vpack.c.bf16 %v2413_v45, %v2413_v45 }
 0x4c3   :  { %4343 = vmatmul.mubr.msk.bf16.vlgmr.msra.gmra.mrb[60].mxu1 %vm2237_vm3, %v2426_v41 }
 0x4c4   :  { %4349 = vmatmul.mubr.msk.bf16.vlgmr.msra.gmra.mrb[64].mxu0 %vm2237_vm3, %v2427_v43  ;;  %4353 = vmatpush3.bf16.msra.mxu1 %v5312_v32 }
 0x4c5   :  { %4359 = vmatpush3.bf16.msra.mxu0 %v5315_v11  ;;  %4354 = vmatprep.mubr.msk.bf16.mxu1 %vm4645_vm0, %v4644_v0 }
 0x4c6   :  { %4360 = vmatprep.mubr.msk.bf16.mxu0 %vm4645_vm0, %v4644_v0  ;;  %4364 = vmatprep.subr.bf16.mxu1 %v4644_v0 }
 0x4cb   :  { %4355 = vmatmul.mubr.msk.bf16.vlgmr.msra.gmra.mrb[64].mxu1 %vm2237_vm3, %v2428_v34 }
 0x4cc   :  { %4361 = vmatmul.mubr.msk.bf16.vlgmr.msra.gmra.mrb[68].mxu0 %vm2237_vm3, %v2429_v44  ;;  %4368 = vmatprep.mubr.msk.bf16.mxu1 %vm4645_vm0, %v4644_v0 }
 0x539   :  { %v2471_v39 = vpop.f32.mrb[36].mxu1 }
 0x53a   :  { %v4272_v32 = vpop.f32.mrb[37].mxu1 }
 0x53b   :  { %v2517_v11 = vpop.f32.mrb[40].mxu0  ;;  %v2474_v47 = vpop.f32.mrb[38].mxu1 }
 0x53c   :  { %v4278_v9 = vpop.f32.mrb[41].mxu0  ;;  %v4273_v15 = vpop.f32.mrb[39].mxu1 }
 0x53d   :  { %v2520_v33 = vpop.f32.mrb[42].mxu0 }
 0x53e   :  { %v4279_v19 = vpop.f32.mrb[43].mxu0 }
 0x541   :  { %v2563_v26 = vpop.f32.mrb[40].mxu1 }
 0x542   :  { %v4284_v48 = vpop.f32.mrb[41].mxu1 }
 0x543   :  { %v2566_v62 = vpop.f32.mrb[42].mxu1 }
 0x544   :  { %v4285_v3 = vpop.f32.mrb[43].mxu1 }
 0x545   :  { %v2609_v50 = vpop.f32.mrb[44].mxu0 }
 0x546   :  { %v4290_v27 = vpop.f32.mrb[45].mxu0 }
 0x547   :  { %v2612_v46 = vpop.f32.mrb[46].mxu0 }
 0x548   :  { %v4291_v57 = vpop.f32.mrb[47].mxu0 }
 0x576   :  { %v2655_v51 = vpop.f32.mrb[44].mxu1 }
 0x577   :  { %v3167_v53 = vcombine.low %v2471_v39, %v2655_v51  ;;  %v3168_v63 = vcombine.high %v2471_v39, %v2655_v51  ;;  %v2701_v59 = vpop.f32.mrb[48].mxu0  ;;  %v4296_v4 = vpop.f32.mrb[45].mxu1 }
 0x578   :  { %v3303_v5 = vcombine.low %v2517_v11, %v2701_v59  ;;  %v3304_v52 = vcombine.high %v2517_v11, %v2701_v59  ;;  %v4302_v30 = vpop.f32.mrb[49].mxu0  ;;  %v2658_v31 = vpop.f32.mrb[46].mxu1 }
 0x579   :  { %v2704_v17 = vpop.f32.mrb[50].mxu0  ;;  %v4297_v21 = vpop.f32.mrb[47].mxu1  ;;  %v3175_v37 = vrot.slane %v3167_v53, %v4786_v10  ;;  %v3182_v38 = vrot.slane %v3168_v63, %v4786_v10 }
 0x57a   :  { %v4303_v35 = vpop.f32.mrb[51].mxu0  ;;  %v3311_v40 = vrot.slane %v3303_v5, %v4786_v10  ;;  %v3318_v58 = vrot.slane %v3304_v52, %v4786_v10 }
 0x57e   :  { %v2747_v6 = vpop.f32.mrb[48].mxu1 }
 0x57f   :  { %v3183_v54 = vcombine.low %v2563_v26, %v2747_v6  ;;  %v3184_v60 = vcombine.high %v2563_v26, %v2747_v6  ;;  %v2793_v22 = vpop.f32.mrb[52].mxu0  ;;  %v4308_v18 = vpop.f32.mrb[49].mxu1 }
 0x580   :  { %v3319_v28 = vcombine.low %v2609_v50, %v2793_v22  ;;  %v3320_v29 = vcombine.high %v2609_v50, %v2793_v22  ;;  %v4314_v25 = vpop.f32.mrb[53].mxu0  ;;  %v2750_v61 = vpop.f32.mrb[50].mxu1 }
 0x581   :  { %v3191_v2 = vrot.slane %v3183_v54, %v4786_v10  ;;  %v3198_v36 = vrot.slane %v3184_v60, %v4786_v10  ;;  %v2796_v12 = vpop.f32.mrb[54].mxu0  ;;  %v4309_v13 = vpop.f32.mrb[51].mxu1 }
 0x582   :  { %v3327_v8 = vrot.slane %v3319_v28, %v4786_v10  ;;  %v3334_v14 = vrot.slane %v3320_v29, %v4786_v10  ;;  %v4315_v7 = vpop.f32.mrb[55].mxu0 }
 0x583   :  { %v3231_v49 = vcombine.low %v3175_v37, %v3191_v2  ;;  %v3232_v56 = vcombine.high %v3175_v37, %v3191_v2  ;;  %v3247_v1 = vcombine.low %v3182_v38, %v3198_v36  ;;  %v3248_v55 = vcombine.high %v3182_v38, %v3198_v36 }
 0x584   :  { %v3367_v20 = vcombine.low %v3311_v40, %v3327_v8  ;;  %v3368_v41 = vcombine.high %v3311_v40, %v3327_v8  ;;  %v3383_v42 = vcombine.low %v3318_v58, %v3334_v14  ;;  %v3384_v43 = vcombine.high %v3318_v58, %v3334_v14 }
 0x585   :  { %v3239_v24 = vrot.slane %v3231_v49, %v4789_v16  ;;  %v3246_v23 = vrot.slane %v3232_v56, %v4789_v16  ;;  %v3255_v45 = vrot.slane %v3247_v1, %v4789_v16  ;;  %v3262_v34 = vrot.slane %v3248_v55, %v4789_v16 }
 0x586   :  { %v3375_v44 = vrot.slane %v3367_v20, %v4789_v16  ;;  %v3382_v39 = vrot.slane %v3368_v41, %v4789_v16  ;;  %v3391_v32 = vrot.slane %v3383_v42, %v4789_v16  ;;  %v3398_v11 = vrot.slane %v3384_v43, %v4789_v16  ;;  %v5421_v47 = vpop.f32.mrb[52].mxu1 }
 0x587   :  { %v4052_v9 = vcombine.low %v3239_v24, %v3246_v23  ;;  %v4054_v15 = vcombine.high %v3239_v24, %v3246_v23  ;;  %v4056_v33 = vcombine.low %v3255_v45, %v3262_v34  ;;  %v4058_v19 = vcombine.high %v3255_v45, %v3262_v34  ;;  %v5423_v26 = vpop.f32.mrb[56].mxu0  ;;  %v4320_v48 = vpop.f32.mrb[53].mxu1 }
 0x588   :  { %v4060_v62 = vcombine.low %v3375_v44, %v3382_v39  ;;  %v4062_v3 = vcombine.high %v3375_v44, %v3382_v39  ;;  %v4064_v50 = vcombine.low %v3391_v32, %v3398_v11  ;;  %v4066_v27 = vcombine.high %v3391_v32, %v3398_v11  ;;  %v4326_v46 = vpop.f32.mrb[57].mxu0  ;;  %v2842_v57 = vpop.f32.mrb[54].mxu1 }
 0x589   :  { %v3447_v51 = vrot.slane %v4052_v9, %v4786_v10  ;;  %v3463_v53 = vrot.slane %v4054_v15, %v4786_v10  ;;  %v3479_v63 = vrot.slane %v4056_v33, %v4786_v10  ;;  %v3495_v59 = vrot.slane %v4058_v19, %v4786_v10  ;;  %v2888_v4 = vpop.f32.mrb[58].mxu0  ;;  %v4321_v5 = vpop.f32.mrb[55].mxu1 }
 0x58a   :  { %v3583_v52 = vrot.slane %v4060_v62, %v4786_v10  ;;  %v3599_v30 = vrot.slane %v4062_v3, %v4786_v10  ;;  %v3615_v31 = vrot.slane %v4064_v50, %v4786_v10  ;;  %v3631_v17 = vrot.slane %v4066_v27, %v4786_v10  ;;  %v4327_v21 = vpop.f32.mrb[59].mxu0 }
 0x58b   :  { %v3504_v35 = vcombine.high %v3447_v51, %v3463_v53  ;;  %v3536_v6 = vcombine.high %v3479_v63, %v3495_v59  ;;  %v3503_v54 = vcombine.low %v3447_v51, %v3463_v53  ;;  %v3535_v60 = vcombine.low %v3479_v63, %v3495_v59 }
 0x58c   :  { %v3640_v22 = vcombine.high %v3583_v52, %v3599_v30  ;;  %v3672_v18 = vcombine.high %v3615_v31, %v3631_v17  ;;  %v3639_v28 = vcombine.low %v3583_v52, %v3599_v30  ;;  %v3671_v29 = vcombine.low %v3615_v31, %v3631_v17 }
 0x58d   :  { %v3518_v25 = vrot.slane %v3504_v35, %v4789_v16  ;;  %v3550_v61 = vrot.slane %v3536_v6, %v4789_v16  ;;  %v5436_v37 = vrot.slane %v3503_v54, %v4789_v16  ;;  %v5439_v38 = vrot.slane %v3535_v60, %v4789_v16 }
 0x58e   :  { %v2931_v2 = vpop.f32.mrb[56].mxu1  ;;  %v3654_v36 = vrot.slane %v3640_v22, %v4789_v16  ;;  %v3686_v12 = vrot.slane %v3672_v18, %v4789_v16  ;;  %v5444_v13 = vrot.slane %v3639_v28, %v4789_v16  ;;  %v5447_v40 = vrot.slane %v3671_v29, %v4789_v16 }
 0x58f   :  { %v2977_v58 = vpop.f32.mrb[60].mxu0  ;;  %v4332_v8 = vpop.f32.mrb[57].mxu1  ;;  %v3569_v14 = vcombine.low %v3518_v25, %v3550_v61  ;;  %v3567_v7 = vcombine.low %v5436_v37, %v5439_v38  ;;  %v3568_v49 = vcombine.high %v5436_v37, %v5439_v38  ;;  %v3570_v56 = vcombine.high %v3518_v25, %v3550_v61 }
 0x590   :  { %v4338_v1 = vpop.f32.mrb[61].mxu0  ;;  %v2934_v55 = vpop.f32.mrb[58].mxu1  ;;  %v3705_v20 = vcombine.low %v3654_v36, %v3686_v12  ;;  %v3704_v41 = vcombine.high %v5444_v13, %v5447_v40  ;;  %v3703_v42 = vcombine.low %v5444_v13, %v5447_v40  ;;  %v3706_v43 = vcombine.high %v3654_v36, %v3686_v12 }
 0x591   :  { %v2980_v24 = vpop.f32.mrb[62].mxu0  ;;  %v4333_v23 = vpop.f32.mrb[59].mxu1 }
 0x592   :  { %v4339_v45 = vpop.f32.mrb[63].mxu0  ;;  %v4404_v34 = vpack.i.bf16 %v3705_v20, %v3569_v14  ;;  %v4399_v44 = vpack.i.bf16 %v3704_v41, %v3568_v49  ;;  %v4409_v39 = vpack.i.bf16 %v3706_v43, %v3570_v56 }
 0x594   :  { %4405 = vrot.lane.b32.xlu0 %v4404_v34, %s4656_s6  ;;  %4400 = vrot.lane.b32.xlu1 %v4399_v44, %s4638_s20  ;;  %s4658_s20 = smov 20  }
 0x596   :  { %v3023_v32 = vpop.f32.mrb[60].mxu1 }
 0x597   :  { %v3199_v11 = vcombine.low %v5421_v47, %v3023_v32  ;;  %v3200_v9 = vcombine.high %v5421_v47, %v3023_v32  ;;  %v3069_v15 = vpop.f32.mrb[64].mxu0  ;;  %v4344_v33 = vpop.f32.mrb[61].mxu1 }
 0x598   :  { %v3335_v19 = vcombine.low %v5423_v26, %v3069_v15  ;;  %v3336_v48 = vcombine.high %v5423_v26, %v3069_v15  ;;  %4410 = vrot.lane.b32.xlu1 %v4409_v39, %s4657_s13  ;;  %v4350_v62 = vpop.f32.mrb[65].mxu0  ;;  %v3026_v3 = vpop.f32.mrb[62].mxu1 }
 0x599   :  { %v3072_v50 = vpop.f32.mrb[66].mxu0  ;;  %v4345_v27 = vpop.f32.mrb[63].mxu1  ;;  %v3207_v30 = vrot.slane %v3199_v11, %v4786_v10  ;;  %v3214_v26 = vrot.slane %v3200_v9, %v4786_v10 }
 0x59a   :  { %v4351_v46 = vpop.f32.mrb[67].mxu0  ;;  %v3343_v6 = vrot.slane %v3335_v19, %v4786_v10  ;;  %v3350_v54 = vrot.slane %v3336_v48, %v4786_v10  ;;  %v4444_v19 = vld [vmem:[#allocation8] sm:$0xff]  }
 0x59b   :  { %4365 = vmatpush3.bf16.msra.mxu1 %v4444_v19 }
 0x59c   :  { %4366 = vmatprep.subr.bf16.mxu1 %v4644_v0 }
 0x59e   :  { %v3115_v57 = vpop.f32.mrb[64].mxu1 }
 0x59f   :  { %v3215_v51 = vcombine.low %v2931_v2, %v3115_v57  ;;  %v3216_v53 = vcombine.high %v2931_v2, %v3115_v57  ;;  %v3161_v63 = vpop.f32.mrb[68].mxu0  ;;  %v4356_v59 = vpop.f32.mrb[65].mxu1 }
 0x5a0   :  { %v3351_v4 = vcombine.low %v2977_v58, %v3161_v63  ;;  %v3352_v47 = vcombine.high %v2977_v58, %v3161_v63  ;;  %v4362_v5 = vpop.f32.mrb[69].mxu0  ;;  %v3118_v52 = vpop.f32.mrb[66].mxu1 }
 0x5a1   :  { %v3223_v31 = vrot.slane %v3215_v51, %v4786_v10  ;;  %v3230_v17 = vrot.slane %v3216_v53, %v4786_v10  ;;  %v3164_v21 = vpop.f32.mrb[70].mxu0  ;;  %v4357_v35 = vpop.f32.mrb[67].mxu1 }
 0x5a2   :  { %v3359_v60 = vrot.slane %v3351_v4, %v4786_v10  ;;  %v3366_v22 = vrot.slane %v3352_v47, %v4786_v10  ;;  %v4363_v18 = vpop.f32.mrb[71].mxu0 }
 0x5a3   :  { %v3263_v28 = vcombine.low %v3207_v30, %v3223_v31  ;;  %v3264_v29 = vcombine.high %v3207_v30, %v3223_v31  ;;  %v3279_v25 = vcombine.low %v3214_v26, %v3230_v17  ;;  %v3280_v61 = vcombine.high %v3214_v26, %v3230_v17 }
 0x5a4   :  { %v3399_v2 = vcombine.low %v3343_v6, %v3359_v60  ;;  %v3400_v36 = vcombine.high %v3343_v6, %v3359_v60  ;;  %v3415_v12 = vcombine.low %v3350_v54, %v3366_v22  ;;  %v3416_v58 = vcombine.high %v3350_v54, %v3366_v22  ;;  %v4445_v22 = vld [vmem:[#allocation8 + $0x8] sm:$0xff]  }
 0x5a5   :  { %v3271_v8 = vrot.slane %v3263_v28, %v4789_v16  ;;  %v3278_v14 = vrot.slane %v3264_v29, %v4789_v16  ;;  %v3287_v49 = vrot.slane %v3279_v25, %v4789_v16  ;;  %v3294_v56 = vrot.slane %v3280_v61, %v4789_v16  ;;  %4367 = vmatpush3.bf16.msra.mxu1 %v4445_v22 }
 0x5a6   :  { %v3407_v1 = vrot.slane %v3399_v2, %v4789_v16  ;;  %v3414_v55 = vrot.slane %v3400_v36, %v4789_v16  ;;  %v3423_v20 = vrot.slane %v3415_v12, %v4789_v16  ;;  %v3430_v41 = vrot.slane %v3416_v58, %v4789_v16 }
 0x5a7   :  { %v4053_v43 = vcombine.low %v3271_v8, %v3278_v14  ;;  %v4055_v24 = vcombine.high %v3271_v8, %v3278_v14  ;;  %v4057_v23 = vcombine.low %v3287_v49, %v3294_v56  ;;  %v4059_v45 = vcombine.high %v3287_v49, %v3294_v56 }
 0x5a8   :  { %v4061_v34 = vcombine.low %v3407_v1, %v3414_v55  ;;  %v4063_v44 = vcombine.high %v3407_v1, %v3414_v55  ;;  %v4065_v39 = vcombine.low %v3423_v20, %v3430_v41  ;;  %v4067_v32 = vcombine.high %v3423_v20, %v3430_v41 }
 0x5a9   :  { %v3454_v11 = vrot.slane %v4053_v43, %v4786_v10  ;;  %v3470_v9 = vrot.slane %v4055_v24, %v4786_v10  ;;  %v3486_v15 = vrot.slane %v4057_v23, %v4786_v10  ;;  %v3502_v33 = vrot.slane %v4059_v45, %v4786_v10 }
 0x5aa   :  { %v3590_v48 = vrot.slane %v4061_v34, %v4786_v10  ;;  %v3606_v62 = vrot.slane %v4063_v44, %v4786_v10  ;;  %v3622_v3 = vrot.slane %v4065_v39, %v4786_v10  ;;  %v3638_v50 = vrot.slane %v4067_v32, %v4786_v10 }
 0x5ab   :  { %v3519_v27 = vcombine.low %v3454_v11, %v3470_v9  ;;  %v3551_v46 = vcombine.low %v3486_v15, %v3502_v33  ;;  %v3520_v57 = vcombine.high %v3454_v11, %v3470_v9  ;;  %v3552_v51 = vcombine.high %v3486_v15, %v3502_v33 }
 0x5ac   :  { %v3655_v53 = vcombine.low %v3590_v48, %v3606_v62  ;;  %v3687_v63 = vcombine.low %v3622_v3, %v3638_v50  ;;  %v3656_v59 = vcombine.high %v3590_v48, %v3606_v62  ;;  %v3688_v4 = vcombine.high %v3622_v3, %v3638_v50 }
 0x5ad   :  { %v3527_v47 = vrot.slane %v3519_v27, %v4789_v16  ;;  %v3559_v5 = vrot.slane %v3551_v46, %v4789_v16  ;;  %v3534_v52 = vrot.slane %v3520_v57, %v4789_v16  ;;  %v3566_v30 = vrot.slane %v3552_v51, %v4789_v16 }
 0x5ae   :  { %v3663_v26 = vrot.slane %v3655_v53, %v4789_v16  ;;  %v3695_v31 = vrot.slane %v3687_v63, %v4789_v16  ;;  %v3670_v17 = vrot.slane %v3656_v59, %v4789_v16  ;;  %v3702_v21 = vrot.slane %v3688_v4, %v4789_v16  ;;  %v4068_v53 = vld [vmem:[%s5554_s8] ss:$0 sm:$0xff]  ;;  %s4662_s8 = smov [#allocation10]  }
 0x5af   :  { %v3572_v35 = vcombine.high %v3527_v47, %v3559_v5  ;;  %v3571_v6 = vcombine.low %v3527_v47, %v3559_v5  ;;  %v3574_v54 = vcombine.high %v3534_v52, %v3566_v30  ;;  %v3573_v60 = vcombine.low %v3534_v52, %v3566_v30  ;;  %s3934_s16 = sshll.u32 %s4662_s8, 4  ;;  %s3935_s16 = int_to_ptr.vmem [resolvable:$true] %s3934_s16 }
 0x5b0   :  { %v3708_v18 = vcombine.high %v3663_v26, %v3695_v31  ;;  %v3707_v28 = vcombine.low %v3663_v26, %v3695_v31  ;;  %v3710_v29 = vcombine.high %v3670_v17, %v3702_v21  ;;  %v3709_v25 = vcombine.low %v3670_v17, %v3702_v21  ;;  %s4606_s7 = scalar_lea.vmem %s3935_s16, 256  ;;  %p4611_p5 = scmp.lt.s32.totalorder %s3935_s16, %s3935_s16 }
 0x5b1   :  { %p4607_p4 = scmp.ne.s32.totalorder %s3935_s16, %s4606_s7  ;;  %p4612_p6 = scmp.lt.s32.totalorder %s4606_s7, %s4606_s7 }
 0x5b2   :  { %v4419_v61 = vpack.i.bf16 %v3708_v18, %v3572_v35  ;;  %v4414_v2 = vpack.i.bf16 %v3707_v28, %v3571_v6  ;;  %v4429_v36 = vpack.i.bf16 %v3710_v29, %v3574_v54  ;;  %v4424_v12 = vpack.i.bf16 %v3709_v25, %v3573_v60 }
 0x5b3   :  { %p4613_p7 = por %p4612_p6, %p4611_p5 }
 0x5b4   :  { %4420 = vrot.lane.b32.xlu0 %v4419_v61, %s4658_s20  ;;  %4415 = vrot.lane.b32.xlu1 %v4414_v2, %s4659_s14 }
 0x5b5   :  { %p4614_p8 = pnand %p4613_p7, %p4607_p4 }
 0x5b8   :  { %4430 = vrot.lane.b32.xlu0 %v4429_v36, %s4660_s15  ;;  %4425 = vrot.lane.b32.xlu1 %v4424_v12, %s4661_s17 }
 0x606   :  { %v4401_v58 = vpop.permute.xlu1 %4400  ;;  %v4406_v8 = vpop.permute.xlu0 %4405 }
 0x607   :  { %v4403_v14 = vunpack.i.h.bf16 %v4401_v58  ;;  %v4402_v49 = vunpack.i.l.bf16 %v4401_v58  ;;  %v4408_v1 = vunpack.i.h.bf16 %v4406_v8  ;;  %v4407_v55 = vunpack.i.l.bf16 %v4406_v8 }
 0x609   :  { %v3767_v20 = vsel %vm1500_vm2, %v3567_v7, %v4402_v49  ;;  %v3768_v41 = vsel %vm1500_vm2, %v3703_v42, %v4403_v14 }
 0x60a   :  { %v4411_v56 = vpop.permute.xlu1 %4410  ;;  %v3769_v34 = vsel %vm2237_vm3, %v3767_v20, %v4407_v55  ;;  %v3770_v44 = vsel %vm2237_vm3, %v3768_v41, %v4408_v1 }
 0x60b   :  { %v4413_v43 = vunpack.i.h.bf16 %v4411_v56  ;;  %v4412_v24 = vunpack.i.l.bf16 %v4411_v56 }
 0x60d   :  { %v3772_v37 = vsel %vm3771_vm5, %v3769_v34, %v4412_v24  ;;  %v3773_v38 = vsel %vm3771_vm5, %v3770_v44, %v4413_v43 }
 0x626   :  { %v4421_v23 = vpop.permute.xlu0 %4420  ;;  %v4416_v45 = vpop.permute.xlu1 %4415 }
 0x627   :  { %v4418_v39 = vunpack.i.h.bf16 %v4416_v45  ;;  %v4417_v32 = vunpack.i.l.bf16 %v4416_v45  ;;  %v4423_v7 = vunpack.i.h.bf16 %v4421_v23  ;;  %v4422_v11 = vunpack.i.l.bf16 %v4421_v23 }
 0x629   :  { %v3776_v9 = vsel %vm3774_vm6, %v3773_v38, %v4418_v39  ;;  %v3775_v13 = vsel %vm3774_vm6, %v3772_v37, %v4417_v32 }
 0x62a   :  { %v4431_v40 = vpop.permute.xlu0 %4430  ;;  %v4426_v42 = vpop.permute.xlu1 %4425  ;;  %v3778_v62 = vsel %vm3777_vm7, %v3775_v13, %v4422_v11  ;;  %v3779_v3 = vsel %vm3777_vm7, %v3776_v9, %v4423_v7 }
 0x62b   :  { %v4433_v15 = vunpack.i.h.bf16 %v4431_v40  ;;  %v4432_v33 = vunpack.i.l.bf16 %v4431_v40  ;;  %v4428_v19 = vunpack.i.h.bf16 %v4426_v42  ;;  %v4427_v48 = vunpack.i.l.bf16 %v4426_v42 }
 0x62d   :  { %v3781_v50 = vsel %vm3780_vm8, %v3778_v62, %v4427_v48  ;;  %v3782_v27 = vsel %vm3780_vm8, %v3779_v3, %v4428_v19 }
 0x62e   :  { %v3784_v46 = vsel %vm3783_vm9, %v3781_v50, %v4432_v33  ;;  %v3785_v57 = vsel %vm3783_vm9, %v3782_v27, %v4433_v15 }
 0x62f   :  { %v3786_v51 = vpack.c.bf16 %v3785_v57, %v3784_v46 }
 0x631   :  { %4369 = vmatmul.mubr.msk.bf16.vlgmr.msra.gmra.mrb[68].mxu1 %vm171_vm1, %v3786_v51 }
 0x704   :  { %v3847_v63 = vpop.f32.mrb[68].mxu1 }
 0x705   :  { %v3848_v59 = vadd.f32 %v4068_v53, %v3847_v63  ;;  %v4370_v4 = vpop.f32.mrb[69].mxu1 }
 0x706   :  { %v3850_v47 = vpop.f32.mrb[70].mxu1 }
 0x707   :  { %v3854_v5 = vcombine.high %v3848_v59, %v4644_v0  ;;  %v3851_v52 = vadd.f32 %v4068_v53, %v3850_v47  ;;  %v4371_v30 = vpop.f32.mrb[71].mxu1  ;;  %v3861_v26 = vrot.slane %v3848_v59, %v4786_v10 }
 0x709   :  { %v3869_v31 = vcombine.high %v3851_v52, %v4644_v0  ;;  %v3876_v17 = vrot.slane %v3851_v52, %v4786_v10  ;;  %v3868_v21 = vrot.slane %v3854_v5, %v4786_v10 }
 0x70b   :  { %v3883_v35 = vrot.slane %v3869_v31, %v4786_v10  ;;  %v3884_v6 = vcombine.low %v3861_v26, %v3876_v17  ;;  %v3885_v54 = vcombine.high %v3861_v26, %v3876_v17 }
 0x70d   :  { %v3892_v60 = vrot.slane %v3884_v6, %v4789_v16  ;;  %v3899_v22 = vrot.slane %v3885_v54, %v4789_v16  ;;  %v3900_v18 = vcombine.low %v3868_v21, %v3883_v35  ;;  %v3901_v28 = vcombine.high %v3868_v21, %v3883_v35 }
 0x70f   :  { %v3908_v29 = vrot.slane %v3900_v18, %v4789_v16  ;;  %v3915_v25 = vrot.slane %v3901_v28, %v4789_v16  ;;  %v3916_v61 = vcombine.high %v3892_v60, %v4644_v0  ;;  %v3917_v2 = vcombine.high %v3899_v22, %v4644_v0  ;;  %3921 = vst.msk [vmem:[#allocation10] sm:$0x3] %vm3920_vm10, %v3892_v60 }
 0x710   :  { %3923 = vst.msk [vmem:[#allocation10 + $0x4] sm:$0x3] %vm3920_vm10, %v3899_v22 }
 0x711   :  { %v3918_v10 = vcombine.high %v3908_v29, %v4644_v0  ;;  %v3919_v36 = vcombine.high %v3915_v25, %v4644_v0  ;;  %3922 = vst.msk [vmem:[#allocation10 + $0x2] sm:$0x3] %vm3920_vm10, %v3916_v61  ;;  %3924 = vst.msk [vmem:[#allocation10 + $0x6] sm:$0x3] %vm3920_vm10, %v3917_v2 }
 0x712   :  { %3925 = vst.msk [vmem:[#allocation10 + $0x8] sm:$0x3] %vm3920_vm10, %v3908_v29  ;;  %3927 = vst.msk [vmem:[#allocation10 + $0xc] sm:$0x3] %vm3920_vm10, %v3915_v25 }
 0x713   :  { %3926 = vst.msk [vmem:[#allocation10 + $0xa] sm:$0x3] %vm3920_vm10, %v3918_v10  ;;  %3928 = vst.msk [vmem:[#allocation10 + $0xe] sm:$0x3] %vm3920_vm10, %v3919_v36 }
 0x714   :  { %4617 = shalt.err (!%p4614_p8)
}
 0x715   :  { %s4618_s23 = scalar_lea.hbm %s5555_s9, 256 }
 0x716   :  { %p4619_p9 = scmp.ne.s32.totalorder %s5555_s9, %s4618_s23  ;;  %p4622_p10 = scmp.lt.u32.totalorder %s4618_s23, %s5555_s9 }
 0x718   :  { %p4624_p11 = pnand %p4622_p10, %p4619_p9 }
 0x71a   :  { %4627 = shalt.err (!%p4624_p11)
}
 0x71b   :  { %3940 = dma.vmem_to_hbm [thread:$0]  %s3935_s16, 256, %s5555_s9, [#allocation4], %s4640_s1, %s4640_s1, %s4641_s10  }
 0x71c   :  { %4634 = dma.done.wait [#allocation4], 256  }
 0x71d   :  { %4635 = vsyncadd [#allocation4], 4294967040 }
 0x71e   :  { %3944 = vsyncpa [#allocation3], 1 }
 0x71f   :  { %3945 = vsyncpa [#allocation6], 1 }
 0x720   :  { %3946 = vsyncpa [#allocation9], 1 }
 0x721   :  { %3947 = vsyncpa [#allocation4], 1 }

// kernel: tpu_custom_call.1
= control target key start
LH: loop header
LB: loop body
LE: loop exit
PB: predicated region body
PF: predicated region fallthrough
CT: control target
= control target key end

     0   :  { %14 = vsyncpa [#allocation3], 0  ;;  %s5546_s0 = inlined_call_operand.hbm [shape: f32[8,2,32], index: 0, kind: input, shape index: {}]   ;;  %s5547_s1 = inlined_call_operand.hbm [shape: bf16[32,96], index: 1, kind: input, shape index: {}]   ;;  %s5548_s2 = inlined_call_operand.vmem [shape: f32[1,96], index: 2, kind: input, shape index: {}]   ;;  %s5549_s3 = inlined_call_operand.hbm [shape: bf16[32,32], index: 3, kind: input, shape index: {}]   ;;  %s5550_s4 = inlined_call_operand.vmem [shape: f32[1,32], index: 4, kind: input, shape index: {}]   ;;  %s5551_s5 = inlined_call_operand.vmem [shape: bf16[32,32], index: 5, kind: input, shape index: {}]   ;;  %s5552_s6 = inlined_call_operand.vmem [shape: f32[1,32], index: 6, kind: input, shape index: {}]   ;;  %s5553_s7 = inlined_call_operand.hbm [shape: bf16[32,32], index: 7, kind: input, shape index: {}]   ;;  %s5554_s8 = inlined_call_operand.vmem [shape: f32[1,32], index: 8, kind: input, shape index: {}]   ;;  %s5555_s9 = inlined_call_operand.hbm [shape: f32[8,2,32], index: 9, kind: output, shape index: {}]  }
   0x1   :  { %15 = vsyncpa [#allocation6], 0 }
   0x2   :  { %16 = vsyncpa [#allocation9], 0 }
   0x3   :  { %17 = vsyncpa [#allocation4], 0  ;;  %s4636_s30 = smov [#allocation5]   ;;  %s4518_s13 = scalar_lea.hbm %s5547_s1, 256 }
   0x4   :  { %s35_s10 = sshll.u32 %s4636_s30, 4  ;;  %p4519_p0 = scmp.ne.s32.totalorder %s5547_s1, %s4518_s13  ;;  %s36_s10 = int_to_ptr.vmem [resolvable:$true] %s35_s10 }
   0x5   :  { %p4522_p1 = scmp.lt.u32.totalorder %s4518_s13, %s5547_s1 }
   0x7   :  { %p4524_p2 = pnand %p4522_p1, %p4519_p0 }
   0x9   :  { %4527 = shalt.err (!%p4524_p2)
}
   0xa   :  { %s4528_s18 = scalar_lea.vmem %s36_s10, 256  ;;  %p4533_p4 = scmp.lt.s32.totalorder %s36_s10, %s36_s10 }
   0xb   :  { %p4529_p3 = scmp.ne.s32.totalorder %s36_s10, %s4528_s18  ;;  %p4534_p5 = scmp.lt.s32.totalorder %s4528_s18, %s4528_s18 }
   0xd   :  { %p4535_p6 = por %p4534_p5, %p4533_p4 }
   0xf   :  { %p4536_p7 = pnand %p4535_p6, %p4529_p3 }
  0x11   :  { %4539 = shalt.err (!%p4536_p7)
}
  0x12   :  { %s4637_s19 = smov 64   ;;  %s4638_s20 = smov 4  }
  0x13   :  { %41 = dma.hbm_to_vmem [thread:$0]  %s5547_s1, 256, %s36_s10, [#allocation6], %s4637_s19, %s4637_s19, %s4638_s20  }
  0x14   :  { %s4639_s23 = smov [#allocation2]   ;;  %s4540_s27 = scalar_lea.hbm %s5546_s0, 256 }
  0x15   :  { %s23_s24 = sshll.u32 %s4639_s23, 4  ;;  %p4541_p8 = scmp.ne.s32.totalorder %s5546_s0, %s4540_s27  ;;  %s24_s24 = int_to_ptr.vmem [resolvable:$true] %s23_s24 }
  0x16   :  { %p4544_p9 = scmp.lt.u32.totalorder %s4540_s27, %s5546_s0 }
  0x18   :  { %p4546_p10 = pnand %p4544_p9, %p4541_p8 }
  0x1a   :  { %4549 = shalt.err (!%p4546_p10)
}
  0x1b   :  { %s4550_s12 = scalar_lea.vmem %s24_s24, 256  ;;  %p4555_p12 = scmp.lt.s32.totalorder %s24_s24, %s24_s24 }
  0x1c   :  { %p4551_p11 = scmp.ne.s32.totalorder %s24_s24, %s4550_s12  ;;  %p4556_p13 = scmp.lt.s32.totalorder %s4550_s12, %s4550_s12 }
  0x1e   :  { %p4557_p0 = por %p4556_p13, %p4555_p12 }
  0x20   :  { %p4558_p1 = pnand %p4557_p0, %p4551_p11 }
  0x22   :  { %4561 = shalt.err (!%p4558_p1)
}
  0x23   :  { %s4640_s1 = smov 32   ;;  %s4641_s10 = smov 2  }
  0x24   :  { %29 = dma.hbm_to_vmem [thread:$0]  %s5546_s0, 256, %s24_s24, [#allocation3], %s4640_s1, %s4640_s1, %s4641_s10  }
  0x25   :  { %s4642_s15 = smov [#allocation7]   ;;  %s4643_s17 = smov [#allocation8]  }
  0x26   :  { %s49_s16 = sshll.u32 %s4642_s15, 4  ;;  %s67_s18 = sshll.u32 %s4643_s17, 4  ;;  %s50_s16 = int_to_ptr.vmem [resolvable:$true] %s49_s16  ;;  %s4743_s18 = int_to_ptr.vmem [resolvable:$true] %s67_s18 }
  0x27   :  { %s4562_s23 = scalar_lea.hbm %s5549_s3, 256 }
  0x28   :  { %p4563_p2 = scmp.ne.s32.totalorder %s5549_s3, %s4562_s23  ;;  %p4566_p3 = scmp.lt.u32.totalorder %s4562_s23, %s5549_s3 }
  0x2a   :  { %p4568_p4 = pnand %p4566_p3, %p4563_p2 }
  0x2c   :  { %4571 = shalt.err (!%p4568_p4)
}
  0x2d   :  { %s4572_s0 = scalar_lea.vmem %s50_s16, 256  ;;  %p4577_p6 = scmp.lt.s32.totalorder %s50_s16, %s50_s16 }
  0x2e   :  { %p4573_p5 = scmp.ne.s32.totalorder %s50_s16, %s4572_s0  ;;  %p4578_p7 = scmp.lt.s32.totalorder %s4572_s0, %s4572_s0 }
  0x30   :  { %p4579_p8 = por %p4578_p7, %p4577_p6 }
  0x32   :  { %p4580_p9 = pnand %p4579_p8, %p4573_p5 }
  0x34   :  { %4583 = shalt.err (!%p4580_p9)
}
  0x35   :  { %55 = dma.hbm_to_vmem [thread:$0]  %s5549_s3, 256, %s50_s16, [#allocation6], %s4637_s19, %s4637_s19, %s4638_s20  }
  0x36   :  { %s4584_s12 = scalar_lea.hbm %s5553_s7, 256 }
  0x37   :  { %p4585_p10 = scmp.ne.s32.totalorder %s5553_s7, %s4584_s12  ;;  %p4588_p11 = scmp.lt.u32.totalorder %s4584_s12, %s5553_s7 }
  0x39   :  { %p4590_p12 = pnand %p4588_p11, %p4585_p10 }
  0x3b   :  { %4593 = shalt.err (!%p4590_p12)
}
  0x3c   :  { %s4594_s21 = scalar_lea.vmem %s4743_s18, 256  ;;  %p4599_p0 = scmp.lt.s32.totalorder %s4743_s18, %s4743_s18 }
  0x3d   :  { %p4595_p13 = scmp.ne.s32.totalorder %s4743_s18, %s4594_s21  ;;  %p4600_p1 = scmp.lt.s32.totalorder %s4594_s21, %s4594_s21 }
  0x3f   :  { %p4601_p2 = por %p4600_p1, %p4599_p0 }
  0x41   :  { %p4602_p3 = pnand %p4601_p2, %p4595_p13 }
  0x43   :  { %4605 = shalt.err (!%p4602_p3)
}
  0x44   :  { %73 = dma.hbm_to_vmem [thread:$0]  %s5553_s7, 256, %s4743_s18, [#allocation9], %s4637_s19, %s4637_s19, %s4638_s20  }
  0x45   :  { %4628 = dma.done.wait [#allocation3], 256  }
  0x46   :  { %4629 = vsyncadd [#allocation3], 4294967040 }
  0x47   :  { %4630 = dma.done.wait [#allocation6], 512  }
  0x48   :  { %4631 = vsyncadd [#allocation6], 4294966784 }
  0x49   :  { %4632 = dma.done.wait [#allocation9], 256  }
  0x4a   :  { %4633 = vsyncadd [#allocation9], 4294967040  ;;  %v4644_v0 = vmov 0.0   ;;  %vm4645_vm0 = vmmov 0   ;;  %v4646_v1 = vmov 1983009808   ;;  %v101_v3 = vlaneseq }
  0x4b   :  { %4148 = vmatprep.subr.bf16.mxu0 %v4644_v0  ;;  %4152 = vmatprep.mubr.msk.bf16.mxu0 %vm4645_vm0, %v4644_v0  ;;  %v99_v2 = vunpack.c.l.s4 %v4646_v1  ;;  %v4647_v6 = vmov 1934713408   ;;  %v4434_v8 = vld [vmem:[#allocation5] sm:$0xff]   ;;  %v4435_v9 = vld [vmem:[#allocation5 + $0x8] sm:$0xff]   ;;  %vm171_vm1 = vcmask 261120   ;;  %v4440_v24 = vld [vmem:[#allocation7] sm:$0xff]  }
  0x4c   :  { %4156 = vmatprep.subr.bf16.mxu1 %v4644_v0  ;;  %4160 = vmatprep.mubr.msk.bf16.mxu1 %vm4645_vm0, %v4644_v0  ;;  %v102_v5 = vshrl.u32 %v101_v3, 7  ;;  %v131_v7 = vunpack.c.l.s4 %v4647_v6  ;;  %v4514_v12 = vld.sshfl [vmem:[#allocation2] sm:$0xf pattern:$0x76325410]  ;;  %v4441_v25 = vld [vmem:[#allocation7 + $0x8] sm:$0xff]  }
  0x4d   :  { %v100_v4 = vunpack.c.0.s8 %v99_v2  ;;  %4149 = vmatpush3.bf16.msra.mxu0 %v4434_v8  ;;  %v4515_v13 = vld.sshfl [vmem:[#allocation2 + $0x2] sm:$0xf pattern:$0x76325410]  ;;  %4157 = vmatpush3.bf16.msra.mxu1 %v4440_v24  ;;  %v3948_v26 = vld [vmem:[%s5548_s2] ss:$0 sm:$0xff] }
  0x4e   :  { %4150 = vmatprep.subr.bf16.mxu0 %v4644_v0  ;;  %v132_v11 = vunpack.c.0.s8 %v131_v7  ;;  %v4516_v14 = vld.sshfl [vmem:[#allocation2 + $0x8] sm:$0xf pattern:$0x76325410]  ;;  %v129_v17 = vcombine.low %v4514_v12, %v4515_v13  ;;  %4158 = vmatprep.subr.bf16.mxu1 %v4644_v0  ;;  %s4648_s22 = smov 116   ;;  %s4649_s23 = smov 124  }
  0x4f   :  { %v4786_v10 = vsub.s32 %v100_v4, %v102_v5  ;;  %v4517_v15 = vld.sshfl [vmem:[#allocation2 + $0xa] sm:$0xf pattern:$0x76325410]  ;;  %s4650_s2 = smov 112   ;;  %s4651_s25 = smov 120  }
  0x50   :  { %v4789_v16 = vsub.s32 %v132_v11, %v102_v5  ;;  %v137_v18 = vcombine.low %v4516_v14, %v4517_v15  ;;  %s4652_s26 = smov 104   ;;  %s4653_s27 = smov 108   ;;  %v4442_v37 = vld [vmem:[%s5551_s5] sm:$0xff]   ;;  %v4443_v38 = vld [vmem:[%s5551_s5 + $0x8] sm:$0xff]   ;;  %vm1500_vm2 = vcmask 31744   ;;  %vm2237_vm3 = vcmask 64512  }
  0x51   :  { %4151 = vmatpush3.bf16.msra.mxu0 %v4435_v9  ;;  %4159 = vmatpush3.bf16.msra.mxu1 %v4441_v25  ;;  %s4654_s28 = smov 100   ;;  %s4655_s0 = smov 96   ;;  %v3952_v46 = vld [vmem:[%s5550_s4] ss:$0 sm:$0xff]  ;;  %vm2433_vm4 = vcmask 1043456   ;;  %vm3771_vm5 = vcmask 97280  }
  0x52   :  { %4164 = vmatprep.subr.bf16.mxu0 %v4644_v0  ;;  %v136_v19 = vrot.slane %v129_v17, %v4789_v16  ;;  %v144_v20 = vrot.slane %v137_v18, %v4789_v16  ;;  %4172 = vmatprep.subr.bf16.mxu1 %v4644_v0  ;;  %s4657_s13 = smov 12   ;;  %s4659_s14 = smov 16   ;;  %vm3774_vm6 = vcmask 130048   ;;  %vm3777_vm7 = vcmask 162816  }
  0x53   :  { %s4660_s15 = smov 28   ;;  %s4661_s17 = smov 24   ;;  %vm3780_vm8 = vcmask 195584   ;;  %vm3783_vm9 = vcmask 228352   ;;  %vm3920_vm10 = vcmask 254976  }
  0x54   :  { %v145_v21 = vcombine.low %v136_v19, %v144_v20  ;;  %v146_v22 = vcombine.high %v136_v19, %v144_v20 }
  0x56   :  { %v147_v23 = vpack.c.bf16 %v146_v22, %v145_v21 }
  0x58   :  { %4153 = vmatmul.mubr.msk.bf16.vlgmr.msra.gmra.mrb[0].mxu0 %vm171_vm1, %v147_v23 }
  0x59   :  { %4168 = vmatprep.mubr.msk.bf16.mxu0 %vm4645_vm0, %v4644_v0  ;;  %4165 = vmatpush3.bf16.msra.mxu0 %v4442_v37 }
  0x5a   :  { %4166 = vmatprep.subr.bf16.mxu0 %v4644_v0 }
  0x5d   :  { %4167 = vmatpush3.bf16.msra.mxu0 %v4443_v38 }
  0x5e   :  { %4178 = vmatprep.subr.bf16.mxu0 %v4644_v0 }
 0x12b   :  { %v209_v27 = vpop.f32.mrb[0].mxu0 }
 0x12c   :  { %v210_v28 = vadd.f32 %v3948_v26, %v209_v27  ;;  %v4154_v29 = vpop.f32.mrb[1].mxu0 }
 0x12d   :  { %v212_v30 = vpop.f32.mrb[2].mxu0 }
 0x12e   :  { %v213_v31 = vadd.f32 %v3948_v26, %v212_v30  ;;  %v4155_v32 = vpop.f32.mrb[3].mxu0  ;;  %v216_v33 = vmax.f32 %v210_v28, 0.0 }
 0x130   :  { %v217_v34 = vmax.f32 %v213_v31, 0.0  ;;  %v356_v35 = vpack.c.bf16 %v213_v31, %v210_v28 }
 0x132   :  { %v218_v36 = vpack.c.bf16 %v217_v34, %v216_v33  ;;  %362 = vrot.lane.b32.xlu1 %v356_v35, %s4648_s22  ;;  %358 = vrot.lane.b32.xlu0 %v356_v35, %s4649_s23 }
 0x134   :  { %4161 = vmatmul.mubr.msk.bf16.vlgmr.msra.gmra.mrb[0].mxu1 %vm171_vm1, %v218_v36 }
 0x135   :  { %4174 = vmatprep.mubr.msk.bf16.mxu1 %vm4645_vm0, %v4644_v0 }
 0x136   :  { %364 = vrot.lane.b32.xlu1 %v356_v35, %s4650_s2  ;;  %360 = vrot.lane.b32.xlu0 %v356_v35, %s4651_s25 }
 0x13a   :  { %368 = vrot.lane.b32.xlu1 %v356_v35, %s4652_s26  ;;  %366 = vrot.lane.b32.xlu0 %v356_v35, %s4653_s27 }
 0x13e   :  { %748 = vrot.lane.b32.xlu1 %v356_v35, %s4637_s19  ;;  %370 = vrot.lane.b32.xlu0 %v356_v35, %s4654_s28 }
 0x142   :  { %372 = vrot.lane.b32.xlu1 %v356_v35, %s4655_s0 }
 0x1a4   :  { %v363_v39 = vpop.permute.xlu1 %362  ;;  %v359_v40 = vpop.permute.xlu0 %358 }
 0x1a5   :  { %750 = vrot.lane.b32.xlu0 %v359_v40, %s4637_s19 }
 0x1a8   :  { %v361_v41 = vpop.permute.xlu0 %360  ;;  %v365_v42 = vpop.permute.xlu1 %364 }
 0x1a9   :  { %754 = vrot.lane.b32.xlu0 %v363_v39, %s4637_s19  ;;  %752 = vrot.lane.b32.xlu1 %v361_v41, %s4637_s19 }
 0x1ac   :  { %v367_v43 = vpop.permute.xlu0 %366  ;;  %v369_v44 = vpop.permute.xlu1 %368 }
 0x1ad   :  { %756 = vrot.lane.b32.xlu1 %v365_v42, %s4637_s19  ;;  %758 = vrot.lane.b32.xlu0 %v367_v43, %s4637_s19 }
 0x1b0   :  { %v371_v45 = vpop.permute.xlu0 %370  ;;  %v749_v53 = vpop.permute.xlu1 %748 }
 0x1b1   :  { %760 = vrot.lane.b32.xlu1 %v369_v44, %s4637_s19  ;;  %762 = vrot.lane.b32.xlu0 %v371_v45, %s4637_s19  ;;  %v768_v9 = vshrl.u32 %v749_v53, 16 }
 0x1b4   :  { %v4831_v56 = vpop.permute.xlu1 %372 }
 0x1b5   :  { %376 = vrot.lane.b32.xlu1 %v361_v41, %s4655_s0  ;;  %374 = vrot.lane.b32.xlu0 %v359_v40, %s4655_s0 }
 0x1b9   :  { %380 = vrot.lane.b32.xlu1 %v365_v42, %s4655_s0  ;;  %378 = vrot.lane.b32.xlu0 %v363_v39, %s4655_s0 }
 0x1bd   :  { %384 = vrot.lane.b32.xlu1 %v369_v44, %s4655_s0  ;;  %382 = vrot.lane.b32.xlu0 %v367_v43, %s4655_s0  ;;  %v392_v44 = vshrl.u32 %v4831_v56, 16 }
 0x1c1   :  { %386 = vrot.lane.b32.xlu0 %v371_v45, %s4655_s0 }
 0x207   :  { %v279_v47 = vpop.f32.mrb[0].mxu1 }
 0x208   :  { %v280_v48 = vadd.f32 %v3952_v46, %v279_v47  ;;  %v4162_v49 = vpop.f32.mrb[1].mxu1 }
 0x209   :  { %v282_v50 = vpop.f32.mrb[2].mxu1 }
 0x20a   :  { %v283_v51 = vadd.f32 %v3952_v46, %v282_v50  ;;  %v4163_v52 = vpop.f32.mrb[3].mxu1  ;;  %4446 = vtanh.f32 %v280_v48 }
 0x20c   :  { %4448 = vtanh.f32 %v283_v51 }
 0x214   :  { %v4447_v54 = vpop.eup %4446 }
 0x216   :  { %v4449_v55 = vpop.eup %4448 }
 0x217   :  { %v751_v57 = vpop.permute.xlu0 %750  ;;  %v288_v58 = vpack.c.bf16 %v4449_v55, %v4447_v54 }
 0x218   :  { %v766_v3 = vpack.i.b16 %v751_v57, %v749_v53  ;;  %v769_v4 = vshrl.u32 %v751_v57, 16 }
 0x219   :  { %4169 = vmatmul.mubr.msk.bf16.vlgmr.msra.gmra.mrb[4].mxu0 %vm171_vm1, %v288_v58 }
 0x21a   :  { %4180 = vmatprep.mubr.msk.bf16.mxu0 %vm4645_vm0, %v4644_v0  ;;  %v770_v19 = vpack.i.b16 %v769_v4, %v768_v9 }
 0x21b   :  { %v753_v59 = vpop.permute.xlu1 %752  ;;  %v755_v60 = vpop.permute.xlu0 %754 }
 0x21c   :  { %v776_v5 = vshrl.u32 %v753_v59, 16  ;;  %v777_v6 = vshrl.u32 %v755_v60, 16  ;;  %v774_v14 = vpack.i.b16 %v755_v60, %v753_v59 }
 0x21e   :  { %v778_v20 = vpack.i.b16 %v777_v6, %v776_v5 }
 0x21f   :  { %v757_v61 = vpop.permute.xlu1 %756  ;;  %v759_v62 = vpop.permute.xlu0 %758 }
 0x220   :  { %v784_v63 = vshrl.u32 %v757_v61, 16  ;;  %v782_v1 = vpack.i.b16 %v759_v62, %v757_v61  ;;  %v785_v2 = vshrl.u32 %v759_v62, 16 }
 0x222   :  { %v786_v11 = vpack.i.b16 %v785_v2, %v784_v63  ;;  %v796_v12 = vcombine.low %v766_v3, %v782_v1  ;;  %v797_v13 = vcombine.high %v766_v3, %v782_v1 }
 0x223   :  { %v761_v7 = vpop.permute.xlu1 %760  ;;  %v763_v8 = vpop.permute.xlu0 %762 }
 0x224   :  { %v792_v15 = vshrl.u32 %v761_v7, 16  ;;  %v790_v17 = vpack.i.b16 %v763_v8, %v761_v7  ;;  %v793_v18 = vshrl.u32 %v763_v8, 16  ;;  %v804_v26 = vrot.slane %v796_v12, %v4786_v10 }
 0x225   :  { %v811_v27 = vrot.slane %v797_v13, %v4786_v10  ;;  %v864_v28 = vcombine.low %v770_v19, %v786_v11  ;;  %v865_v33 = vcombine.high %v770_v19, %v786_v11 }
 0x226   :  { %v794_v21 = vpack.i.b16 %v793_v18, %v792_v15  ;;  %v812_v22 = vcombine.low %v774_v14, %v790_v17  ;;  %v813_v23 = vcombine.high %v774_v14, %v790_v17 }
 0x227   :  { %v377_v24 = vpop.permute.xlu1 %376  ;;  %v375_v25 = vpop.permute.xlu0 %374  ;;  %v872_v40 = vrot.slane %v864_v28, %v4786_v10  ;;  %v879_v47 = vrot.slane %v865_v33, %v4786_v10 }
 0x228   :  { %v820_v29 = vrot.slane %v812_v22, %v4786_v10  ;;  %v827_v30 = vrot.slane %v813_v23, %v4786_v10  ;;  %v880_v31 = vcombine.low %v778_v20, %v794_v21  ;;  %v881_v32 = vcombine.high %v778_v20, %v794_v21 }
 0x229   :  { %v393_v43 = vshrl.u32 %v375_v25, 16  ;;  %v400_v54 = vshrl.u32 %v377_v24, 16  ;;  %v390_v55 = vpack.i.b16 %v375_v25, %v4831_v56 }
 0x22a   :  { %v828_v34 = vcombine.low %v804_v26, %v820_v29  ;;  %v829_v35 = vcombine.high %v804_v26, %v820_v29  ;;  %v844_v36 = vcombine.low %v811_v27, %v827_v30  ;;  %v845_v37 = vcombine.high %v811_v27, %v827_v30 }
 0x22b   :  { %v381_v38 = vpop.permute.xlu1 %380  ;;  %v379_v39 = vpop.permute.xlu0 %378  ;;  %v888_v41 = vrot.slane %v880_v31, %v4786_v10  ;;  %v895_v42 = vrot.slane %v881_v32, %v4786_v10  ;;  %v394_v57 = vpack.i.b16 %v393_v43, %v392_v44 }
 0x22c   :  { %v836_v45 = vrot.slane %v828_v34, %v4789_v16  ;;  %v843_v46 = vrot.slane %v829_v35, %v4789_v16  ;;  %v852_v48 = vrot.slane %v844_v36, %v4789_v16  ;;  %v859_v49 = vrot.slane %v845_v37, %v4789_v16 }
 0x22d   :  { %v896_v50 = vcombine.low %v872_v40, %v888_v41  ;;  %v897_v51 = vcombine.high %v872_v40, %v888_v41  ;;  %v912_v53 = vcombine.low %v879_v47, %v895_v42  ;;  %v913_v58 = vcombine.high %v879_v47, %v895_v42 }
 0x22e   :  { %v932_v59 = vcombine.low %v836_v45, %v843_v46  ;;  %v408_v60 = vshrl.u32 %v381_v38, 16  ;;  %v398_v61 = vpack.i.b16 %v379_v39, %v377_v24  ;;  %v3980_v1 = vcombine.high %v836_v45, %v843_v46 }
 0x22f   :  { %v383_v52 = vpop.permute.xlu0 %382  ;;  %v385_v62 = vpop.permute.xlu1 %384  ;;  %v4851_v63 = vrot.slane %v896_v50, %v4789_v16  ;;  %v948_v2 = vcombine.low %v852_v48, %v859_v49  ;;  %v3981_v3 = vcombine.high %v852_v48, %v859_v49  ;;  %v4854_v4 = vrot.slane %v897_v51, %v4789_v16 }
 0x230   :  { %v401_v5 = vshrl.u32 %v379_v39, 16  ;;  %v406_v6 = vpack.i.b16 %v383_v52, %v381_v38  ;;  %v409_v7 = vshrl.u32 %v383_v52, 16  ;;  %v4857_v56 = vrot.slane %v912_v53, %v4789_v16 }
 0x231   :  { %v416_v9 = vshrl.u32 %v385_v62, 16  ;;  %v4860_v13 = vrot.slane %v913_v58, %v4789_v16  ;;  %v4867_v30 = vrot.slane %v932_v59, %v4786_v10  ;;  %v4870_v31 = vrot.slane %v3980_v1, %v4786_v10 }
 0x232   :  { %v410_v14 = vpack.i.b16 %v409_v7, %v408_v60  ;;  %v420_v15 = vcombine.low %v390_v55, %v406_v6  ;;  %v421_v17 = vcombine.high %v390_v55, %v406_v6  ;;  %v402_v18 = vpack.i.b16 %v401_v5, %v400_v54 }
 0x233   :  { %v387_v8 = vpop.permute.xlu0 %386  ;;  %v4873_v32 = vrot.slane %v948_v2, %v4786_v10  ;;  %v4876_v33 = vrot.slane %v3981_v3, %v4786_v10  ;;  %v1000_v50 = vcombine.low %v4851_v63, %v4854_v4  ;;  %v3982_v51 = vcombine.high %v4851_v63, %v4854_v4 }
 0x234   :  { %v414_v11 = vpack.i.b16 %v387_v8, %v385_v62  ;;  %v417_v12 = vshrl.u32 %v387_v8, 16  ;;  %v428_v22 = vrot.slane %v420_v15, %v4786_v10  ;;  %v435_v23 = vrot.slane %v421_v17, %v4786_v10 }
 0x235   :  { %v488_v24 = vcombine.low %v394_v57, %v410_v14  ;;  %v489_v25 = vcombine.high %v394_v57, %v410_v14  ;;  %v1016_v52 = vcombine.low %v4857_v56, %v4860_v13  ;;  %v3983_v53 = vcombine.high %v4857_v56, %v4860_v13 }
 0x236   :  { %v418_v19 = vpack.i.b16 %v417_v12, %v416_v9  ;;  %v436_v20 = vcombine.low %v398_v61, %v414_v11  ;;  %v437_v21 = vcombine.high %v398_v61, %v414_v11  ;;  %v964_v4 = vcombine.low %v4867_v30, %v4870_v31 }
 0x237   :  { %v496_v38 = vrot.slane %v488_v24, %v4786_v10  ;;  %v503_v39 = vrot.slane %v489_v25, %v4786_v10  ;;  %v980_v5 = vcombine.low %v4873_v32, %v4876_v33  ;;  %v4903_v6 = vrot.slane %v1000_v50, %v4786_v10 }
 0x238   :  { %v444_v26 = vrot.slane %v436_v20, %v4786_v10  ;;  %v451_v27 = vrot.slane %v437_v21, %v4786_v10  ;;  %v504_v28 = vcombine.low %v402_v18, %v418_v19  ;;  %v505_v29 = vcombine.high %v402_v18, %v418_v19 }
 0x239   :  { %v4906_v7 = vrot.slane %v3982_v51, %v4786_v10  ;;  %v4937_v19 = vrot.slane %v1016_v52, %v4786_v10  ;;  %v4940_v20 = vrot.slane %v3983_v53, %v4786_v10 }
 0x23a   :  { %v452_v34 = vcombine.low %v428_v22, %v444_v26  ;;  %v453_v35 = vcombine.high %v428_v22, %v444_v26  ;;  %v468_v36 = vcombine.low %v435_v23, %v451_v27  ;;  %v469_v37 = vcombine.high %v435_v23, %v451_v27 }
 0x23b   :  { %v512_v40 = vrot.slane %v504_v28, %v4786_v10  ;;  %v519_v41 = vrot.slane %v505_v29, %v4786_v10  ;;  %v1032_v21 = vcombine.low %v4903_v6, %v4906_v7  ;;  %v972_v22 = vrot.slane %v964_v4, %v4789_v16 }
 0x23c   :  { %v460_v42 = vrot.slane %v452_v34, %v4789_v16  ;;  %v467_v43 = vrot.slane %v453_v35, %v4789_v16  ;;  %v476_v44 = vrot.slane %v468_v36, %v4789_v16  ;;  %v483_v45 = vrot.slane %v469_v37, %v4789_v16 }
 0x23d   :  { %v520_v46 = vcombine.low %v496_v38, %v512_v40  ;;  %v521_v47 = vcombine.high %v496_v38, %v512_v40  ;;  %v536_v48 = vcombine.low %v503_v39, %v519_v41  ;;  %v537_v49 = vcombine.high %v503_v39, %v519_v41 }
 0x23e   :  { %v556_v59 = vcombine.low %v460_v42, %v467_v43  ;;  %v3960_v60 = vcombine.high %v460_v42, %v467_v43  ;;  %v572_v61 = vcombine.low %v476_v44, %v483_v45  ;;  %v3961_v62 = vcombine.high %v476_v44, %v483_v45 }
 0x23f   :  { %v528_v54 = vrot.slane %v520_v46, %v4789_v16  ;;  %v535_v55 = vrot.slane %v521_v47, %v4789_v16  ;;  %v544_v57 = vrot.slane %v536_v48, %v4789_v16  ;;  %v551_v58 = vrot.slane %v537_v49, %v4789_v16 }
 0x240   :  { %v4921_v12 = vrot.slane %v556_v59, %v4786_v10  ;;  %v4924_v13 = vrot.slane %v3960_v60, %v4786_v10  ;;  %v4927_v14 = vrot.slane %v572_v61, %v4786_v10  ;;  %v4930_v15 = vrot.slane %v3961_v62, %v4786_v10 }
 0x241   :  { %v624_v1 = vcombine.low %v528_v54, %v535_v55  ;;  %v3962_v63 = vcombine.high %v528_v54, %v535_v55  ;;  %v640_v2 = vcombine.low %v544_v57, %v551_v58  ;;  %v3963_v3 = vcombine.high %v544_v57, %v551_v58 }
 0x242   :  { %v988_v23 = vrot.slane %v980_v5, %v4789_v16  ;;  %v588_v24 = vcombine.low %v4921_v12, %v4924_v13  ;;  %v604_v25 = vcombine.low %v4927_v14, %v4930_v15  ;;  %v1040_v26 = vrot.slane %v1032_v21, %v4789_v16 }
 0x243   :  { %v4909_v8 = vrot.slane %v624_v1, %v4786_v10  ;;  %v4912_v56 = vrot.slane %v3962_v63, %v4786_v10  ;;  %v4915_v9 = vrot.slane %v640_v2, %v4786_v10  ;;  %v4918_v11 = vrot.slane %v3963_v3, %v4786_v10 }
 0x244   :  { %v1048_v27 = vcombine.low %v4937_v19, %v4940_v20  ;;  %v596_v35 = vrot.slane %v588_v24, %v4789_v16  ;;  %v612_v36 = vrot.slane %v604_v25, %v4789_v16  ;;  %v996_v37 = vcombine.low %v972_v22, %v988_v23 }
 0x245   :  { %v656_v17 = vcombine.low %v4909_v8, %v4912_v56  ;;  %v672_v18 = vcombine.low %v4915_v9, %v4918_v11  ;;  %v997_v57 = vcombine.high %v972_v22, %v988_v23  ;;  %v1033_v3 = vcombine.high %v4903_v6, %v4906_v7 }
 0x246   :  { %v1056_v28 = vrot.slane %v1048_v27, %v4789_v16  ;;  %v620_v44 = vcombine.low %v596_v35, %v612_v36  ;;  %v1071_v45 = vshrl.u32 %v996_v37, 16  ;;  %v1049_v4 = vcombine.high %v4937_v19, %v4940_v20 }
 0x247   :  { %v664_v29 = vrot.slane %v656_v17, %v4789_v16  ;;  %v680_v34 = vrot.slane %v672_v18, %v4789_v16  ;;  %v1077_v17 = vshrl.u32 %v997_v57, 16  ;;  %v965_v22 = vcombine.high %v4867_v30, %v4870_v31 }
 0x248   :  { %v1064_v38 = vcombine.low %v1040_v26, %v1056_v28  ;;  %v1065_v50 = vcombine.high %v1040_v26, %v1056_v28  ;;  %v695_v60 = vshrl.u32 %v620_v44, 16  ;;  %v981_v23 = vcombine.high %v4873_v32, %v4876_v33 }
 0x249   :  { %v688_v40 = vcombine.low %v664_v29, %v680_v34  ;;  %v689_v5 = vcombine.high %v664_v29, %v680_v34  ;;  %v621_v24 = vcombine.high %v596_v35, %v612_v36  ;;  %v1047_v19 = vrot.slane %v1033_v3, %v4789_v16 }
 0x24a   :  { %v1070_v39 = vpack.i.b16 %v1064_v38, %v996_v37  ;;  %v1072_v41 = vshrl.u32 %v1064_v38, 16  ;;  %v1076_v61 = vpack.i.b16 %v1065_v50, %v997_v57  ;;  %v1078_v1 = vshrl.u32 %v1065_v50, 16 }
 0x24b   :  { %v694_v48 = vpack.i.b16 %v688_v40, %v620_v44  ;;  %v696_v55 = vshrl.u32 %v688_v40, 16  ;;  %v1063_v20 = vrot.slane %v1049_v4, %v4789_v16  ;;  %v700_v30 = vpack.i.b16 %v689_v5, %v621_v24 }
 0x24c   :  { %v3984_v42 = vcombine.low %v1070_v39, %v1070_v39  ;;  %v3985_v43 = vcombine.high %v1070_v39, %v1070_v39  ;;  %v1073_v49 = vpack.i.b16 %v1072_v41, %v1071_v45  ;;  %v3988_v63 = vcombine.low %v1076_v61, %v1076_v61 }
 0x24d   :  { %v3964_v51 = vcombine.low %v694_v48, %v694_v48  ;;  %v3965_v52 = vcombine.high %v694_v48, %v694_v48  ;;  %v697_v62 = vpack.i.b16 %v696_v55, %v695_v60  ;;  %v3989_v2 = vcombine.high %v1076_v61, %v1076_v61 }
 0x24e   :  { %v1505_v46 = vsel %vm1500_vm2, %v3984_v42, 0  ;;  %v1551_v47 = vsel %vm1500_vm2, %v3985_v43, 0  ;;  %v3986_v53 = vcombine.low %v1073_v49, %v1073_v49  ;;  %v3987_v54 = vcombine.high %v1073_v49, %v1073_v49 }
 0x24f   :  { %4173 = vmatpush3.bf16.xpose.msra.mxu1 %v1505_v46  ;;  %4179 = vmatpush3.bf16.xpose.msra.mxu0 %v1551_v47  ;;  %v3966_v18 = vcombine.low %v697_v62, %v697_v62  ;;  %v3967_v21 = vcombine.high %v697_v62, %v697_v62  ;;  %v1079_v25 = vpack.i.b16 %v1078_v1, %v1077_v17  ;;  %v1689_v6 = vsel %vm1500_vm2, %v3988_v63, 0 }
 0x250   :  { %4184 = vmatprep.subr.bf16.mxu1 %v4644_v0  ;;  %4190 = vmatprep.subr.bf16.mxu0 %v4644_v0  ;;  %v1597_v58 = vsel %vm1500_vm2, %v3986_v53, 0  ;;  %v1643_v59 = vsel %vm1500_vm2, %v3987_v54, 0  ;;  %v1735_v7 = vsel %vm1500_vm2, %v3989_v2, 0  ;;  %v979_v31 = vrot.slane %v965_v22, %v4789_v16 }
 0x251   :  { %v995_v32 = vrot.slane %v981_v23, %v4789_v16  ;;  %v3990_v33 = vcombine.low %v1079_v25, %v1079_v25  ;;  %v3991_v26 = vcombine.high %v1079_v25, %v1079_v25  ;;  %v1066_v27 = vcombine.low %v1047_v19, %v1063_v20 }
 0x252   :  { %v657_v28 = vcombine.high %v4909_v8, %v4912_v56  ;;  %v673_v29 = vcombine.high %v4915_v9, %v4918_v11  ;;  %v3968_v34 = vcombine.low %v700_v30, %v700_v30  ;;  %v3969_v35 = vcombine.high %v700_v30, %v700_v30 }
 0x253   :  { %v702_v36 = vshrl.u32 %v689_v5, 16  ;;  %v998_v37 = vcombine.low %v979_v31, %v995_v32  ;;  %v589_v38 = vcombine.high %v4921_v12, %v4924_v13  ;;  %v605_v39 = vcombine.high %v4927_v14, %v4930_v15 }
 0x254   :  { %v1781_v40 = vsel %vm1500_vm2, %v3990_v33, 0  ;;  %v1827_v8 = vsel %vm1500_vm2, %v3991_v26, 0  ;;  %v701_v56 = vshrl.u32 %v621_v24, 16  ;;  %v671_v12 = vrot.slane %v657_v28, %v4789_v16 }
 0x255   :  { %v1082_v9 = vpack.i.b16 %v1066_v27, %v998_v37  ;;  %v687_v13 = vrot.slane %v673_v29, %v4789_v16  ;;  %v603_v14 = vrot.slane %v589_v38, %v4789_v16  ;;  %v619_v15 = vrot.slane %v605_v39, %v4789_v16 }
 0x256   :  { %4175 = vmatmul.mubr.msk.bf16.vlgmr.msra.gmra.mrb[4].mxu1 %vm1500_vm2, %v3964_v51  ;;  %4181 = vmatmul.mubr.msk.bf16.vlgmr.msra.gmra.mrb[8].mxu0 %vm1500_vm2, %v3965_v52  ;;  %v703_v11 = vpack.i.b16 %v702_v36, %v701_v56  ;;  %v1084_v43 = vshrl.u32 %v1066_v27, 16  ;;  %v1083_v47 = vshrl.u32 %v998_v37, 16  ;;  %v1067_v55 = vcombine.high %v1047_v19, %v1063_v20 }
 0x257   :  { %4185 = vmatpush3.bf16.xpose.msra.mxu1 %v1597_v58  ;;  %4191 = vmatpush3.bf16.xpose.msra.mxu0 %v1643_v59  ;;  %v3992_v41 = vcombine.low %v1082_v9, %v1082_v9  ;;  %v3993_v42 = vcombine.high %v1082_v9, %v1082_v9  ;;  %v690_v46 = vcombine.low %v671_v12, %v687_v13 }
 0x258   :  { %4186 = vmatprep.mubr.msk.bf16.mxu1 %vm4645_vm0, %v4644_v0  ;;  %4192 = vmatprep.mubr.msk.bf16.mxu0 %vm4645_vm0, %v4644_v0  ;;  %v3970_v44 = vcombine.low %v703_v11, %v703_v11  ;;  %v3971_v45 = vcombine.high %v703_v11, %v703_v11  ;;  %v622_v50 = vcombine.low %v603_v14, %v619_v15  ;;  %v1090_v5 = vshrl.u32 %v1067_v55, 16 }
 0x259   :  { %4196 = vmatprep.subr.bf16.mxu1 %v4644_v0  ;;  %4202 = vmatprep.subr.bf16.mxu0 %v4644_v0  ;;  %v1873_v48 = vsel %vm1500_vm2, %v3992_v41, 0  ;;  %v1919_v49 = vsel %vm1500_vm2, %v3993_v42, 0  ;;  %v1085_v51 = vpack.i.b16 %v1084_v43, %v1083_v47  ;;  %v708_v59 = vshrl.u32 %v690_v46, 16 }
 0x25a   :  { %v706_v52 = vpack.i.b16 %v690_v46, %v622_v50  ;;  %v999_v60 = vcombine.high %v979_v31, %v995_v32  ;;  %v707_v1 = vshrl.u32 %v622_v50, 16  ;;  %v623_v25 = vcombine.high %v603_v14, %v619_v15 }
 0x25b   :  { %v3994_v53 = vcombine.low %v1085_v51, %v1085_v51  ;;  %v3995_v54 = vcombine.high %v1085_v51, %v1085_v51 }
 0x25c   :  { %v3972_v57 = vcombine.low %v706_v52, %v706_v52  ;;  %v3973_v58 = vcombine.high %v706_v52, %v706_v52  ;;  %v1088_v63 = vpack.i.b16 %v1067_v55, %v999_v60  ;;  %v709_v2 = vpack.i.b16 %v708_v59, %v707_v1 }
 0x25d   :  { %v1965_v61 = vsel %vm1500_vm2, %v3994_v53, 0  ;;  %v2011_v62 = vsel %vm1500_vm2, %v3995_v54, 0  ;;  %v1089_v22 = vshrl.u32 %v999_v60, 16  ;;  %v713_v27 = vshrl.u32 %v623_v25, 16 }
 0x25e   :  { %4187 = vmatmul.mubr.msk.bf16.vlgmr.msra.gmra.mrb[8].mxu1 %vm1500_vm2, %v3966_v18  ;;  %4193 = vmatmul.mubr.msk.bf16.vlgmr.msra.gmra.mrb[12].mxu0 %vm1500_vm2, %v3967_v21  ;;  %v3996_v3 = vcombine.low %v1088_v63, %v1088_v63  ;;  %v3997_v4 = vcombine.high %v1088_v63, %v1088_v63  ;;  %v3974_v17 = vcombine.low %v709_v2, %v709_v2 }
 0x25f   :  { %4197 = vmatpush3.bf16.xpose.msra.mxu1 %v1689_v6  ;;  %4203 = vmatpush3.bf16.xpose.msra.mxu0 %v1735_v7  ;;  %v3975_v18 = vcombine.high %v709_v2, %v709_v2  ;;  %v691_v21 = vcombine.high %v671_v12, %v687_v13  ;;  %v1091_v6 = vpack.i.b16 %v1090_v5, %v1089_v22 }
 0x260   :  { %4198 = vmatprep.mubr.msk.bf16.mxu1 %vm4645_vm0, %v4644_v0  ;;  %4204 = vmatprep.mubr.msk.bf16.mxu0 %vm4645_vm0, %v4644_v0  ;;  %v2057_v23 = vsel %vm1500_vm2, %v3996_v3, 0  ;;  %v2103_v24 = vsel %vm1500_vm2, %v3997_v4, 0 }
 0x261   :  { %4208 = vmatprep.subr.bf16.mxu1 %v4644_v0  ;;  %4214 = vmatprep.subr.bf16.mxu0 %v4644_v0  ;;  %v712_v7 = vpack.i.b16 %v691_v21, %v623_v25  ;;  %v3998_v19 = vcombine.low %v1091_v6, %v1091_v6  ;;  %v3999_v20 = vcombine.high %v1091_v6, %v1091_v6  ;;  %v714_v32 = vshrl.u32 %v691_v21, 16 }
 0x263   :  { %v3976_v30 = vcombine.low %v712_v7, %v712_v7  ;;  %v3977_v31 = vcombine.high %v712_v7, %v712_v7  ;;  %v2149_v33 = vsel %vm1500_vm2, %v3998_v19, 0  ;;  %v2195_v26 = vsel %vm1500_vm2, %v3999_v20, 0 }
 0x264   :  { %v715_v28 = vpack.i.b16 %v714_v32, %v713_v27 }
 0x266   :  { %4199 = vmatmul.mubr.msk.bf16.vlgmr.msra.gmra.mrb[12].mxu1 %vm1500_vm2, %v3968_v34  ;;  %4205 = vmatmul.mubr.msk.bf16.vlgmr.msra.gmra.mrb[16].mxu0 %vm1500_vm2, %v3969_v35  ;;  %v3978_v29 = vcombine.low %v715_v28, %v715_v28  ;;  %v3979_v34 = vcombine.high %v715_v28, %v715_v28  ;;  %v3956_v35 = vld [vmem:[%s5552_s6] ss:$0 sm:$0xff]  ;;  %s4656_s6 = smov 8  }
 0x267   :  { %4209 = vmatpush3.bf16.xpose.msra.mxu1 %v1781_v40  ;;  %4215 = vmatpush3.bf16.xpose.msra.mxu0 %v1827_v8 }
 0x268   :  { %4210 = vmatprep.mubr.msk.bf16.mxu1 %vm4645_vm0, %v4644_v0  ;;  %4216 = vmatprep.mubr.msk.bf16.mxu0 %vm4645_vm0, %v4644_v0 }
 0x269   :  { %4220 = vmatprep.subr.bf16.mxu1 %v4644_v0  ;;  %4226 = vmatprep.subr.bf16.mxu0 %v4644_v0 }
 0x26e   :  { %4211 = vmatmul.mubr.msk.bf16.vlgmr.msra.gmra.mrb[16].mxu1 %vm1500_vm2, %v3970_v44  ;;  %4217 = vmatmul.mubr.msk.bf16.vlgmr.msra.gmra.mrb[20].mxu0 %vm1500_vm2, %v3971_v45 }
 0x26f   :  { %4221 = vmatpush3.bf16.xpose.msra.mxu1 %v1873_v48  ;;  %4227 = vmatpush3.bf16.xpose.msra.mxu0 %v1919_v49 }
 0x270   :  { %4222 = vmatprep.mubr.msk.bf16.mxu1 %vm4645_vm0, %v4644_v0  ;;  %4228 = vmatprep.mubr.msk.bf16.mxu0 %vm4645_vm0, %v4644_v0 }
 0x271   :  { %4232 = vmatprep.subr.bf16.mxu1 %v4644_v0  ;;  %4238 = vmatprep.subr.bf16.mxu0 %v4644_v0 }
 0x276   :  { %4223 = vmatmul.mubr.msk.bf16.vlgmr.msra.gmra.mrb[20].mxu1 %vm1500_vm2, %v3972_v57  ;;  %4229 = vmatmul.mubr.msk.bf16.vlgmr.msra.gmra.mrb[24].mxu0 %vm1500_vm2, %v3973_v58 }
 0x277   :  { %4233 = vmatpush3.bf16.xpose.msra.mxu1 %v1965_v61  ;;  %4239 = vmatpush3.bf16.xpose.msra.mxu0 %v2011_v62 }
 0x278   :  { %4234 = vmatprep.mubr.msk.bf16.mxu1 %vm4645_vm0, %v4644_v0  ;;  %4240 = vmatprep.mubr.msk.bf16.mxu0 %vm4645_vm0, %v4644_v0 }
 0x279   :  { %4244 = vmatprep.subr.bf16.mxu1 %v4644_v0  ;;  %4250 = vmatprep.subr.bf16.mxu0 %v4644_v0 }
 0x27e   :  { %4235 = vmatmul.mubr.msk.bf16.vlgmr.msra.gmra.mrb[24].mxu1 %vm1500_vm2, %v3974_v17  ;;  %4241 = vmatmul.mubr.msk.bf16.vlgmr.msra.gmra.mrb[28].mxu0 %vm1500_vm2, %v3975_v18 }
 0x27f   :  { %4245 = vmatpush3.bf16.xpose.msra.mxu1 %v2057_v23  ;;  %4251 = vmatpush3.bf16.xpose.msra.mxu0 %v2103_v24 }
 0x280   :  { %4246 = vmatprep.mubr.msk.bf16.mxu1 %vm4645_vm0, %v4644_v0  ;;  %4252 = vmatprep.mubr.msk.bf16.mxu0 %vm4645_vm0, %v4644_v0 }
 0x281   :  { %4256 = vmatprep.subr.bf16.mxu1 %v4644_v0  ;;  %4262 = vmatprep.subr.bf16.mxu0 %v4644_v0 }
 0x286   :  { %4247 = vmatmul.mubr.msk.bf16.vlgmr.msra.gmra.mrb[28].mxu1 %vm1500_vm2, %v3976_v30  ;;  %4253 = vmatmul.mubr.msk.bf16.vlgmr.msra.gmra.mrb[32].mxu0 %vm1500_vm2, %v3977_v31 }
 0x287   :  { %4257 = vmatpush3.bf16.xpose.msra.mxu1 %v2149_v33  ;;  %4263 = vmatpush3.bf16.xpose.msra.mxu0 %v2195_v26 }
 0x288   :  { %4258 = vmatprep.mubr.msk.bf16.mxu1 %vm4645_vm0, %v4644_v0  ;;  %4264 = vmatprep.mubr.msk.bf16.mxu0 %vm4645_vm0, %v4644_v0 }
 0x289   :  { %4268 = vmatprep.subr.bf16.mxu1 %v4644_v0  ;;  %4274 = vmatprep.subr.bf16.mxu0 %v4644_v0 }
 0x28e   :  { %4259 = vmatmul.mubr.msk.bf16.vlgmr.msra.gmra.mrb[32].mxu1 %vm1500_vm2, %v3978_v29  ;;  %4265 = vmatmul.mubr.msk.bf16.vlgmr.msra.gmra.mrb[36].mxu0 %vm1500_vm2, %v3979_v34 }
 0x28f   :  { %4270 = vmatprep.mubr.msk.bf16.mxu1 %vm4645_vm0, %v4644_v0  ;;  %4276 = vmatprep.mubr.msk.bf16.mxu0 %vm4645_vm0, %v4644_v0 }
 0x2ec   :  { %v349_v36 = vpop.f32.mrb[4].mxu0 }
 0x2ed   :  { %v4170_v37 = vpop.f32.mrb[5].mxu0  ;;  %v350_v39 = vadd.f32 %v3956_v35, %v349_v36 }
 0x2ee   :  { %v352_v38 = vpop.f32.mrb[6].mxu0 }
 0x2ef   :  { %v353_v40 = vadd.f32 %v3956_v35, %v352_v38  ;;  %v4171_v8 = vpop.f32.mrb[7].mxu0 }
 0x2f1   :  { %v5065_v56 = vpack.c.bf16 %v353_v40, %v350_v39 }
 0x2f3   :  { %1128 = vrot.lane.b32.xlu1 %v5065_v56, %s4651_s25  ;;  %1126 = vrot.lane.b32.xlu0 %v5065_v56, %s4649_s23 }
 0x2f7   :  { %1130 = vrot.lane.b32.xlu1 %v5065_v56, %s4648_s22 }
 0x329   :  { %v5073_v9 = vpop.f32.mrb[4].mxu1  ;;  %v5075_v11 = vpop.f32.mrb[8].mxu0 }
 0x32a   :  { %v4176_v12 = vpop.f32.mrb[5].mxu1  ;;  %v4182_v13 = vpop.f32.mrb[9].mxu0  ;;  %v2238_v14 = vsel %vm2237_vm3, %v5073_v9, -inf  ;;  %v2241_v15 = vsel %vm2237_vm3, %v5075_v11, -inf }
 0x32b   :  { %v1544_v41 = vpop.f32.mrb[6].mxu1  ;;  %2239 = vmax.xlane.f32.xlu1 %v2238_v14  ;;  %2242 = vmax.xlane.f32.xlu0 %v2241_v15  ;;  %v1590_v42 = vpop.f32.mrb[10].mxu0 }
 0x32c   :  { %v4177_v43 = vpop.f32.mrb[7].mxu1  ;;  %v4183_v44 = vpop.f32.mrb[11].mxu0 }
 0x331   :  { %v5081_v45 = vpop.f32.mrb[8].mxu1  ;;  %v5083_v46 = vpop.f32.mrb[12].mxu0 }
 0x332   :  { %v4188_v47 = vpop.f32.mrb[9].mxu1  ;;  %v4194_v48 = vpop.f32.mrb[13].mxu0  ;;  %v2244_v49 = vsel %vm2237_vm3, %v5081_v45, -inf  ;;  %v2247_v50 = vsel %vm2237_vm3, %v5083_v46, -inf }
 0x333   :  { %v1636_v51 = vpop.f32.mrb[10].mxu1  ;;  %2245 = vmax.xlane.f32.xlu0 %v2244_v49  ;;  %2248 = vmax.xlane.f32.xlu1 %v2247_v50  ;;  %v1682_v52 = vpop.f32.mrb[14].mxu0 }
 0x334   :  { %v4189_v53 = vpop.f32.mrb[11].mxu1  ;;  %v4195_v54 = vpop.f32.mrb[15].mxu0 }
 0x339   :  { %v5089_v55 = vpop.f32.mrb[12].mxu1  ;;  %v5091_v57 = vpop.f32.mrb[16].mxu0 }
 0x33a   :  { %v4200_v58 = vpop.f32.mrb[13].mxu1  ;;  %v4206_v59 = vpop.f32.mrb[17].mxu0  ;;  %v2250_v47 = vsel %vm2237_vm3, %v5089_v55, -inf  ;;  %v2253_v48 = vsel %vm2237_vm3, %v5091_v57, -inf }
 0x33b   :  { %v1728_v60 = vpop.f32.mrb[14].mxu1  ;;  %v1774_v61 = vpop.f32.mrb[18].mxu0 }
 0x33c   :  { %v4201_v62 = vpop.f32.mrb[15].mxu1  ;;  %v4207_v1 = vpop.f32.mrb[19].mxu0 }
 0x341   :  { %v5093_v63 = vpop.f32.mrb[16].mxu1  ;;  %v5095_v2 = vpop.f32.mrb[20].mxu0 }
 0x342   :  { %v4212_v3 = vpop.f32.mrb[17].mxu1  ;;  %v4218_v4 = vpop.f32.mrb[21].mxu0  ;;  %v2256_v49 = vsel %vm2237_vm3, %v5093_v63, -inf  ;;  %v2259_v50 = vsel %vm2237_vm3, %v5095_v2, -inf }
 0x343   :  { %v1820_v5 = vpop.f32.mrb[18].mxu1  ;;  %v1866_v17 = vpop.f32.mrb[22].mxu0 }
 0x344   :  { %v4213_v18 = vpop.f32.mrb[19].mxu1  ;;  %1134 = vrot.lane.b32.xlu1 %v5065_v56, %s4653_s27  ;;  %v4219_v21 = vpop.f32.mrb[23].mxu0 }
 0x349   :  { %v5099_v22 = vpop.f32.mrb[20].mxu1  ;;  %1132 = vrot.lane.b32.xlu0 %v5065_v56, %s4650_s2  ;;  %v5103_v23 = vpop.f32.mrb[24].mxu0 }
 0x34a   :  { %v4224_v24 = vpop.f32.mrb[21].mxu1  ;;  %v4230_v25 = vpop.f32.mrb[25].mxu0  ;;  %v2262_v51 = vsel %vm2237_vm3, %v5099_v22, -inf  ;;  %v2265_v52 = vsel %vm2237_vm3, %v5103_v23, -inf }
 0x34b   :  { %v1912_v6 = vpop.f32.mrb[22].mxu1  ;;  %v1958_v7 = vpop.f32.mrb[26].mxu0 }
 0x34c   :  { %v4225_v19 = vpop.f32.mrb[23].mxu1  ;;  %v4231_v20 = vpop.f32.mrb[27].mxu0 }
 0x351   :  { %v5105_v30 = vpop.f32.mrb[24].mxu1  ;;  %v5107_v31 = vpop.f32.mrb[28].mxu0 }
 0x352   :  { %v4236_v32 = vpop.f32.mrb[25].mxu1  ;;  %v4242_v33 = vpop.f32.mrb[29].mxu0  ;;  %v2268_v53 = vsel %vm2237_vm3, %v5105_v30, -inf  ;;  %v2271_v54 = vsel %vm2237_vm3, %v5107_v31, -inf }
 0x353   :  { %v2004_v26 = vpop.f32.mrb[26].mxu1  ;;  %v2050_v27 = vpop.f32.mrb[30].mxu0 }
 0x354   :  { %v4237_v28 = vpop.f32.mrb[27].mxu1  ;;  %v4243_v29 = vpop.f32.mrb[31].mxu0 }
 0x359   :  { %v5109_v34 = vpop.f32.mrb[28].mxu1  ;;  %v5111_v35 = vpop.f32.mrb[32].mxu0 }
 0x35a   :  { %v4248_v36 = vpop.f32.mrb[29].mxu1  ;;  %v4254_v37 = vpop.f32.mrb[33].mxu0  ;;  %v2274_v58 = vsel %vm2237_vm3, %v5109_v34, -inf  ;;  %v2277_v59 = vsel %vm2237_vm3, %v5111_v35, -inf }
 0x35b   :  { %v2096_v38 = vpop.f32.mrb[30].mxu1  ;;  %v2142_v39 = vpop.f32.mrb[34].mxu0 }
 0x35c   :  { %v4249_v40 = vpop.f32.mrb[31].mxu1  ;;  %v4255_v8 = vpop.f32.mrb[35].mxu0 }
 0x361   :  { %v5113_v12 = vpop.f32.mrb[32].mxu1  ;;  %v5115_v13 = vpop.f32.mrb[36].mxu0 }
 0x362   :  { %v4260_v14 = vpop.f32.mrb[33].mxu1  ;;  %v4266_v15 = vpop.f32.mrb[37].mxu0  ;;  %v2280_v60 = vsel %vm2237_vm3, %v5113_v12, -inf  ;;  %v2283_v61 = vsel %vm2237_vm3, %v5115_v13, -inf }
 0x363   :  { %v2188_v41 = vpop.f32.mrb[34].mxu1  ;;  %v2234_v42 = vpop.f32.mrb[38].mxu0 }
 0x364   :  { %v4261_v43 = vpop.f32.mrb[35].mxu1  ;;  %v4267_v44 = vpop.f32.mrb[39].mxu0 }
 0x365   :  { %v5145_v62 = vpop.permute.xlu1 %1128  ;;  %v5147_v1 = vpop.permute.xlu0 %1126 }
 0x368   :  { %2251 = vmax.xlane.f32.xlu0 %v2250_v47  ;;  %2254 = vmax.xlane.f32.xlu1 %v2253_v48 }
 0x369   :  { %v5149_v3 = vpop.permute.xlu1 %1130 }
 0x36c   :  { %2257 = vmax.xlane.f32.xlu0 %v2256_v49  ;;  %2260 = vmax.xlane.f32.xlu1 %v2259_v50 }
 0x370   :  { %2263 = vmax.xlane.f32.xlu0 %v2262_v51  ;;  %2266 = vmax.xlane.f32.xlu1 %v2265_v52 }
 0x374   :  { %2269 = vmax.xlane.f32.xlu0 %v2268_v53  ;;  %2272 = vmax.xlane.f32.xlu1 %v2271_v54 }
 0x378   :  { %2275 = vmax.xlane.f32.xlu0 %v2274_v58  ;;  %2278 = vmax.xlane.f32.xlu1 %v2277_v59 }
 0x37c   :  { %2281 = vmax.xlane.f32.xlu0 %v2280_v60  ;;  %2284 = vmax.xlane.f32.xlu1 %v2283_v61 }
 0x38d   :  { %1138 = vrot.lane.b32.xlu1 %v5065_v56, %s4654_s28 }
 0x392   :  { %1136 = vrot.lane.b32.xlu0 %v5065_v56, %s4652_s26 }
 0x3b8   :  { %v2240_v4 = vpop.xlane.xlu1 %2239  ;;  %v2243_v5 = vpop.xlane.xlu0 %2242 }
 0x3b9   :  { %v2286_v17 = vsub.f32 %v5073_v9, %v2240_v4  ;;  %v2287_v18 = vsub.f32 %v5075_v11, %v2243_v5 }
 0x3bb   :  { %v2302_v21 = vmul.f32 1.442695, %v2286_v17  ;;  %v2304_v24 = vmul.f32 1.442695, %v2287_v18 }
 0x3bd   :  { %4450 = vpow2.f32 %v2302_v21  ;;  %v1145_v21 = vshrl.u32 %v5147_v1, 16 }
 0x3be   :  { %4452 = vpow2.f32 %v2304_v24 }
 0x3c0   :  { %v2246_v25 = vpop.xlane.xlu0 %2245  ;;  %v2249_v6 = vpop.xlane.xlu1 %2248 }
 0x3c1   :  { %v2288_v7 = vsub.f32 %v5081_v45, %v2246_v25  ;;  %v2289_v19 = vsub.f32 %v5083_v46, %v2249_v6 }
 0x3c3   :  { %v2306_v20 = vmul.f32 1.442695, %v2288_v7  ;;  %v2308_v32 = vmul.f32 1.442695, %v2289_v19 }
 0x3c4   :  { %v5171_v29 = vpop.permute.xlu0 %1132  ;;  %v5173_v36 = vpop.permute.xlu1 %1134 }
 0x3c5   :  { %4454 = vpow2.f32 %v2306_v20  ;;  %v1161_v17 = vshrl.u32 %v5173_v36, 16 }
 0x3c6   :  { %4456 = vpow2.f32 %v2308_v32 }
 0x3c7   :  { %v5155_v33 = vpop.eup %4450 }
 0x3c8   :  { %v5157_v26 = vpop.eup %4452  ;;  %v2334_v9 = vsel %vm2237_vm3, %v5155_v33, 0.0 }
 0x3c9   :  { %2335 = vadd.xlane.f32.xlu0 %v2334_v9  ;;  %v2337_v11 = vsel %vm2237_vm3, %v5157_v26, 0.0 }
 0x3ca   :  { %2338 = vadd.xlane.f32.xlu1 %v2337_v11 }
 0x3cf   :  { %v5163_v27 = vpop.eup %4454 }
 0x3d0   :  { %v2340_v45 = vsel %vm2237_vm3, %v5163_v27, 0.0  ;;  %v5167_v46 = vpop.eup %4456 }
 0x3d1   :  { %2341 = vadd.xlane.f32.xlu0 %v2340_v45  ;;  %v2343_v28 = vsel %vm2237_vm3, %v5167_v46, 0.0  ;;  %v1142_v45 = vpack.i.b16 %v5147_v1, %v5065_v56 }
 0x3d5   :  { %2344 = vadd.xlane.f32.xlu0 %v2343_v28  ;;  %v1153_v28 = vshrl.u32 %v5149_v3, 16 }
 0x3f5   :  { %v2252_v37 = vpop.xlane.xlu0 %2251  ;;  %v2255_v38 = vpop.xlane.xlu1 %2254 }
 0x3f6   :  { %v2290_v39 = vsub.f32 %v5089_v55, %v2252_v37  ;;  %v2291_v40 = vsub.f32 %v5091_v57, %v2255_v38  ;;  %v1152_v37 = vshrl.u32 %v5145_v62, 16 }
 0x3f8   :  { %v2310_v8 = vmul.f32 1.442695, %v2290_v39  ;;  %v2312_v14 = vmul.f32 1.442695, %v2291_v40 }
 0x3f9   :  { %v2258_v15 = vpop.xlane.xlu0 %2257  ;;  %v2261_v41 = vpop.xlane.xlu1 %2260 }
 0x3fa   :  { %4458 = vpow2.f32 %v2310_v8  ;;  %v2292_v42 = vsub.f32 %v5093_v63, %v2258_v15  ;;  %v2293_v43 = vsub.f32 %v5095_v2, %v2261_v41 }
 0x3fb   :  { %4460 = vpow2.f32 %v2312_v14 }
 0x3fc   :  { %v2314_v44 = vmul.f32 1.442695, %v2292_v42  ;;  %v2316_v47 = vmul.f32 1.442695, %v2293_v43 }
 0x3fd   :  { %v2264_v48 = vpop.xlane.xlu0 %2263  ;;  %v2267_v49 = vpop.xlane.xlu1 %2266 }
 0x3fe   :  { %4462 = vpow2.f32 %v2314_v44  ;;  %v2294_v50 = vsub.f32 %v5099_v22, %v2264_v48  ;;  %v2295_v55 = vsub.f32 %v5103_v23, %v2267_v49  ;;  %v1154_v44 = vpack.i.b16 %v1153_v28, %v1152_v37 }
 0x3ff   :  { %4464 = vpow2.f32 %v2316_v47 }
 0x400   :  { %v2318_v57 = vmul.f32 1.442695, %v2294_v50  ;;  %v2320_v51 = vmul.f32 1.442695, %v2295_v55 }
 0x401   :  { %v2270_v52 = vpop.xlane.xlu0 %2269  ;;  %v2273_v53 = vpop.xlane.xlu1 %2272 }
 0x402   :  { %4466 = vpow2.f32 %v2318_v57  ;;  %v2296_v63 = vsub.f32 %v5105_v30, %v2270_v52  ;;  %v2297_v2 = vsub.f32 %v5107_v31, %v2273_v53  ;;  %v1160_v31 = vshrl.u32 %v5171_v29, 16 }
 0x403   :  { %4468 = vpow2.f32 %v2320_v51 }
 0x404   :  { %v5183_v54 = vpop.eup %4458  ;;  %v2322_v58 = vmul.f32 1.442695, %v2296_v63  ;;  %v2324_v59 = vmul.f32 1.442695, %v2297_v2 }
 0x405   :  { %v5185_v60 = vpop.eup %4460  ;;  %v2276_v22 = vpop.xlane.xlu0 %2275  ;;  %v2346_v23 = vsel %vm2237_vm3, %v5183_v54, 0.0 }
 0x406   :  { %v2279_v61 = vpop.xlane.xlu1 %2278  ;;  %4470 = vpow2.f32 %v2322_v58  ;;  %v2298_v4 = vsub.f32 %v5109_v34, %v2276_v22  ;;  %v2349_v30 = vsel %vm2237_vm3, %v5185_v60, 0.0  ;;  %2347 = vadd.xlane.f32.xlu1 %v2346_v23  ;;  %v1144_v34 = vshrl.u32 %v5065_v56, 16 }
 0x407   :  { %v2299_v5 = vsub.f32 %v5111_v35, %v2279_v61  ;;  %4472 = vpow2.f32 %v2324_v59  ;;  %2350 = vadd.xlane.f32.xlu0 %v2349_v30  ;;  %v1158_v35 = vpack.i.b16 %v5173_v36, %v5171_v29  ;;  %v1162_v29 = vpack.i.b16 %v1161_v17, %v1160_v31 }
 0x408   :  { %v5195_v18 = vpop.eup %4462  ;;  %v2326_v24 = vmul.f32 1.442695, %v2298_v4  ;;  %v1146_v38 = vpack.i.b16 %v1145_v21, %v1144_v34 }
 0x409   :  { %v5198_v25 = vpop.eup %4464  ;;  %v2328_v6 = vmul.f32 1.442695, %v2299_v5  ;;  %v2282_v7 = vpop.xlane.xlu0 %2281  ;;  %v2352_v20 = vsel %vm2237_vm3, %v5195_v18, 0.0  ;;  %v1172_v8 = vcombine.low %v1142_v45, %v1158_v35  ;;  %v1173_v14 = vcombine.high %v1142_v45, %v1158_v35 }
 0x40a   :  { %v2285_v19 = vpop.xlane.xlu1 %2284  ;;  %4474 = vpow2.f32 %v2326_v24  ;;  %v2300_v32 = vsub.f32 %v5113_v12, %v2282_v7  ;;  %v2355_v11 = vsel %vm2237_vm3, %v5198_v25, 0.0  ;;  %2353 = vadd.xlane.f32.xlu1 %v2352_v20  ;;  %v1240_v47 = vcombine.low %v1146_v38, %v1162_v29 }
 0x40b   :  { %v2301_v9 = vsub.f32 %v5115_v13, %v2285_v19  ;;  %2356 = vadd.xlane.f32.xlu0 %v2355_v11  ;;  %v1150_v13 = vpack.i.b16 %v5149_v3, %v5145_v62  ;;  %4476 = vpow2.f32 %v2328_v6  ;;  %v1180_v57 = vrot.slane %v1172_v8, %v4786_v10 }
 0x40c   :  { %v5212_v36 = vpop.eup %4466  ;;  %v2330_v39 = vmul.f32 1.442695, %v2300_v32  ;;  %v1187_v51 = vrot.slane %v1173_v14, %v4786_v10  ;;  %v1241_v52 = vcombine.high %v1146_v38, %v1162_v29  ;;  %v1248_v22 = vrot.slane %v1240_v47, %v4786_v10 }
 0x40d   :  { %v2332_v12 = vmul.f32 1.442695, %v2301_v9  ;;  %v5215_v40 = vpop.eup %4468  ;;  %v1137_v15 = vpop.permute.xlu0 %1136  ;;  %v2358_v1 = vsel %vm2237_vm3, %v5212_v36, 0.0 }
 0x40e   :  { %v1139_v56 = vpop.permute.xlu1 %1138  ;;  %v1168_v41 = vshrl.u32 %v1137_v15, 16  ;;  %2359 = vadd.xlane.f32.xlu1 %v2358_v1  ;;  %4478 = vpow2.f32 %v2330_v39  ;;  %v2361_v48 = vsel %vm2237_vm3, %v5215_v40, 0.0  ;;  %v1255_v17 = vrot.slane %v1241_v52, %v4786_v10 }
 0x40f   :  { %v1166_v42 = vpack.i.b16 %v1139_v56, %v1137_v15  ;;  %v1169_v43 = vshrl.u32 %v1139_v56, 16  ;;  %4480 = vpow2.f32 %v2332_v12  ;;  %2362 = vadd.xlane.f32.xlu0 %v2361_v48 }
 0x410   :  { %v5223_v49 = vpop.eup %4470 }
 0x411   :  { %v1170_v62 = vpack.i.b16 %v1169_v43, %v1168_v41  ;;  %v1188_v3 = vcombine.low %v1150_v13, %v1166_v42  ;;  %v1189_v50 = vcombine.high %v1150_v13, %v1166_v42  ;;  %v5225_v55 = vpop.eup %4472  ;;  %v2364_v53 = vsel %vm2237_vm3, %v5223_v49, 0.0 }
 0x412   :  { %2365 = vadd.xlane.f32.xlu1 %v2364_v53  ;;  %v2367_v61 = vsel %vm2237_vm3, %v5225_v55, 0.0 }
 0x413   :  { %v1196_v63 = vrot.slane %v1188_v3, %v4786_v10  ;;  %v1203_v2 = vrot.slane %v1189_v50, %v4786_v10  ;;  %v1256_v58 = vcombine.low %v1154_v44, %v1170_v62  ;;  %v1257_v59 = vcombine.high %v1154_v44, %v1170_v62  ;;  %2368 = vadd.xlane.f32.xlu0 %v2367_v61 }
 0x414   :  { %v5236_v23 = vpop.eup %4474 }
 0x415   :  { %v1204_v4 = vcombine.low %v1180_v57, %v1196_v63  ;;  %v1205_v5 = vcombine.high %v1180_v57, %v1196_v63  ;;  %v1220_v30 = vcombine.low %v1187_v51, %v1203_v2  ;;  %v1221_v31 = vcombine.high %v1187_v51, %v1203_v2  ;;  %v5247_v45 = vpop.eup %4476 }
 0x416   :  { %v1264_v21 = vrot.slane %v1256_v58, %v4786_v10  ;;  %v1271_v24 = vrot.slane %v1257_v59, %v4786_v10  ;;  %v2370_v34 = vsel %vm2237_vm3, %v5236_v23, 0.0  ;;  %v2373_v62 = vsel %vm2237_vm3, %v5247_v45, 0.0 }
 0x417   :  { %v1212_v35 = vrot.slane %v1204_v4, %v4789_v16  ;;  %v1219_v6 = vrot.slane %v1205_v5, %v4789_v16  ;;  %v1228_v7 = vrot.slane %v1220_v30, %v4789_v16  ;;  %v1235_v19 = vrot.slane %v1221_v31, %v4789_v16  ;;  %2371 = vadd.xlane.f32.xlu1 %v2370_v34 }
 0x418   :  { %v1272_v20 = vcombine.low %v1248_v22, %v1264_v21  ;;  %v1273_v32 = vcombine.high %v1248_v22, %v1264_v21  ;;  %v1288_v9 = vcombine.low %v1255_v17, %v1271_v24  ;;  %v1289_v11 = vcombine.high %v1255_v17, %v1271_v24  ;;  %v5249_v39 = vpop.eup %4478  ;;  %2374 = vadd.xlane.f32.xlu0 %v2373_v62 }
 0x419   :  { %v1308_v28 = vcombine.low %v1212_v35, %v1219_v6  ;;  %v4000_v29 = vcombine.high %v1212_v35, %v1219_v6  ;;  %v1324_v37 = vcombine.low %v1228_v7, %v1235_v19  ;;  %v4001_v38 = vcombine.high %v1228_v7, %v1235_v19  ;;  %v5255_v15 = vpop.eup %4480 }
 0x41a   :  { %v1280_v12 = vrot.slane %v1272_v20, %v4789_v16  ;;  %v1287_v13 = vrot.slane %v1273_v32, %v4789_v16  ;;  %v1296_v8 = vrot.slane %v1288_v9, %v4789_v16  ;;  %v1303_v14 = vrot.slane %v1289_v11, %v4789_v16 }
 0x41b   :  { %v1315_v56 = vrot.slane %v1308_v28, %v4786_v10  ;;  %v1323_v1 = vrot.slane %v4000_v29, %v4786_v10  ;;  %v1331_v41 = vrot.slane %v1324_v37, %v4786_v10  ;;  %v1339_v42 = vrot.slane %v4001_v38, %v4786_v10 }
 0x41c   :  { %v1376_v43 = vcombine.low %v1280_v12, %v1287_v13  ;;  %v4002_v44 = vcombine.high %v1280_v12, %v1287_v13  ;;  %v1392_v47 = vcombine.low %v1296_v8, %v1303_v14  ;;  %v4003_v48 = vcombine.high %v1296_v8, %v1303_v14 }
 0x41d   :  { %v2376_v3 = vsel %vm2237_vm3, %v5249_v39, 0.0  ;;  %v1340_v50 = vcombine.low %v1315_v56, %v1323_v1  ;;  %v2379_v57 = vsel %vm2237_vm3, %v5255_v15, 0.0  ;;  %v1356_v51 = vcombine.low %v1331_v41, %v1339_v42 }
 0x41e   :  { %2377 = vadd.xlane.f32.xlu1 %v2376_v3  ;;  %v1383_v52 = vrot.slane %v1376_v43, %v4786_v10  ;;  %v1391_v53 = vrot.slane %v4002_v44, %v4786_v10  ;;  %v1399_v2 = vrot.slane %v1392_v47, %v4786_v10  ;;  %v1407_v58 = vrot.slane %v4003_v48, %v4786_v10 }
 0x41f   :  { %v1348_v63 = vrot.slane %v1340_v50, %v4789_v16  ;;  %v1341_v59 = vcombine.high %v1315_v56, %v1323_v1  ;;  %v1364_v22 = vrot.slane %v1356_v51, %v4789_v16  ;;  %v1357_v4 = vcombine.high %v1331_v41, %v1339_v42  ;;  %2380 = vadd.xlane.f32.xlu0 %v2379_v57 }
 0x420   :  { %v1408_v61 = vcombine.low %v1383_v52, %v1391_v53  ;;  %v1409_v5 = vcombine.high %v1383_v52, %v1391_v53  ;;  %v1424_v30 = vcombine.low %v1399_v2, %v1407_v58  ;;  %v1425_v17 = vcombine.high %v1399_v2, %v1407_v58 }
 0x421   :  { %v1355_v31 = vrot.slane %v1341_v59, %v4789_v16  ;;  %v1373_v24 = vcombine.high %v1348_v63, %v1364_v22  ;;  %v1371_v34 = vrot.slane %v1357_v4, %v4789_v16  ;;  %v1372_v19 = vcombine.low %v1348_v63, %v1364_v22 }
 0x422   :  { %v1416_v21 = vrot.slane %v1408_v61, %v4789_v16  ;;  %v1432_v35 = vrot.slane %v1424_v30, %v4789_v16  ;;  %v1423_v6 = vrot.slane %v1409_v5, %v4789_v16  ;;  %v1439_v7 = vrot.slane %v1425_v17, %v4789_v16 }
 0x423   :  { %v1374_v20 = vcombine.low %v1355_v31, %v1371_v34  ;;  %v1375_v32 = vcombine.high %v1355_v31, %v1371_v34  ;;  %v1453_v13 = vshrl.u32 %v1373_v24, 16 }
 0x424   :  { %v1440_v9 = vcombine.low %v1416_v21, %v1432_v35  ;;  %v1441_v11 = vcombine.high %v1416_v21, %v1432_v35  ;;  %v1442_v28 = vcombine.low %v1423_v6, %v1439_v7  ;;  %v1443_v29 = vcombine.high %v1423_v6, %v1439_v7 }
 0x425   :  { %v1459_v50 = vshrl.u32 %v1374_v20, 16  ;;  %v1465_v59 = vshrl.u32 %v1375_v32, 16 }
 0x426   :  { %v1446_v37 = vpack.i.b16 %v1440_v9, %v1372_v19  ;;  %v1452_v38 = vpack.i.b16 %v1441_v11, %v1373_v24  ;;  %v1454_v12 = vshrl.u32 %v1441_v11, 16  ;;  %v1458_v8 = vpack.i.b16 %v1442_v28, %v1374_v20 }
 0x427   :  { %v1464_v14 = vpack.i.b16 %v1443_v29, %v1375_v32  ;;  %v1460_v42 = vshrl.u32 %v1442_v28, 16  ;;  %v1466_v57 = vshrl.u32 %v1443_v29, 16 }
 0x428   :  { %v4004_v56 = vcombine.low %v1446_v37, %v1446_v37  ;;  %v4005_v1 = vcombine.high %v1446_v37, %v1446_v37  ;;  %v4008_v41 = vcombine.low %v1452_v38, %v1452_v38  ;;  %v4009_v43 = vcombine.high %v1452_v38, %v1452_v38 }
 0x429   :  { %v1455_v44 = vpack.i.b16 %v1454_v12, %v1453_v13  ;;  %v4012_v47 = vcombine.low %v1458_v8, %v1458_v8  ;;  %v4013_v48 = vcombine.high %v1458_v8, %v1458_v8  ;;  %v1461_v4 = vpack.i.b16 %v1460_v42, %v1459_v50 }
 0x42a   :  { %v2435_v62 = vsel %vm2433_vm4, %v4004_v56, 0  ;;  %v2481_v3 = vsel %vm2433_vm4, %v4005_v1, 0  ;;  %v2619_v51 = vsel %vm2433_vm4, %v4008_v41, 0  ;;  %v5283_v52 = vsel %vm2433_vm4, %v4009_v43, 0 }
 0x42b   :  { %4269 = vmatpush3.bf16.msra.mxu1 %v2435_v62  ;;  %4275 = vmatpush3.bf16.msra.mxu0 %v2481_v3  ;;  %v4010_v53 = vcombine.low %v1455_v44, %v1455_v44  ;;  %v4011_v63 = vcombine.high %v1455_v44, %v1455_v44  ;;  %v5288_v2 = vsel %vm2433_vm4, %v4012_v47, 0  ;;  %v5291_v58 = vsel %vm2433_vm4, %v4013_v48, 0 }
 0x42c   :  { %4280 = vmatprep.subr.bf16.mxu1 %v4644_v0  ;;  %4286 = vmatprep.subr.bf16.mxu0 %v4644_v0  ;;  %v4016_v5 = vcombine.low %v1464_v14, %v1464_v14  ;;  %v4017_v30 = vcombine.high %v1464_v14, %v1464_v14  ;;  %v1467_v31 = vpack.i.b16 %v1466_v57, %v1465_v59  ;;  %v1448_v37 = vshrl.u32 %v1440_v9, 16 }
 0x42d   :  { %v5294_v22 = vsel %vm2433_vm4, %v4010_v53, 0  ;;  %v5297_v61 = vsel %vm2433_vm4, %v4011_v63, 0  ;;  %v4014_v17 = vcombine.low %v1461_v4, %v1461_v4  ;;  %v4015_v21 = vcombine.high %v1461_v4, %v1461_v4 }
 0x42e   :  { %v5300_v24 = vsel %vm2433_vm4, %v4016_v5, 0  ;;  %v5303_v34 = vsel %vm2433_vm4, %v4017_v30, 0  ;;  %v4018_v35 = vcombine.low %v1467_v31, %v1467_v31  ;;  %v4019_v6 = vcombine.high %v1467_v31, %v1467_v31 }
 0x42f   :  { %v5306_v7 = vsel %vm2433_vm4, %v4014_v17, 0  ;;  %v5309_v20 = vsel %vm2433_vm4, %v4015_v21, 0  ;;  %v1447_v38 = vshrl.u32 %v1372_v19, 16 }
 0x430   :  { %v5312_v32 = vsel %vm2433_vm4, %v4018_v35, 0  ;;  %v5315_v11 = vsel %vm2433_vm4, %v4019_v6, 0 }
 0x431   :  { %v1449_v13 = vpack.i.b16 %v1448_v37, %v1447_v38 }
 0x433   :  { %v4006_v1 = vcombine.low %v1449_v13, %v1449_v13  ;;  %v4007_v44 = vcombine.high %v1449_v13, %v1449_v13 }
 0x435   :  { %v2527_v9 = vsel %vm2433_vm4, %v4006_v1, 0 }
 0x456   :  { %v2336_v28 = vpop.xlane.xlu0 %2335 }
 0x457   :  { %4482 = vrcp.f32 %v2336_v28  ;;  %v2339_v29 = vpop.xlane.xlu1 %2338 }
 0x458   :  { %4484 = vrcp.f32 %v2339_v29 }
 0x45e   :  { %v2342_v12 = vpop.xlane.xlu0 %2341 }
 0x45f   :  { %4486 = vrcp.f32 %v2342_v12 }
 0x461   :  { %v4483_v8 = vpop.eup %4482 }
 0x462   :  { %v2398_v14 = vmul.f32 %v4483_v8, %v5155_v33  ;;  %v2345_v56 = vpop.xlane.xlu0 %2344  ;;  %v4485_v41 = vpop.eup %4484  ;;  %v2573_v33 = vsel %vm2433_vm4, %v4007_v44, 0 }
 0x463   :  { %4488 = vrcp.f32 %v2345_v56  ;;  %v2399_v42 = vmul.f32 %v4485_v41, %v5157_v26 }
 0x464   :  { %v2414_v43 = vpack.c.bf16 %v2398_v14, %v2398_v14 }
 0x465   :  { %v2415_v47 = vpack.c.bf16 %v2399_v42, %v2399_v42 }
 0x466   :  { %4271 = vmatmul.mubr.msk.bf16.vlgmr.msra.gmra.mrb[36].mxu1 %vm2237_vm3, %v2414_v43 }
 0x467   :  { %4281 = vmatpush3.bf16.msra.mxu1 %v2527_v9  ;;  %4282 = vmatprep.mubr.msk.bf16.mxu1 %vm4645_vm0, %v4644_v0 }
 0x468   :  { %4277 = vmatmul.mubr.msk.bf16.vlgmr.msra.gmra.mrb[40].mxu0 %vm2237_vm3, %v2415_v47  ;;  %4292 = vmatprep.subr.bf16.mxu1 %v4644_v0 }
 0x469   :  { %v4487_v19 = vpop.eup %4486  ;;  %4287 = vmatpush3.bf16.msra.mxu0 %v2573_v33  ;;  %4288 = vmatprep.mubr.msk.bf16.mxu0 %vm4645_vm0, %v4644_v0 }
 0x46a   :  { %v2400_v26 = vmul.f32 %v4487_v19, %v5163_v27  ;;  %4298 = vmatprep.subr.bf16.mxu0 %v4644_v0 }
 0x46c   :  { %v2416_v48 = vpack.c.bf16 %v2400_v26, %v2400_v26 }
 0x46d   :  { %v4489_v62 = vpop.eup %4488 }
 0x46e   :  { %v2401_v3 = vmul.f32 %v4489_v62, %v5167_v46  ;;  %4283 = vmatmul.mubr.msk.bf16.vlgmr.msra.gmra.mrb[40].mxu1 %vm2237_vm3, %v2416_v48 }
 0x46f   :  { %4293 = vmatpush3.bf16.msra.mxu1 %v2619_v51  ;;  %4294 = vmatprep.mubr.msk.bf16.mxu1 %vm4645_vm0, %v4644_v0 }
 0x470   :  { %v2417_v50 = vpack.c.bf16 %v2401_v3, %v2401_v3  ;;  %4304 = vmatprep.subr.bf16.mxu1 %v4644_v0 }
 0x472   :  { %4289 = vmatmul.mubr.msk.bf16.vlgmr.msra.gmra.mrb[44].mxu0 %vm2237_vm3, %v2417_v50 }
 0x473   :  { %4299 = vmatpush3.bf16.msra.mxu0 %v5283_v52  ;;  %4300 = vmatprep.mubr.msk.bf16.mxu0 %vm4645_vm0, %v4644_v0 }
 0x474   :  { %4310 = vmatprep.subr.bf16.mxu0 %v4644_v0 }
 0x493   :  { %v2348_v27 = vpop.xlane.xlu1 %2347 }
 0x494   :  { %v2351_v46 = vpop.xlane.xlu0 %2350  ;;  %4490 = vrcp.f32 %v2348_v27 }
 0x495   :  { %4492 = vrcp.f32 %v2351_v46 }
 0x497   :  { %v2354_v57 = vpop.xlane.xlu1 %2353 }
 0x498   :  { %v2357_v51 = vpop.xlane.xlu0 %2356  ;;  %4494 = vrcp.f32 %v2354_v57 }
 0x499   :  { %4496 = vrcp.f32 %v2357_v51 }
 0x49b   :  { %v2360_v53 = vpop.xlane.xlu1 %2359 }
 0x49c   :  { %v2363_v59 = vpop.xlane.xlu0 %2362  ;;  %4498 = vrcp.f32 %v2360_v53 }
 0x49d   :  { %4500 = vrcp.f32 %v2363_v59 }
 0x49e   :  { %v4491_v63 = vpop.eup %4490 }
 0x49f   :  { %v4493_v4 = vpop.eup %4492  ;;  %v2402_v5 = vmul.f32 %v4491_v63, %v5183_v54  ;;  %v2366_v6 = vpop.xlane.xlu1 %2365 }
 0x4a0   :  { %v2403_v52 = vmul.f32 %v4493_v4, %v5185_v60  ;;  %v2369_v60 = vpop.xlane.xlu0 %2368  ;;  %4502 = vrcp.f32 %v2366_v6 }
 0x4a1   :  { %v2418_v30 = vpack.c.bf16 %v2402_v5, %v2402_v5  ;;  %4504 = vrcp.f32 %v2369_v60 }
 0x4a2   :  { %v4495_v31 = vpop.eup %4494  ;;  %v2419_v17 = vpack.c.bf16 %v2403_v52, %v2403_v52 }
 0x4a3   :  { %v4497_v21 = vpop.eup %4496  ;;  %4295 = vmatmul.mubr.msk.bf16.vlgmr.msra.gmra.mrb[44].mxu1 %vm2237_vm3, %v2418_v30  ;;  %v2404_v35 = vmul.f32 %v4495_v31, %v5195_v18 }
 0x4a4   :  { %4301 = vmatmul.mubr.msk.bf16.vlgmr.msra.gmra.mrb[48].mxu0 %vm2237_vm3, %v2419_v17  ;;  %4305 = vmatpush3.bf16.msra.mxu1 %v5294_v22  ;;  %v2405_v54 = vmul.f32 %v4497_v21, %v5198_v25 }
 0x4a5   :  { %4311 = vmatpush3.bf16.msra.mxu0 %v5297_v61  ;;  %4306 = vmatprep.mubr.msk.bf16.mxu1 %vm4645_vm0, %v4644_v0  ;;  %v2420_v22 = vpack.c.bf16 %v2404_v35, %v2404_v35  ;;  %v2372_v61 = vpop.xlane.xlu1 %2371  ;;  %v2375_v38 = vpop.xlane.xlu0 %2374 }
 0x4a6   :  { %4312 = vmatprep.mubr.msk.bf16.mxu0 %vm4645_vm0, %v4644_v0  ;;  %4316 = vmatprep.subr.bf16.mxu1 %v4644_v0  ;;  %v4499_v18 = vpop.eup %4498  ;;  %v2421_v28 = vpack.c.bf16 %v2405_v54, %v2405_v54  ;;  %4506 = vrcp.f32 %v2372_v61 }
 0x4a7   :  { %4322 = vmatprep.subr.bf16.mxu0 %v4644_v0  ;;  %v4501_v29 = vpop.eup %4500  ;;  %v2406_v25 = vmul.f32 %v4499_v18, %v5212_v36  ;;  %4508 = vrcp.f32 %v2375_v38 }
 0x4a8   :  { %v2407_v37 = vmul.f32 %v4501_v29, %v5215_v40 }
 0x4aa   :  { %v4503_v36 = vpop.eup %4502  ;;  %v2423_v12 = vpack.c.bf16 %v2407_v37, %v2407_v37 }
 0x4ab   :  { %4307 = vmatmul.mubr.msk.bf16.vlgmr.msra.gmra.mrb[48].mxu1 %vm2237_vm3, %v2420_v22  ;;  %v4505_v13 = vpop.eup %4504  ;;  %v2408_v40 = vmul.f32 %v4503_v36, %v5223_v49 }
 0x4ac   :  { %4313 = vmatmul.mubr.msk.bf16.vlgmr.msra.gmra.mrb[52].mxu0 %vm2237_vm3, %v2421_v28  ;;  %4317 = vmatpush3.bf16.msra.mxu1 %v5288_v2  ;;  %v2422_v2 = vpack.c.bf16 %v2406_v25, %v2406_v25  ;;  %v2409_v8 = vmul.f32 %v4505_v13, %v5225_v55  ;;  %v2381_v14 = vpop.xlane.xlu0 %2380 }
 0x4ad   :  { %4323 = vmatpush3.bf16.msra.mxu0 %v5291_v58  ;;  %4318 = vmatprep.mubr.msk.bf16.mxu1 %vm4645_vm0, %v4644_v0  ;;  %v2378_v58 = vpop.xlane.xlu1 %2377 }
 0x4ae   :  { %4324 = vmatprep.mubr.msk.bf16.mxu0 %vm4645_vm0, %v4644_v0  ;;  %4328 = vmatprep.subr.bf16.mxu1 %v4644_v0  ;;  %4510 = vrcp.f32 %v2378_v58  ;;  %v2425_v56 = vpack.c.bf16 %v2409_v8, %v2409_v8 }
 0x4af   :  { %4334 = vmatprep.subr.bf16.mxu0 %v4644_v0  ;;  %4512 = vrcp.f32 %v2381_v14 }
 0x4b0   :  { %v4507_v49 = vpop.eup %4506 }
 0x4b1   :  { %v4509_v1 = vpop.eup %4508  ;;  %v2410_v55 = vmul.f32 %v4507_v49, %v5236_v23 }
 0x4b3   :  { %4319 = vmatmul.mubr.msk.bf16.vlgmr.msra.gmra.mrb[52].mxu1 %vm2237_vm3, %v2422_v2  ;;  %v2426_v41 = vpack.c.bf16 %v2410_v55, %v2410_v55 }
 0x4b4   :  { %4325 = vmatmul.mubr.msk.bf16.vlgmr.msra.gmra.mrb[56].mxu0 %vm2237_vm3, %v2423_v12  ;;  %4329 = vmatpush3.bf16.msra.mxu1 %v5306_v7  ;;  %v2424_v7 = vpack.c.bf16 %v2408_v40, %v2408_v40 }
 0x4b5   :  { %4335 = vmatpush3.bf16.msra.mxu0 %v5309_v20  ;;  %4330 = vmatprep.mubr.msk.bf16.mxu1 %vm4645_vm0, %v4644_v0  ;;  %v2411_v20 = vmul.f32 %v4509_v1, %v5247_v45 }
 0x4b6   :  { %4336 = vmatprep.mubr.msk.bf16.mxu0 %vm4645_vm0, %v4644_v0  ;;  %4340 = vmatprep.subr.bf16.mxu1 %v4644_v0 }
 0x4b7   :  { %4346 = vmatprep.subr.bf16.mxu0 %v4644_v0  ;;  %v2427_v43 = vpack.c.bf16 %v2411_v20, %v2411_v20 }
 0x4b8   :  { %v4511_v42 = vpop.eup %4510 }
 0x4b9   :  { %v2412_v23 = vmul.f32 %v4511_v42, %v5249_v39 }
 0x4bb   :  { %4331 = vmatmul.mubr.msk.bf16.vlgmr.msra.gmra.mrb[56].mxu1 %vm2237_vm3, %v2424_v7 }
 0x4bc   :  { %4337 = vmatmul.mubr.msk.bf16.vlgmr.msra.gmra.mrb[60].mxu0 %vm2237_vm3, %v2425_v56  ;;  %4341 = vmatpush3.bf16.msra.mxu1 %v5300_v24  ;;  %v4513_v24 = vpop.eup %4512 }
 0x4bd   :  { %4347 = vmatpush3.bf16.msra.mxu0 %v5303_v34  ;;  %4342 = vmatprep.mubr.msk.bf16.mxu1 %vm4645_vm0, %v4644_v0  ;;  %v2413_v45 = vmul.f32 %v4513_v24, %v5255_v15  ;;  %v2428_v34 = vpack.c.bf16 %v2412_v23, %v2412_v23 }
 0x4be   :  { %4348 = vmatprep.mubr.msk.bf16.mxu0 %vm4645_vm0, %v4644_v0  ;;  %4352 = vmatprep.subr.bf16.mxu1 %v4644_v0 }
 0x4bf   :  { %4358 = vmatprep.subr.bf16.mxu0 %v4644_v0  ;;  %v2429_v44 = vpack.c.bf16 %v2413_v45, %v2413_v45 }
 0x4c3   :  { %4343 = vmatmul.mubr.msk.bf16.vlgmr.msra.gmra.mrb[60].mxu1 %vm2237_vm3, %v2426_v41 }
 0x4c4   :  { %4349 = vmatmul.mubr.msk.bf16.vlgmr.msra.gmra.mrb[64].mxu0 %vm2237_vm3, %v2427_v43  ;;  %4353 = vmatpush3.bf16.msra.mxu1 %v5312_v32 }
 0x4c5   :  { %4359 = vmatpush3.bf16.msra.mxu0 %v5315_v11  ;;  %4354 = vmatprep.mubr.msk.bf16.mxu1 %vm4645_vm0, %v4644_v0 }
 0x4c6   :  { %4360 = vmatprep.mubr.msk.bf16.mxu0 %vm4645_vm0, %v4644_v0  ;;  %4364 = vmatprep.subr.bf16.mxu1 %v4644_v0 }
 0x4cb   :  { %4355 = vmatmul.mubr.msk.bf16.vlgmr.msra.gmra.mrb[64].mxu1 %vm2237_vm3, %v2428_v34 }
 0x4cc   :  { %4361 = vmatmul.mubr.msk.bf16.vlgmr.msra.gmra.mrb[68].mxu0 %vm2237_vm3, %v2429_v44  ;;  %4368 = vmatprep.mubr.msk.bf16.mxu1 %vm4645_vm0, %v4644_v0 }
 0x539   :  { %v2471_v39 = vpop.f32.mrb[36].mxu1 }
 0x53a   :  { %v4272_v32 = vpop.f32.mrb[37].mxu1 }
 0x53b   :  { %v2517_v11 = vpop.f32.mrb[40].mxu0  ;;  %v2474_v47 = vpop.f32.mrb[38].mxu1 }
 0x53c   :  { %v4278_v9 = vpop.f32.mrb[41].mxu0  ;;  %v4273_v15 = vpop.f32.mrb[39].mxu1 }
 0x53d   :  { %v2520_v33 = vpop.f32.mrb[42].mxu0 }
 0x53e   :  { %v4279_v19 = vpop.f32.mrb[43].mxu0 }
 0x541   :  { %v2563_v26 = vpop.f32.mrb[40].mxu1 }
 0x542   :  { %v4284_v48 = vpop.f32.mrb[41].mxu1 }
 0x543   :  { %v2566_v62 = vpop.f32.mrb[42].mxu1 }
 0x544   :  { %v4285_v3 = vpop.f32.mrb[43].mxu1 }
 0x545   :  { %v2609_v50 = vpop.f32.mrb[44].mxu0 }
 0x546   :  { %v4290_v27 = vpop.f32.mrb[45].mxu0 }
 0x547   :  { %v2612_v46 = vpop.f32.mrb[46].mxu0 }
 0x548   :  { %v4291_v57 = vpop.f32.mrb[47].mxu0 }
 0x576   :  { %v2655_v51 = vpop.f32.mrb[44].mxu1 }
 0x577   :  { %v3167_v53 = vcombine.low %v2471_v39, %v2655_v51  ;;  %v3168_v63 = vcombine.high %v2471_v39, %v2655_v51  ;;  %v2701_v59 = vpop.f32.mrb[48].mxu0  ;;  %v4296_v4 = vpop.f32.mrb[45].mxu1 }
 0x578   :  { %v3303_v5 = vcombine.low %v2517_v11, %v2701_v59  ;;  %v3304_v52 = vcombine.high %v2517_v11, %v2701_v59  ;;  %v4302_v30 = vpop.f32.mrb[49].mxu0  ;;  %v2658_v31 = vpop.f32.mrb[46].mxu1 }
 0x579   :  { %v2704_v17 = vpop.f32.mrb[50].mxu0  ;;  %v4297_v21 = vpop.f32.mrb[47].mxu1  ;;  %v3175_v37 = vrot.slane %v3167_v53, %v4786_v10  ;;  %v3182_v38 = vrot.slane %v3168_v63, %v4786_v10 }
 0x57a   :  { %v4303_v35 = vpop.f32.mrb[51].mxu0  ;;  %v3311_v40 = vrot.slane %v3303_v5, %v4786_v10  ;;  %v3318_v58 = vrot.slane %v3304_v52, %v4786_v10 }
 0x57e   :  { %v2747_v6 = vpop.f32.mrb[48].mxu1 }
 0x57f   :  { %v3183_v54 = vcombine.low %v2563_v26, %v2747_v6  ;;  %v3184_v60 = vcombine.high %v2563_v26, %v2747_v6  ;;  %v2793_v22 = vpop.f32.mrb[52].mxu0  ;;  %v4308_v18 = vpop.f32.mrb[49].mxu1 }
 0x580   :  { %v3319_v28 = vcombine.low %v2609_v50, %v2793_v22  ;;  %v3320_v29 = vcombine.high %v2609_v50, %v2793_v22  ;;  %v4314_v25 = vpop.f32.mrb[53].mxu0  ;;  %v2750_v61 = vpop.f32.mrb[50].mxu1 }
 0x581   :  { %v3191_v2 = vrot.slane %v3183_v54, %v4786_v10  ;;  %v3198_v36 = vrot.slane %v3184_v60, %v4786_v10  ;;  %v2796_v12 = vpop.f32.mrb[54].mxu0  ;;  %v4309_v13 = vpop.f32.mrb[51].mxu1 }
 0x582   :  { %v3327_v8 = vrot.slane %v3319_v28, %v4786_v10  ;;  %v3334_v14 = vrot.slane %v3320_v29, %v4786_v10  ;;  %v4315_v7 = vpop.f32.mrb[55].mxu0 }
 0x583   :  { %v3231_v49 = vcombine.low %v3175_v37, %v3191_v2  ;;  %v3232_v56 = vcombine.high %v3175_v37, %v3191_v2  ;;  %v3247_v1 = vcombine.low %v3182_v38, %v3198_v36  ;;  %v3248_v55 = vcombine.high %v3182_v38, %v3198_v36 }
 0x584   :  { %v3367_v20 = vcombine.low %v3311_v40, %v3327_v8  ;;  %v3368_v41 = vcombine.high %v3311_v40, %v3327_v8  ;;  %v3383_v42 = vcombine.low %v3318_v58, %v3334_v14  ;;  %v3384_v43 = vcombine.high %v3318_v58, %v3334_v14 }
 0x585   :  { %v3239_v24 = vrot.slane %v3231_v49, %v4789_v16  ;;  %v3246_v23 = vrot.slane %v3232_v56, %v4789_v16  ;;  %v3255_v45 = vrot.slane %v3247_v1, %v4789_v16  ;;  %v3262_v34 = vrot.slane %v3248_v55, %v4789_v16 }
 0x586   :  { %v3375_v44 = vrot.slane %v3367_v20, %v4789_v16  ;;  %v3382_v39 = vrot.slane %v3368_v41, %v4789_v16  ;;  %v3391_v32 = vrot.slane %v3383_v42, %v4789_v16  ;;  %v3398_v11 = vrot.slane %v3384_v43, %v4789_v16  ;;  %v5421_v47 = vpop.f32.mrb[52].mxu1 }
 0x587   :  { %v4052_v9 = vcombine.low %v3239_v24, %v3246_v23  ;;  %v4054_v15 = vcombine.high %v3239_v24, %v3246_v23  ;;  %v4056_v33 = vcombine.low %v3255_v45, %v3262_v34  ;;  %v4058_v19 = vcombine.high %v3255_v45, %v3262_v34  ;;  %v5423_v26 = vpop.f32.mrb[56].mxu0  ;;  %v4320_v48 = vpop.f32.mrb[53].mxu1 }
 0x588   :  { %v4060_v62 = vcombine.low %v3375_v44, %v3382_v39  ;;  %v4062_v3 = vcombine.high %v3375_v44, %v3382_v39  ;;  %v4064_v50 = vcombine.low %v3391_v32, %v3398_v11  ;;  %v4066_v27 = vcombine.high %v3391_v32, %v3398_v11  ;;  %v4326_v46 = vpop.f32.mrb[57].mxu0  ;;  %v2842_v57 = vpop.f32.mrb[54].mxu1 }
 0x589   :  { %v3447_v51 = vrot.slane %v4052_v9, %v4786_v10  ;;  %v3463_v53 = vrot.slane %v4054_v15, %v4786_v10  ;;  %v3479_v63 = vrot.slane %v4056_v33, %v4786_v10  ;;  %v3495_v59 = vrot.slane %v4058_v19, %v4786_v10  ;;  %v2888_v4 = vpop.f32.mrb[58].mxu0  ;;  %v4321_v5 = vpop.f32.mrb[55].mxu1 }
 0x58a   :  { %v3583_v52 = vrot.slane %v4060_v62, %v4786_v10  ;;  %v3599_v30 = vrot.slane %v4062_v3, %v4786_v10  ;;  %v3615_v31 = vrot.slane %v4064_v50, %v4786_v10  ;;  %v3631_v17 = vrot.slane %v4066_v27, %v4786_v10  ;;  %v4327_v21 = vpop.f32.mrb[59].mxu0 }
 0x58b   :  { %v3504_v35 = vcombine.high %v3447_v51, %v3463_v53  ;;  %v3536_v6 = vcombine.high %v3479_v63, %v3495_v59  ;;  %v3503_v54 = vcombine.low %v3447_v51, %v3463_v53  ;;  %v3535_v60 = vcombine.low %v3479_v63, %v3495_v59 }
 0x58c   :  { %v3640_v22 = vcombine.high %v3583_v52, %v3599_v30  ;;  %v3672_v18 = vcombine.high %v3615_v31, %v3631_v17  ;;  %v3639_v28 = vcombine.low %v3583_v52, %v3599_v30  ;;  %v3671_v29 = vcombine.low %v3615_v31, %v3631_v17 }
 0x58d   :  { %v3518_v25 = vrot.slane %v3504_v35, %v4789_v16  ;;  %v3550_v61 = vrot.slane %v3536_v6, %v4789_v16  ;;  %v5436_v37 = vrot.slane %v3503_v54, %v4789_v16  ;;  %v5439_v38 = vrot.slane %v3535_v60, %v4789_v16 }
 0x58e   :  { %v2931_v2 = vpop.f32.mrb[56].mxu1  ;;  %v3654_v36 = vrot.slane %v3640_v22, %v4789_v16  ;;  %v3686_v12 = vrot.slane %v3672_v18, %v4789_v16  ;;  %v5444_v13 = vrot.slane %v3639_v28, %v4789_v16  ;;  %v5447_v40 = vrot.slane %v3671_v29, %v4789_v16 }
 0x58f   :  { %v2977_v58 = vpop.f32.mrb[60].mxu0  ;;  %v4332_v8 = vpop.f32.mrb[57].mxu1  ;;  %v3569_v14 = vcombine.low %v3518_v25, %v3550_v61  ;;  %v3567_v7 = vcombine.low %v5436_v37, %v5439_v38  ;;  %v3568_v49 = vcombine.high %v5436_v37, %v5439_v38  ;;  %v3570_v56 = vcombine.high %v3518_v25, %v3550_v61 }
 0x590   :  { %v4338_v1 = vpop.f32.mrb[61].mxu0  ;;  %v2934_v55 = vpop.f32.mrb[58].mxu1  ;;  %v3705_v20 = vcombine.low %v3654_v36, %v3686_v12  ;;  %v3704_v41 = vcombine.high %v5444_v13, %v5447_v40  ;;  %v3703_v42 = vcombine.low %v5444_v13, %v5447_v40  ;;  %v3706_v43 = vcombine.high %v3654_v36, %v3686_v12 }
 0x591   :  { %v2980_v24 = vpop.f32.mrb[62].mxu0  ;;  %v4333_v23 = vpop.f32.mrb[59].mxu1 }
 0x592   :  { %v4339_v45 = vpop.f32.mrb[63].mxu0  ;;  %v4404_v34 = vpack.i.bf16 %v3705_v20, %v3569_v14  ;;  %v4399_v44 = vpack.i.bf16 %v3704_v41, %v3568_v49  ;;  %v4409_v39 = vpack.i.bf16 %v3706_v43, %v3570_v56 }
 0x594   :  { %4405 = vrot.lane.b32.xlu0 %v4404_v34, %s4656_s6  ;;  %4400 = vrot.lane.b32.xlu1 %v4399_v44, %s4638_s20  ;;  %s4658_s20 = smov 20  }
 0x596   :  { %v3023_v32 = vpop.f32.mrb[60].mxu1 }
 0x597   :  { %v3199_v11 = vcombine.low %v5421_v47, %v3023_v32  ;;  %v3200_v9 = vcombine.high %v5421_v47, %v3023_v32  ;;  %v3069_v15 = vpop.f32.mrb[64].mxu0  ;;  %v4344_v33 = vpop.f32.mrb[61].mxu1 }
 0x598   :  { %v3335_v19 = vcombine.low %v5423_v26, %v3069_v15  ;;  %v3336_v48 = vcombine.high %v5423_v26, %v3069_v15  ;;  %4410 = vrot.lane.b32.xlu1 %v4409_v39, %s4657_s13  ;;  %v4350_v62 = vpop.f32.mrb[65].mxu0  ;;  %v3026_v3 = vpop.f32.mrb[62].mxu1 }
 0x599   :  { %v3072_v50 = vpop.f32.mrb[66].mxu0  ;;  %v4345_v27 = vpop.f32.mrb[63].mxu1  ;;  %v3207_v30 = vrot.slane %v3199_v11, %v4786_v10  ;;  %v3214_v26 = vrot.slane %v3200_v9, %v4786_v10 }
 0x59a   :  { %v4351_v46 = vpop.f32.mrb[67].mxu0  ;;  %v3343_v6 = vrot.slane %v3335_v19, %v4786_v10  ;;  %v3350_v54 = vrot.slane %v3336_v48, %v4786_v10  ;;  %v4444_v19 = vld [vmem:[#allocation8] sm:$0xff]  }
 0x59b   :  { %4365 = vmatpush3.bf16.msra.mxu1 %v4444_v19 }
 0x59c   :  { %4366 = vmatprep.subr.bf16.mxu1 %v4644_v0 }
 0x59e   :  { %v3115_v57 = vpop.f32.mrb[64].mxu1 }
 0x59f   :  { %v3215_v51 = vcombine.low %v2931_v2, %v3115_v57  ;;  %v3216_v53 = vcombine.high %v2931_v2, %v3115_v57  ;;  %v3161_v63 = vpop.f32.mrb[68].mxu0  ;;  %v4356_v59 = vpop.f32.mrb[65].mxu1 }
 0x5a0   :  { %v3351_v4 = vcombine.low %v2977_v58, %v3161_v63  ;;  %v3352_v47 = vcombine.high %v2977_v58, %v3161_v63  ;;  %v4362_v5 = vpop.f32.mrb[69].mxu0  ;;  %v3118_v52 = vpop.f32.mrb[66].mxu1 }
 0x5a1   :  { %v3223_v31 = vrot.slane %v3215_v51, %v4786_v10  ;;  %v3230_v17 = vrot.slane %v3216_v53, %v4786_v10  ;;  %v3164_v21 = vpop.f32.mrb[70].mxu0  ;;  %v4357_v35 = vpop.f32.mrb[67].mxu1 }
 0x5a2   :  { %v3359_v60 = vrot.slane %v3351_v4, %v4786_v10  ;;  %v3366_v22 = vrot.slane %v3352_v47, %v4786_v10  ;;  %v4363_v18 = vpop.f32.mrb[71].mxu0 }
 0x5a3   :  { %v3263_v28 = vcombine.low %v3207_v30, %v3223_v31  ;;  %v3264_v29 = vcombine.high %v3207_v30, %v3223_v31  ;;  %v3279_v25 = vcombine.low %v3214_v26, %v3230_v17  ;;  %v3280_v61 = vcombine.high %v3214_v26, %v3230_v17 }
 0x5a4   :  { %v3399_v2 = vcombine.low %v3343_v6, %v3359_v60  ;;  %v3400_v36 = vcombine.high %v3343_v6, %v3359_v60  ;;  %v3415_v12 = vcombine.low %v3350_v54, %v3366_v22  ;;  %v3416_v58 = vcombine.high %v3350_v54, %v3366_v22  ;;  %v4445_v22 = vld [vmem:[#allocation8 + $0x8] sm:$0xff]  }
 0x5a5   :  { %v3271_v8 = vrot.slane %v3263_v28, %v4789_v16  ;;  %v3278_v14 = vrot.slane %v3264_v29, %v4789_v16  ;;  %v3287_v49 = vrot.slane %v3279_v25, %v4789_v16  ;;  %v3294_v56 = vrot.slane %v3280_v61, %v4789_v16  ;;  %4367 = vmatpush3.bf16.msra.mxu1 %v4445_v22 }
 0x5a6   :  { %v3407_v1 = vrot.slane %v3399_v2, %v4789_v16  ;;  %v3414_v55 = vrot.slane %v3400_v36, %v4789_v16  ;;  %v3423_v20 = vrot.slane %v3415_v12, %v4789_v16  ;;  %v3430_v41 = vrot.slane %v3416_v58, %v4789_v16 }
 0x5a7   :  { %v4053_v43 = vcombine.low %v3271_v8, %v3278_v14  ;;  %v4055_v24 = vcombine.high %v3271_v8, %v3278_v14  ;;  %v4057_v23 = vcombine.low %v3287_v49, %v3294_v56  ;;  %v4059_v45 = vcombine.high %v3287_v49, %v3294_v56 }
 0x5a8   :  { %v4061_v34 = vcombine.low %v3407_v1, %v3414_v55  ;;  %v4063_v44 = vcombine.high %v3407_v1, %v3414_v55  ;;  %v4065_v39 = vcombine.low %v3423_v20, %v3430_v41  ;;  %v4067_v32 = vcombine.high %v3423_v20, %v3430_v41 }
 0x5a9   :  { %v3454_v11 = vrot.slane %v4053_v43, %v4786_v10  ;;  %v3470_v9 = vrot.slane %v4055_v24, %v4786_v10  ;;  %v3486_v15 = vrot.slane %v4057_v23, %v4786_v10  ;;  %v3502_v33 = vrot.slane %v4059_v45, %v4786_v10 }
 0x5aa   :  { %v3590_v48 = vrot.slane %v4061_v34, %v4786_v10  ;;  %v3606_v62 = vrot.slane %v4063_v44, %v4786_v10  ;;  %v3622_v3 = vrot.slane %v4065_v39, %v4786_v10  ;;  %v3638_v50 = vrot.slane %v4067_v32, %v4786_v10 }
 0x5ab   :  { %v3519_v27 = vcombine.low %v3454_v11, %v3470_v9  ;;  %v3551_v46 = vcombine.low %v3486_v15, %v3502_v33  ;;  %v3520_v57 = vcombine.high %v3454_v11, %v3470_v9  ;;  %v3552_v51 = vcombine.high %v3486_v15, %v3502_v33 }
 0x5ac   :  { %v3655_v53 = vcombine.low %v3590_v48, %v3606_v62  ;;  %v3687_v63 = vcombine.low %v3622_v3, %v3638_v50  ;;  %v3656_v59 = vcombine.high %v3590_v48, %v3606_v62  ;;  %v3688_v4 = vcombine.high %v3622_v3, %v3638_v50 }
 0x5ad   :  { %v3527_v47 = vrot.slane %v3519_v27, %v4789_v16  ;;  %v3559_v5 = vrot.slane %v3551_v46, %v4789_v16  ;;  %v3534_v52 = vrot.slane %v3520_v57, %v4789_v16  ;;  %v3566_v30 = vrot.slane %v3552_v51, %v4789_v16 }
 0x5ae   :  { %v3663_v26 = vrot.slane %v3655_v53, %v4789_v16  ;;  %v3695_v31 = vrot.slane %v3687_v63, %v4789_v16  ;;  %v3670_v17 = vrot.slane %v3656_v59, %v4789_v16  ;;  %v3702_v21 = vrot.slane %v3688_v4, %v4789_v16  ;;  %v4068_v53 = vld [vmem:[%s5554_s8] ss:$0 sm:$0xff]  ;;  %s4662_s8 = smov [#allocation10]  }
 0x5af   :  { %v3572_v35 = vcombine.high %v3527_v47, %v3559_v5  ;;  %v3571_v6 = vcombine.low %v3527_v47, %v3559_v5  ;;  %v3574_v54 = vcombine.high %v3534_v52, %v3566_v30  ;;  %v3573_v60 = vcombine.low %v3534_v52, %v3566_v30  ;;  %s3934_s16 = sshll.u32 %s4662_s8, 4  ;;  %s3935_s16 = int_to_ptr.vmem [resolvable:$true] %s3934_s16 }
 0x5b0   :  { %v3708_v18 = vcombine.high %v3663_v26, %v3695_v31  ;;  %v3707_v28 = vcombine.low %v3663_v26, %v3695_v31  ;;  %v3710_v29 = vcombine.high %v3670_v17, %v3702_v21  ;;  %v3709_v25 = vcombine.low %v3670_v17, %v3702_v21  ;;  %s4606_s7 = scalar_lea.vmem %s3935_s16, 256  ;;  %p4611_p5 = scmp.lt.s32.totalorder %s3935_s16, %s3935_s16 }
 0x5b1   :  { %p4607_p4 = scmp.ne.s32.totalorder %s3935_s16, %s4606_s7  ;;  %p4612_p6 = scmp.lt.s32.totalorder %s4606_s7, %s4606_s7 }
 0x5b2   :  { %v4419_v61 = vpack.i.bf16 %v3708_v18, %v3572_v35  ;;  %v4414_v2 = vpack.i.bf16 %v3707_v28, %v3571_v6  ;;  %v4429_v36 = vpack.i.bf16 %v3710_v29, %v3574_v54  ;;  %v4424_v12 = vpack.i.bf16 %v3709_v25, %v3573_v60 }
 0x5b3   :  { %p4613_p7 = por %p4612_p6, %p4611_p5 }
 0x5b4   :  { %4420 = vrot.lane.b32.xlu0 %v4419_v61, %s4658_s20  ;;  %4415 = vrot.lane.b32.xlu1 %v4414_v2, %s4659_s14 }
 0x5b5   :  { %p4614_p8 = pnand %p4613_p7, %p4607_p4 }
 0x5b8   :  { %4430 = vrot.lane.b32.xlu0 %v4429_v36, %s4660_s15  ;;  %4425 = vrot.lane.b32.xlu1 %v4424_v12, %s4661_s17 }
 0x606   :  { %v4401_v58 = vpop.permute.xlu1 %4400  ;;  %v4406_v8 = vpop.permute.xlu0 %4405 }
 0x607   :  { %v4403_v14 = vunpack.i.h.bf16 %v4401_v58  ;;  %v4402_v49 = vunpack.i.l.bf16 %v4401_v58  ;;  %v4408_v1 = vunpack.i.h.bf16 %v4406_v8  ;;  %v4407_v55 = vunpack.i.l.bf16 %v4406_v8 }
 0x609   :  { %v3767_v20 = vsel %vm1500_vm2, %v3567_v7, %v4402_v49  ;;  %v3768_v41 = vsel %vm1500_vm2, %v3703_v42, %v4403_v14 }
 0x60a   :  { %v4411_v56 = vpop.permute.xlu1 %4410  ;;  %v3769_v34 = vsel %vm2237_vm3, %v3767_v20, %v4407_v55  ;;  %v3770_v44 = vsel %vm2237_vm3, %v3768_v41, %v4408_v1 }
 0x60b   :  { %v4413_v43 = vunpack.i.h.bf16 %v4411_v56  ;;  %v4412_v24 = vunpack.i.l.bf16 %v4411_v56 }
 0x60d   :  { %v3772_v37 = vsel %vm3771_vm5, %v3769_v34, %v4412_v24  ;;  %v3773_v38 = vsel %vm3771_vm5, %v3770_v44, %v4413_v43 }
 0x626   :  { %v4421_v23 = vpop.permute.xlu0 %4420  ;;  %v4416_v45 = vpop.permute.xlu1 %4415 }
 0x627   :  { %v4418_v39 = vunpack.i.h.bf16 %v4416_v45  ;;  %v4417_v32 = vunpack.i.l.bf16 %v4416_v45  ;;  %v4423_v7 = vunpack.i.h.bf16 %v4421_v23  ;;  %v4422_v11 = vunpack.i.l.bf16 %v4421_v23 }
 0x629   :  { %v3776_v9 = vsel %vm3774_vm6, %v3773_v38, %v4418_v39  ;;  %v3775_v13 = vsel %vm3774_vm6, %v3772_v37, %v4417_v32 }
 0x62a   :  { %v4431_v40 = vpop.permute.xlu0 %4430  ;;  %v4426_v42 = vpop.permute.xlu1 %4425  ;;  %v3778_v62 = vsel %vm3777_vm7, %v3775_v13, %v4422_v11  ;;  %v3779_v3 = vsel %vm3777_vm7, %v3776_v9, %v4423_v7 }
 0x62b   :  { %v4433_v15 = vunpack.i.h.bf16 %v4431_v40  ;;  %v4432_v33 = vunpack.i.l.bf16 %v4431_v40  ;;  %v4428_v19 = vunpack.i.h.bf16 %v4426_v42  ;;  %v4427_v48 = vunpack.i.l.bf16 %v4426_v42 }
 0x62d   :  { %v3781_v50 = vsel %vm3780_vm8, %v3778_v62, %v4427_v48  ;;  %v3782_v27 = vsel %vm3780_vm8, %v3779_v3, %v4428_v19 }
 0x62e   :  { %v3784_v46 = vsel %vm3783_vm9, %v3781_v50, %v4432_v33  ;;  %v3785_v57 = vsel %vm3783_vm9, %v3782_v27, %v4433_v15 }
 0x62f   :  { %v3786_v51 = vpack.c.bf16 %v3785_v57, %v3784_v46 }
 0x631   :  { %4369 = vmatmul.mubr.msk.bf16.vlgmr.msra.gmra.mrb[68].mxu1 %vm171_vm1, %v3786_v51 }
 0x704   :  { %v3847_v63 = vpop.f32.mrb[68].mxu1 }
 0x705   :  { %v3848_v59 = vadd.f32 %v4068_v53, %v3847_v63  ;;  %v4370_v4 = vpop.f32.mrb[69].mxu1 }
 0x706   :  { %v3850_v47 = vpop.f32.mrb[70].mxu1 }
 0x707   :  { %v3854_v5 = vcombine.high %v3848_v59, %v4644_v0  ;;  %v3851_v52 = vadd.f32 %v4068_v53, %v3850_v47  ;;  %v4371_v30 = vpop.f32.mrb[71].mxu1  ;;  %v3861_v26 = vrot.slane %v3848_v59, %v4786_v10 }
 0x709   :  { %v3869_v31 = vcombine.high %v3851_v52, %v4644_v0  ;;  %v3876_v17 = vrot.slane %v3851_v52, %v4786_v10  ;;  %v3868_v21 = vrot.slane %v3854_v5, %v4786_v10 }
 0x70b   :  { %v3883_v35 = vrot.slane %v3869_v31, %v4786_v10  ;;  %v3884_v6 = vcombine.low %v3861_v26, %v3876_v17  ;;  %v3885_v54 = vcombine.high %v3861_v26, %v3876_v17 }
 0x70d   :  { %v3892_v60 = vrot.slane %v3884_v6, %v4789_v16  ;;  %v3899_v22 = vrot.slane %v3885_v54, %v4789_v16  ;;  %v3900_v18 = vcombine.low %v3868_v21, %v3883_v35  ;;  %v3901_v28 = vcombine.high %v3868_v21, %v3883_v35 }
 0x70f   :  { %v3908_v29 = vrot.slane %v3900_v18, %v4789_v16  ;;  %v3915_v25 = vrot.slane %v3901_v28, %v4789_v16  ;;  %v3916_v61 = vcombine.high %v3892_v60, %v4644_v0  ;;  %v3917_v2 = vcombine.high %v3899_v22, %v4644_v0  ;;  %3921 = vst.msk [vmem:[#allocation10] sm:$0x3] %vm3920_vm10, %v3892_v60 }
 0x710   :  { %3923 = vst.msk [vmem:[#allocation10 + $0x4] sm:$0x3] %vm3920_vm10, %v3899_v22 }
 0x711   :  { %v3918_v10 = vcombine.high %v3908_v29, %v4644_v0  ;;  %v3919_v36 = vcombine.high %v3915_v25, %v4644_v0  ;;  %3922 = vst.msk [vmem:[#allocation10 + $0x2] sm:$0x3] %vm3920_vm10, %v3916_v61  ;;  %3924 = vst.msk [vmem:[#allocation10 + $0x6] sm:$0x3] %vm3920_vm10, %v3917_v2 }
 0x712   :  { %3925 = vst.msk [vmem:[#allocation10 + $0x8] sm:$0x3] %vm3920_vm10, %v3908_v29  ;;  %3927 = vst.msk [vmem:[#allocation10 + $0xc] sm:$0x3] %vm3920_vm10, %v3915_v25 }
 0x713   :  { %3926 = vst.msk [vmem:[#allocation10 + $0xa] sm:$0x3] %vm3920_vm10, %v3918_v10  ;;  %3928 = vst.msk [vmem:[#allocation10 + $0xe] sm:$0x3] %vm3920_vm10, %v3919_v36 }
 0x714   :  { %4617 = shalt.err (!%p4614_p8)
}
 0x715   :  { %s4618_s23 = scalar_lea.hbm %s5555_s9, 256 }
 0x716   :  { %p4619_p9 = scmp.ne.s32.totalorder %s5555_s9, %s4618_s23  ;;  %p4622_p10 = scmp.lt.u32.totalorder %s4618_s23, %s5555_s9 }
 0x718   :  { %p4624_p11 = pnand %p4622_p10, %p4619_p9 }
 0x71a   :  { %4627 = shalt.err (!%p4624_p11)
}
 0x71b   :  { %3940 = dma.vmem_to_hbm [thread:$0]  %s3935_s16, 256, %s5555_s9, [#allocation4], %s4640_s1, %s4640_s1, %s4641_s10  }
 0x71c   :  { %4634 = dma.done.wait [#allocation4], 256  }
 0x71d   :  { %4635 = vsyncadd [#allocation4], 4294967040 }
 0x71e   :  { %3944 = vsyncpa [#allocation3], 1 }
 0x71f   :  { %3945 = vsyncpa [#allocation6], 1 }
 0x720   :  { %3946 = vsyncpa [#allocation9], 1 }
 0x721   :  { %3947 = vsyncpa [#allocation4], 1 }

</bundles_post_ra>
